<compile_context>
chip_gen: v7x
topology: tpu7x:2x2x1
jax: 0.10.0
libtpu: 0.0.40
codegen_flags: <defaults>
</compile_context>

<pallas_src>
import jax
import jax.numpy as jnp
from jax.experimental import pallas as pl
from jax.experimental.pallas import tpu as pltpu

LATENT_DIM = 2
IN_DIM = 784
XHAT_PAD = 896   # 7 * 128  (lane-dense xhat / dec3 output width)
Z_PAD = 128      # lane-dense latent width
DEFAULT_TILE_B = 256


def _round_up(n, m):
    return ((n + m - 1) // m) * m


# -----------------------------------------------------------------------------
# Kernel
# -----------------------------------------------------------------------------
def ae_kernel(x_ref, w1_ref, w2_ref, w3_ref, w4_ref, w5_ref, w6_ref, b_ref,
              xhat_ref, z_ref):
    """Full AE forward for one batch tile.  All weights/biases VMEM-resident."""

    def layer(h, w_ref, bias_row, n_out, act):
        # bf16 x bf16 -> f32 accumulation on the MXU.
        y = jnp.dot(h.astype(jnp.bfloat16), w_ref[...],
                    preferred_element_type=jnp.float32)
        y = y + b_ref[bias_row:bias_row + 1, 0:n_out]      # (1, n_out) broadcast
        if act == "relu":
            return jnp.maximum(y, 0.0)
        # sigmoid: exp + approximate reciprocal both run on the EUP slot.
        return pl.reciprocal(1.0 + jnp.exp(-y), approx=True)

    # ---- encode ----
    h = layer(x_ref[...], w1_ref, 0, 32, "relu")        # (tb, 32)
    h = layer(h, w2_ref, 1, 16, "relu")                 # (tb, 16)
    z = layer(h, w3_ref, 2, Z_PAD, "relu")              # (tb, 128); cols >= 2 are 0

    # ---- decode ----  (padded z cols are 0 and padded w4 rows are 0 -> no effect)
    d = layer(z, w4_ref, 3, 16, "relu")                 # (tb, 16)
    d = layer(d, w5_ref, 4, 32, "relu")                 # (tb, 32)
    xhat = layer(d, w6_ref, 5, XHAT_PAD, "sigmoid")     # (tb, 896); cols >= 784 junk

    xhat_ref[...] = xhat                                # full-lane, unmasked stores
    z_ref[...] = z


# -----------------------------------------------------------------------------
# One-time parameter preparation (hoisted out of the per-call path)
# -----------------------------------------------------------------------------
def prepare_params(params, dtype=jnp.bfloat16):
    """Convert PyTorch-layout (out, in) f32 params into kernel operand layout.

    Returns (w1, w2, w3, w4, w5, w6, bias_pack):
      w1 (784,32) w2 (32,16) w3 (16,128) w4 (128,16) w5 (16,32) w6 (32,896), all bf16,
      bias_pack (8, 896) f32 with bias i zero-padded into row i.
    """
    (w1, b1), (w2, b2), (w3, b3), (w4, b4), (w5, b5), (w6, b6) = params

    def t(w):
        return jnp.asarray(w, jnp.float32).T

    w1t = t(w1).astype(dtype)                                              # (784, 32)
    w2t = t(w2).astype(dtype)                                              # (32, 16)
    w3t = jnp.zeros((16, Z_PAD), jnp.float32).at[:, :LATENT_DIM].set(t(w3)).astype(dtype)
    w4t = jnp.zeros((Z_PAD, 16), jnp.float32).at[:LATENT_DIM, :].set(t(w4)).astype(dtype)
    w5t = t(w5).astype(dtype)                                              # (16, 32)
    w6t = jnp.zeros((32, XHAT_PAD), jnp.float32).at[:, :IN_DIM].set(t(w6)).astype(dtype)

    bias = jnp.zeros((8, XHAT_PAD), jnp.float32)
    bias = bias.at[0, :32].set(jnp.asarray(b1, jnp.float32))
    bias = bias.at[1, :16].set(jnp.asarray(b2, jnp.float32))
    bias = bias.at[2, :LATENT_DIM].set(jnp.asarray(b3, jnp.float32))
    bias = bias.at[3, :16].set(jnp.asarray(b4, jnp.float32))
    bias = bias.at[4, :32].set(jnp.asarray(b5, jnp.float32))
    bias = bias.at[5, :IN_DIM].set(jnp.asarray(b6, jnp.float32))

    return (w1t, w2t, w3t, w4t, w5t, w6t, bias)


# -----------------------------------------------------------------------------
# Forward wrapper
# -----------------------------------------------------------------------------
def ae_forward(x, prepared, *, tile_b=DEFAULT_TILE_B):
    """Run the AE forward pass. Returns (xHat, z), matching the PyTorch module."""
    B = x.shape[0]
    tile_b = max(8, min(tile_b, _round_up(B, 8)))       # keep tile <= (padded) batch
    Bp = _round_up(B, tile_b)
    x_in = x if Bp == B else jnp.pad(x, ((0, Bp - B), (0, 0)))

    w1, w2, w3, w4, w5, w6, bias = prepared
    grid = (Bp // tile_b,)

    const = lambda i: (0, 0)   # VMEM-resident across grid steps
    xhat_pad, z_pad = pl.pallas_call(
        ae_kernel,
        grid=grid,
        in_specs=[
            pl.BlockSpec((tile_b, IN_DIM), lambda i: (i, 0)),   # x (streamed)
            pl.BlockSpec((IN_DIM, 32), const),                  # w1
            pl.BlockSpec((32, 16), const),                      # w2
            pl.BlockSpec((16, Z_PAD), const),                   # w3
            pl.BlockSpec((Z_PAD, 16), const),                   # w4
            pl.BlockSpec((16, 32), const),                      # w5
            pl.BlockSpec((32, XHAT_PAD), const),                # w6
            pl.BlockSpec((8, XHAT_PAD), const),                 # packed biases
        ],
        out_specs=(
            pl.BlockSpec((tile_b, XHAT_PAD), lambda i: (i, 0)),
            pl.BlockSpec((tile_b, Z_PAD), lambda i: (i, 0)),
        ),
        out_shape=(
            jax.ShapeDtypeStruct((Bp, XHAT_PAD), jnp.float32),
            jax.ShapeDtypeStruct((Bp, Z_PAD), jnp.float32),
        ),
        compiler_params=pltpu.CompilerParams(
            dimension_semantics=("parallel",)),   # megacore sharding on v7x
    )(x_in, w1, w2, w3, w4, w5, w6, bias)

    return xhat_pad[:B, :IN_DIM], z_pad[:B, :LATENT_DIM]


# -----------------------------------------------------------------------------
# Parameter init & references (for the self-check)
# -----------------------------------------------------------------------------
def init_params(key):
    """Deterministic synthetic params with PyTorch nn.Linear shapes (out, in)."""
    layer_dims = [
        (32, IN_DIM),         # fc_enc1
        (16, 32),             # fc_enc2
        (LATENT_DIM, 16),     # fc_enc3
        (16, LATENT_DIM),     # fc_dec1
        (32, 16),             # fc_dec2
        (IN_DIM, 32),         # fc_dec3
    ]
    params = []
    for (out_f, in_f) in layer_dims:
        key, kw, kb = jax.random.split(key, 3)
        bound = 1.0 / (in_f ** 0.5)
        w = jax.random.uniform(kw, (out_f, in_f), jnp.float32, -bound, bound)
        b = jax.random.uniform(kb, (out_f,), jnp.float32, -bound, bound)
        params.append((w, b))
    return params


def _reference_f32(x, params):
    """Pure-f32 plain-JAX reference (module semantics)."""
    h = x
    z = None
    for i, (w, b) in enumerate(params):
        y = h @ w.T + b
        h = jnp.maximum(y, 0.0) if i < 5 else 1.0 / (1.0 + jnp.exp(-y))
        if i == 2:
            z = h
    return h, z


def _reference_bf16(x, params):
    """Reference that matches the kernel's bf16-matmul / f32-accumulate math."""
    h = x
    z = None
    for i, (w, b) in enumerate(params):
        y = jnp.dot(h.astype(jnp.bfloat16),
                    jnp.asarray(w, jnp.float32).T.astype(jnp.bfloat16),
                    preferred_element_type=jnp.float32) + jnp.asarray(b, jnp.float32)
        h = jnp.maximum(y, 0.0) if i < 5 else 1.0 / (1.0 + jnp.exp(-y))
        if i == 2:
            z = h
    return h, z


if __name__ == "__main__":
    key = jax.random.PRNGKey(0)
    kx, kp = jax.random.split(key)

    B = 512
    x = jax.random.uniform(kx, (B, IN_DIM), jnp.float32)   # MNIST-like flattened input
    params = init_params(kp)

    prepared = prepare_params(params)      # one-time prep (hoisted out of call path)
    fwd = jax.jit(lambda xx: ae_forward(xx, prepared, tile_b=DEFAULT_TILE_B))

    xhat, z = fwd(x)
    jax.block_until_ready((xhat, z))

    assert xhat.shape == (B, IN_DIM) and z.shape == (B, LATENT_DIM)

    # Tight check vs a bf16-matmul-matched reference (accounts for MXU bf16 path).
    xhat_m, z_m = _reference_bf16(x, params)
    assert jnp.allclose(z, z_m, atol=5e-3), "z mismatch vs bf16-matched reference"
    assert jnp.allclose(xhat, xhat_m, atol=3e-2), "xHat mismatch vs bf16-matched reference"

    # Loose sanity check vs the pure-f32 module semantics.
    xhat_f, z_f = _reference_f32(x, params)
    assert jnp.allclose(z, z_f, atol=8e-2), "z mismatch vs f32 reference"
    assert jnp.allclose(xhat, xhat_f, atol=8e-2), "xHat mismatch vs f32 reference"

    print("KERNEL_OK")
</pallas_src>

<mosaic_0001>
module attributes {stable_mosaic.version = 11 : i64} {
  func.func @ae_kernel(%arg0: i32, %arg1: memref<256x784xf32, #tpu.memory_space<vmem>>, %arg2: memref<784x32xbf16, #tpu.memory_space<vmem>>, %arg3: memref<32x16xbf16, #tpu.memory_space<vmem>>, %arg4: memref<16x128xbf16, #tpu.memory_space<vmem>>, %arg5: memref<128x16xbf16, #tpu.memory_space<vmem>>, %arg6: memref<16x32xbf16, #tpu.memory_space<vmem>>, %arg7: memref<32x896xbf16, #tpu.memory_space<vmem>>, %arg8: memref<8x896xf32, #tpu.memory_space<vmem>>, %arg9: memref<256x896xf32, #tpu.memory_space<vmem>>, %arg10: memref<256x128xf32, #tpu.memory_space<vmem>>) attributes {dimension_semantics = [#tpu.dimension_semantics<parallel>], iteration_bounds = array<i64: 2>, scalar_prefetch = 0 : i64, scratch_operands = 0 : i64, tpu.core_type = #tpu.core_type<tc>, window_params = [{transform_indices = @transform_0, window_bounds = array<i64: 256, 784>}, {pipeline_mode = #tpu.pipeline_mode<synchronous>, transform_indices = @transform_1, window_bounds = array<i64: 784, 32>}, {pipeline_mode = #tpu.pipeline_mode<synchronous>, transform_indices = @transform_2, window_bounds = array<i64: 32, 16>}, {pipeline_mode = #tpu.pipeline_mode<synchronous>, transform_indices = @transform_3, window_bounds = array<i64: 16, 128>}, {pipeline_mode = #tpu.pipeline_mode<synchronous>, transform_indices = @transform_4, window_bounds = array<i64: 128, 16>}, {pipeline_mode = #tpu.pipeline_mode<synchronous>, transform_indices = @transform_5, window_bounds = array<i64: 16, 32>}, {pipeline_mode = #tpu.pipeline_mode<synchronous>, transform_indices = @transform_6, window_bounds = array<i64: 32, 896>}, {pipeline_mode = #tpu.pipeline_mode<synchronous>, transform_indices = @transform_7, window_bounds = array<i64: 8, 896>}, {transform_indices = @transform_8, window_bounds = array<i64: 256, 896>}, {transform_indices = @transform_9, window_bounds = array<i64: 256, 128>}]} {
    %c0 = arith.constant 0 : index
    %c0_0 = arith.constant 0 : index
    %0 = vector.load %arg1[%c0, %c0_0] : memref<256x784xf32, #tpu.memory_space<vmem>>, vector<256x784xf32>
    %1 = arith.truncf %0 : vector<256x784xf32> to vector<256x784xbf16>
    %c0_1 = arith.constant 0 : index
    %c0_2 = arith.constant 0 : index
    %2 = vector.load %arg2[%c0_1, %c0_2] : memref<784x32xbf16, #tpu.memory_space<vmem>>, vector<784x32xbf16>
    %cst = arith.constant dense<0.000000e+00> : vector<256x32xf32>
    %3 = tpu.matmul %1, %2, %cst {dimension_numbers = #tpu.dot_dimension_numbers<[1], [0], [0], [1], [0, 0, 1, 1], [], []>} : vector<256x784xbf16>, vector<784x32xbf16>, vector<256x32xf32> -> vector<256x32xf32>
    %c0_3 = arith.constant 0 : index
    %c0_4 = arith.constant 0 : index
    %4 = vector.load %arg8[%c0_3, %c0_4] : memref<8x896xf32, #tpu.memory_space<vmem>>, vector<1x32xf32>
    %5 = vector.broadcast %4 : vector<1x32xf32> to vector<256x32xf32>
    %6 = arith.addf %3, %5 : vector<256x32xf32>
    %cst_5 = arith.constant 0.000000e+00 : f32
    %7 = vector.broadcast %cst_5 : f32 to vector<256x32xf32>
    %8 = arith.maximumf %6, %7 : vector<256x32xf32>
    %9 = arith.truncf %8 : vector<256x32xf32> to vector<256x32xbf16>
    %c0_6 = arith.constant 0 : index
    %c0_7 = arith.constant 0 : index
    %10 = vector.load %arg3[%c0_6, %c0_7] : memref<32x16xbf16, #tpu.memory_space<vmem>>, vector<32x16xbf16>
    %cst_8 = arith.constant dense<0.000000e+00> : vector<256x16xf32>
    %11 = tpu.matmul %9, %10, %cst_8 {dimension_numbers = #tpu.dot_dimension_numbers<[1], [0], [0], [1], [0, 0, 1, 1], [], []>} : vector<256x32xbf16>, vector<32x16xbf16>, vector<256x16xf32> -> vector<256x16xf32>
    %c1 = arith.constant 1 : index
    %c0_9 = arith.constant 0 : index
    %12 = vector.load %arg8[%c1, %c0_9] : memref<8x896xf32, #tpu.memory_space<vmem>>, vector<1x16xf32>
    %13 = vector.broadcast %12 : vector<1x16xf32> to vector<256x16xf32>
    %14 = arith.addf %11, %13 : vector<256x16xf32>
    %cst_10 = arith.constant 0.000000e+00 : f32
    %15 = vector.broadcast %cst_10 : f32 to vector<256x16xf32>
    %16 = arith.maximumf %14, %15 : vector<256x16xf32>
    %17 = arith.truncf %16 : vector<256x16xf32> to vector<256x16xbf16>
    %c0_11 = arith.constant 0 : index
    %c0_12 = arith.constant 0 : index
    %18 = vector.load %arg4[%c0_11, %c0_12] : memref<16x128xbf16, #tpu.memory_space<vmem>>, vector<16x128xbf16>
    %cst_13 = arith.constant dense<0.000000e+00> : vector<256x128xf32>
    %19 = tpu.matmul %17, %18, %cst_13 {dimension_numbers = #tpu.dot_dimension_numbers<[1], [0], [0], [1], [0, 0, 1, 1], [], []>} : vector<256x16xbf16>, vector<16x128xbf16>, vector<256x128xf32> -> vector<256x128xf32>
    %c2 = arith.constant 2 : index
    %c0_14 = arith.constant 0 : index
    %20 = vector.load %arg8[%c2, %c0_14] : memref<8x896xf32, #tpu.memory_space<vmem>>, vector<1x128xf32>
    %21 = vector.broadcast %20 : vector<1x128xf32> to vector<256x128xf32>
    %22 = arith.addf %19, %21 : vector<256x128xf32>
    %cst_15 = arith.constant 0.000000e+00 : f32
    %23 = vector.broadcast %cst_15 : f32 to vector<256x128xf32>
    %24 = arith.maximumf %22, %23 : vector<256x128xf32>
    %25 = arith.truncf %24 : vector<256x128xf32> to vector<256x128xbf16>
    %c0_16 = arith.constant 0 : index
    %c0_17 = arith.constant 0 : index
    %26 = vector.load %arg5[%c0_16, %c0_17] : memref<128x16xbf16, #tpu.memory_space<vmem>>, vector<128x16xbf16>
    %cst_18 = arith.constant dense<0.000000e+00> : vector<256x16xf32>
    %27 = tpu.matmul %25, %26, %cst_18 {dimension_numbers = #tpu.dot_dimension_numbers<[1], [0], [0], [1], [0, 0, 1, 1], [], []>} : vector<256x128xbf16>, vector<128x16xbf16>, vector<256x16xf32> -> vector<256x16xf32>
    %c3 = arith.constant 3 : index
    %c0_19 = arith.constant 0 : index
    %28 = vector.load %arg8[%c3, %c0_19] : memref<8x896xf32, #tpu.memory_space<vmem>>, vector<1x16xf32>
    %29 = vector.broadcast %28 : vector<1x16xf32> to vector<256x16xf32>
    %30 = arith.addf %27, %29 : vector<256x16xf32>
    %cst_20 = arith.constant 0.000000e+00 : f32
    %31 = vector.broadcast %cst_20 : f32 to vector<256x16xf32>
    %32 = arith.maximumf %30, %31 : vector<256x16xf32>
    %33 = arith.truncf %32 : vector<256x16xf32> to vector<256x16xbf16>
    %c0_21 = arith.constant 0 : index
    %c0_22 = arith.constant 0 : index
    %34 = vector.load %arg6[%c0_21, %c0_22] : memref<16x32xbf16, #tpu.memory_space<vmem>>, vector<16x32xbf16>
    %cst_23 = arith.constant dense<0.000000e+00> : vector<256x32xf32>
    %35 = tpu.matmul %33, %34, %cst_23 {dimension_numbers = #tpu.dot_dimension_numbers<[1], [0], [0], [1], [0, 0, 1, 1], [], []>} : vector<256x16xbf16>, vector<16x32xbf16>, vector<256x32xf32> -> vector<256x32xf32>
    %c4 = arith.constant 4 : index
    %c0_24 = arith.constant 0 : index
    %36 = vector.load %arg8[%c4, %c0_24] : memref<8x896xf32, #tpu.memory_space<vmem>>, vector<1x32xf32>
    %37 = vector.broadcast %36 : vector<1x32xf32> to vector<256x32xf32>
    %38 = arith.addf %35, %37 : vector<256x32xf32>
    %cst_25 = arith.constant 0.000000e+00 : f32
    %39 = vector.broadcast %cst_25 : f32 to vector<256x32xf32>
    %40 = arith.maximumf %38, %39 : vector<256x32xf32>
    %41 = arith.truncf %40 : vector<256x32xf32> to vector<256x32xbf16>
    %c0_26 = arith.constant 0 : index
    %c0_27 = arith.constant 0 : index
    %42 = vector.load %arg7[%c0_26, %c0_27] : memref<32x896xbf16, #tpu.memory_space<vmem>>, vector<32x896xbf16>
    %cst_28 = arith.constant dense<0.000000e+00> : vector<256x896xf32>
    %43 = tpu.matmul %41, %42, %cst_28 {dimension_numbers = #tpu.dot_dimension_numbers<[1], [0], [0], [1], [0, 0, 1, 1], [], []>} : vector<256x32xbf16>, vector<32x896xbf16>, vector<256x896xf32> -> vector<256x896xf32>
    %c5 = arith.constant 5 : index
    %c0_29 = arith.constant 0 : index
    %44 = vector.load %arg8[%c5, %c0_29] : memref<8x896xf32, #tpu.memory_space<vmem>>, vector<1x896xf32>
    %45 = vector.broadcast %44 : vector<1x896xf32> to vector<256x896xf32>
    %46 = arith.addf %43, %45 : vector<256x896xf32>
    %cst_30 = arith.constant 0.000000e+00 : f32
    %47 = vector.broadcast %cst_30 : f32 to vector<256x896xf32>
    %48 = arith.subf %47, %46 : vector<256x896xf32>
    %49 = math.exp %48 : vector<256x896xf32>
    %cst_31 = arith.constant 1.000000e+00 : f32
    %50 = vector.broadcast %cst_31 : f32 to vector<256x896xf32>
    %51 = arith.addf %50, %49 : vector<256x896xf32>
    %52 = tpu.reciprocal %51 {approx = true} : vector<256x896xf32> -> vector<256x896xf32>
    %c0_32 = arith.constant 0 : index
    %c0_33 = arith.constant 0 : index
    %53 = vector.load %arg9[%c0_32, %c0_33] : memref<256x896xf32, #tpu.memory_space<vmem>>, vector<256x896xf32>
    tpu.vector_store %arg9[%c0_32, %c0_33], %52 {strides = array<i32>} : memref<256x896xf32, #tpu.memory_space<vmem>>, vector<256x896xf32>,
    %c0_34 = arith.constant 0 : index
    %c0_35 = arith.constant 0 : index
    %54 = vector.load %arg10[%c0_34, %c0_35] : memref<256x128xf32, #tpu.memory_space<vmem>>, vector<256x128xf32>
    tpu.vector_store %arg10[%c0_34, %c0_35], %24 {strides = array<i32>} : memref<256x128xf32, #tpu.memory_space<vmem>>, vector<256x128xf32>,
    return
  }
  func.func @transform_0(%arg0: i32) -> (i32, i32) {
    %c0_i32 = arith.constant 0 : i32
    %c0_i32_0 = arith.constant 0 : i32
    return %arg0, %c0_i32 : i32, i32
  }
  func.func @transform_1(%arg0: i32) -> (i32, i32) {
    %c0_i32 = arith.constant 0 : i32
    %c0_i32_0 = arith.constant 0 : i32
    %c0_i32_1 = arith.constant 0 : i32
    return %c0_i32, %c0_i32_0 : i32, i32
  }
  func.func @transform_2(%arg0: i32) -> (i32, i32) {
    %c0_i32 = arith.constant 0 : i32
    %c0_i32_0 = arith.constant 0 : i32
    %c0_i32_1 = arith.constant 0 : i32
    return %c0_i32, %c0_i32_0 : i32, i32
  }
  func.func @transform_3(%arg0: i32) -> (i32, i32) {
    %c0_i32 = arith.constant 0 : i32
    %c0_i32_0 = arith.constant 0 : i32
    %c0_i32_1 = arith.constant 0 : i32
    return %c0_i32, %c0_i32_0 : i32, i32
  }
  func.func @transform_4(%arg0: i32) -> (i32, i32) {
    %c0_i32 = arith.constant 0 : i32
    %c0_i32_0 = arith.constant 0 : i32
    %c0_i32_1 = arith.constant 0 : i32
    return %c0_i32, %c0_i32_0 : i32, i32
  }
  func.func @transform_5(%arg0: i32) -> (i32, i32) {
    %c0_i32 = arith.constant 0 : i32
    %c0_i32_0 = arith.constant 0 : i32
    %c0_i32_1 = arith.constant 0 : i32
    return %c0_i32, %c0_i32_0 : i32, i32
  }
  func.func @transform_6(%arg0: i32) -> (i32, i32) {
    %c0_i32 = arith.constant 0 : i32
    %c0_i32_0 = arith.constant 0 : i32
    %c0_i32_1 = arith.constant 0 : i32
    return %c0_i32, %c0_i32_0 : i32, i32
  }
  func.func @transform_7(%arg0: i32) -> (i32, i32) {
    %c0_i32 = arith.constant 0 : i32
    %c0_i32_0 = arith.constant 0 : i32
    %c0_i32_1 = arith.constant 0 : i32
    return %c0_i32, %c0_i32_0 : i32, i32
  }
  func.func @transform_8(%arg0: i32) -> (i32, i32) {
    %c0_i32 = arith.constant 0 : i32
    %c0_i32_0 = arith.constant 0 : i32
    return %arg0, %c0_i32 : i32, i32
  }
  func.func @transform_9(%arg0: i32) -> (i32, i32) {
    %c0_i32 = arith.constant 0 : i32
    %c0_i32_0 = arith.constant 0 : i32
    return %arg0, %c0_i32 : i32, i32
  }
}

</mosaic_0001>

<bundles_post_ra>
// kernel: _lambda_.1
= control target key start
LH: loop header
LB: loop body
LE: loop exit
PB: predicated region body
PF: predicated region fallthrough
CT: control target
= control target key end

     0   :  { %s7224_s30 = smov 0   ;;  %s9431_s0 = inlined_call_operand.vmem [shape: f32[512,784], index: 0, kind: input, shape index: {}]   ;;  %s9432_s1 = inlined_call_operand.vmem [shape: bf16[784,32], index: 1, kind: input, shape index: {}]   ;;  %s9433_s2 = inlined_call_operand.vmem [shape: bf16[32,16], index: 2, kind: input, shape index: {}]   ;;  %s9434_s3 = inlined_call_operand.vmem [shape: bf16[16,128], index: 3, kind: input, shape index: {}]   ;;  %s9435_s4 = inlined_call_operand.vmem [shape: bf16[128,16], index: 4, kind: input, shape index: {}]   ;;  %s9436_s5 = inlined_call_operand.vmem [shape: bf16[16,32], index: 5, kind: input, shape index: {}]   ;;  %s9437_s6 = inlined_call_operand.vmem [shape: bf16[32,896], index: 6, kind: input, shape index: {}]   ;;  %s9438_s7 = inlined_call_operand.vmem [shape: f32[8,896], index: 7, kind: input, shape index: {}]   ;;  %s9439_s8 = inlined_call_operand.vmem [shape: f32[512,896], index: 8, kind: output, shape index: {0}]   ;;  %s9440_s9 = inlined_call_operand.vmem [shape: f32[512,128], index: 9, kind: output, shape index: {1}]  }
   0x1 LB: > { %s5291_s10 = sadd.s32 4294967295, %s7171_s30   ;;  %p5295_p0 = scmp.ge.s32.totalorder %s7171_s30, 1  ;;  %s7171_s30 = sphi %s7224_s30, %s20_s30  }
   0x2   : > { %p292_p1 = scmp.lt.s32.totalorder %s7171_s30, 3 }
   0x4   : > { %p293_p2 = pnand %p5295_p0, %p292_p1 }
   0x6   : > { %296 = sbr.rel (%p293_p2) target bundleno = 1985 (0x7c1), region = 52 }
   0xd   : > { %v6188_v0 = vld [vmem:[%s9432_s1 + $0x40] sm:$0xff]   ;;  %v6192_v4 = vld [vmem:[%s9432_s1 + $0x48] sm:$0xff]   ;;  %v6196_v8 = vld [vmem:[%s9432_s1 + $0x50] sm:$0xff]   ;;  %s5296_s20 = sshll.u32 %s5291_s10, 5  ;;  %vm1085_vm0 = vcmask 130048   ;;  %vm1843_vm1 = vcmask 261120  }
   0xe   : > { %v6189_v1 = vld [vmem:[%s9432_s1] sm:$0xff]   ;;  %5509 = vmatprep.subr.bf16.mxu0 %v6188_v0  ;;  %v6193_v5 = vld [vmem:[%s9432_s1 + $0x8] sm:$0xff]   ;;  %v6197_v9 = vld [vmem:[%s9432_s1 + $0x10] sm:$0xff]   ;;  %p336_p3 = scmp.lt.s32.totalorder %s5296_s20, 63 }
   0xf   : > { %v6190_v2 = vld [vmem:[%s9432_s1 + $0xc0] sm:$0xff]   ;;  %5510 = vmatpush3.bf16.msra.mxu0 %v6189_v1  ;;  %v6194_v6 = vld [vmem:[%s9432_s1 + $0xc8] sm:$0xff]   ;;  %v6198_v10 = vld [vmem:[%s9432_s1 + $0xd0] sm:$0xff]  }
  0x10   : > { %v6191_v3 = vld [vmem:[%s9432_s1 + $0x80] sm:$0xff]   ;;  %5621 = vmatprep.subr.bf16.mxu1 %v6190_v2  ;;  %5511 = vmatprep.subr.bf16.mxu0 %v6192_v4  ;;  %v6195_v7 = vld [vmem:[%s9432_s1 + $0x88] sm:$0xff]   ;;  %v6199_v11 = vld [vmem:[%s9432_s1 + $0x90] sm:$0xff]   ;;  %s9552_s20 = smov (!%p336_p3, %s5296_s20), 63 }
  0x11   : > { %5622 = vmatpush3.bf16.msra.mxu1 %v6191_v3  ;;  %v6200_v12 = vld [vmem:[%s9432_s1 + $0x58] sm:$0xff]   ;;  %v6204_v16 = vld [vmem:[%s9432_s1 + $0x60] sm:$0xff]   ;;  %v6208_v20 = vld [vmem:[%s9432_s1 + $0x68] sm:$0xff]   ;;  %s6178_s24 = smul.u32 56, %s9552_s20  ;;  %s5301_s16 = sshll.u32 %s9552_s20, 3 }
  0x12   : > { %5623 = vmatprep.subr.bf16.mxu1 %v6194_v6  ;;  %v6201_v13 = vld [vmem:[%s9432_s1 + $0x18] sm:$0xff]   ;;  %v6205_v17 = vld [vmem:[%s9432_s1 + $0x20] sm:$0xff]   ;;  %v6209_v21 = vld [vmem:[%s9432_s1 + $0x28] sm:$0xff]   ;;  %s7933_s19 = scalar_lea.vmem %s9440_s9, %s5301_s16 }
  0x13   : > { %5512 = vmatpush3.bf16.msra.mxu0 %v6193_v5  ;;  %v6202_v14 = vld [vmem:[%s9432_s1 + $0xd8] sm:$0xff]   ;;  %v6206_v18 = vld [vmem:[%s9432_s1 + $0xe0] sm:$0xff]   ;;  %v6210_v22 = vld [vmem:[%s9432_s1 + $0xe8] sm:$0xff]   ;;  %s7329_s15 = scalar_lea.vmem %s9431_s0, %s6178_s24  ;;  %s8398_s23 = scalar_lea.vmem %s9439_s8, %s6178_s24 }
  0x14   : > { %5513 = vmatprep.subr.bf16.mxu0 %v6196_v8  ;;  %v6203_v15 = vld [vmem:[%s9432_s1 + $0x98] sm:$0xff]   ;;  %v6207_v19 = vld [vmem:[%s9432_s1 + $0xa0] sm:$0xff]   ;;  %v6211_v23 = vld [vmem:[%s9432_s1 + $0xa8] sm:$0xff]  }
  0x15   : > { %5624 = vmatpush3.bf16.msra.mxu1 %v6195_v7  ;;  %v6212_v24 = vld [vmem:[%s9432_s1 + $0x70] sm:$0xff]   ;;  %v6216_v28 = vld [vmem:[%s9432_s1 + $0x78] sm:$0xff]   ;;  %v357_v31 = vld [vmem:[%s7329_s15 + $0x8] sm:$0xff] }
  0x16   : > { %5625 = vmatprep.subr.bf16.mxu1 %v6198_v10  ;;  %v6213_v25 = vld [vmem:[%s9432_s1 + $0x30] sm:$0xff]   ;;  %v6217_v29 = vld [vmem:[%s9432_s1 + $0x38] sm:$0xff]   ;;  %v364_v32 = vld [vmem:[%s7329_s15 + $0x40] sm:$0xff] }
  0x17   : > { %5514 = vmatpush3.bf16.msra.mxu0 %v6197_v9  ;;  %v6214_v26 = vld [vmem:[%s9432_s1 + $0xf0] sm:$0xff]   ;;  %v6218_v30 = vld [vmem:[%s9432_s1 + $0xf8] sm:$0xff]   ;;  %v581_v33 = vpack.c.bf16 %v364_v32, %v357_v31  ;;  %v356_v35 = vld [vmem:[%s7329_s15] sm:$0xff] }
  0x18   : > { %5515 = vmatprep.subr.bf16.mxu0 %v6200_v12  ;;  %v6215_v27 = vld [vmem:[%s9432_s1 + $0xb0] sm:$0xff]   ;;  %v6219_v34 = vld [vmem:[%s9432_s1 + $0xb8] sm:$0xff]   ;;  %v6220_v38 = vld [vmem:[%s9432_s1 + $0x140] sm:$0xff]  }
  0x19   : > { %5626 = vmatpush3.bf16.msra.mxu1 %v6199_v11  ;;  %v363_v36 = vld [vmem:[%s7329_s15 + $0x38] sm:$0xff]  ;;  %1166 = vmatprep.mubr.bf16.mxu0 %v581_v33  ;;  %v366_v40 = vld [vmem:[%s7329_s15 + $0x50] sm:$0xff]  ;;  %v6221_v42 = vld [vmem:[%s9432_s1 + $0x100] sm:$0xff]  }
  0x1a   : > { %5627 = vmatprep.subr.bf16.mxu1 %v6202_v14  ;;  %v580_v37 = vpack.c.bf16 %v363_v36, %v356_v35  ;;  %v359_v39 = vld [vmem:[%s7329_s15 + $0x18] sm:$0xff]  ;;  %v358_v43 = vld [vmem:[%s7329_s15 + $0x10] sm:$0xff]  ;;  %v365_v44 = vld [vmem:[%s7329_s15 + $0x48] sm:$0xff] }
  0x1b   : > { %5516 = vmatpush3.bf16.msra.mxu0 %v6201_v13  ;;  %v583_v41 = vpack.c.bf16 %v366_v40, %v359_v39  ;;  %v371_v45 = vld [vmem:[%s7329_s15 + $0x78] sm:$0xff]  ;;  %v582_v46 = vpack.c.bf16 %v365_v44, %v358_v43  ;;  %v378_v47 = vld [vmem:[%s7329_s15 + $0xb0] sm:$0xff]  ;;  %v377_v49 = vld [vmem:[%s7329_s15 + $0xa8] sm:$0xff] }
  0x1c   : > { %5517 = vmatprep.subr.bf16.mxu0 %v6204_v16  ;;  %v370_v48 = vld [vmem:[%s7329_s15 + $0x70] sm:$0xff]  ;;  %v588_v50 = vpack.c.bf16 %v378_v47, %v371_v45  ;;  %v373_v51 = vld [vmem:[%s7329_s15 + $0x88] sm:$0xff]  ;;  %v380_v52 = vld [vmem:[%s7329_s15 + $0xc0] sm:$0xff] }
  0x1d   : > { %5628 = vmatpush3.bf16.msra.mxu1 %v6203_v15  ;;  %1327 = vmatprep.mubr.bf16.mxu1 %v583_v41  ;;  %v372_v53 = vld [vmem:[%s7329_s15 + $0x80] sm:$0xff]  ;;  %v590_v54 = vpack.c.bf16 %v380_v52, %v373_v51  ;;  %v379_v55 = vld [vmem:[%s7329_s15 + $0xb8] sm:$0xff]  ;;  %v587_v56 = vpack.c.bf16 %v377_v49, %v370_v48  ;;  %v385_v58 = vld [vmem:[%s7329_s15 + $0xe8] sm:$0xff] }
  0x1e   : > { %5629 = vmatprep.subr.bf16.mxu1 %v6206_v18  ;;  %v6222_v57 = vld [vmem:[%s9432_s1 + $0x180] sm:$0xff]   ;;  %v6223_v61 = vld [vmem:[%s9432_s1 + $0x148] sm:$0xff]   ;;  %v387_v62 = vld [vmem:[%s7329_s15 + $0xf8] sm:$0xff]  ;;  %v589_v63 = vpack.c.bf16 %v379_v55, %v372_v53 }
  0x1f   : > { %5518 = vmatpush3.bf16.msra.mxu0 %v6205_v17  ;;  %v392_v59 = vld [vmem:[%s7329_s15 + $0x120] sm:$0xff]  ;;  %v394_v0 = vld [vmem:[%s7329_s15 + $0x130] sm:$0xff]  ;;  %v6224_v2 = vld [vmem:[%s9432_s1 + $0x108] sm:$0xff]  }
  0x20   : > { %5519 = vmatprep.subr.bf16.mxu0 %v6208_v20  ;;  %v595_v60 = vpack.c.bf16 %v392_v59, %v385_v58  ;;  %v597_v1 = vpack.c.bf16 %v394_v0, %v387_v62  ;;  %v384_v3 = vld [vmem:[%s7329_s15 + $0xe0] sm:$0xff]  ;;  %v391_v4 = vld [vmem:[%s7329_s15 + $0x118] sm:$0xff]  ;;  %v406_v6 = vld [vmem:[%s7329_s15 + $0x190] sm:$0xff] }
  0x21   : > { %5630 = vmatpush3.bf16.msra.mxu1 %v6207_v19  ;;  %v399_v5 = vld [vmem:[%s7329_s15 + $0x158] sm:$0xff]  ;;  %v386_v7 = vld [vmem:[%s7329_s15 + $0xf0] sm:$0xff]  ;;  %v594_v8 = vpack.c.bf16 %v391_v4, %v384_v3  ;;  %v393_v9 = vld [vmem:[%s7329_s15 + $0x128] sm:$0xff] }
  0x22   : > { %5631 = vmatprep.subr.bf16.mxu1 %v6210_v22  ;;  %v401_v10 = vld [vmem:[%s7329_s15 + $0x168] sm:$0xff]  ;;  %v408_v11 = vld [vmem:[%s7329_s15 + $0x1a0] sm:$0xff]  ;;  %v602_v12 = vpack.c.bf16 %v406_v6, %v399_v5  ;;  %v6225_v13 = vld [vmem:[%s9432_s1 + $0x150] sm:$0xff]   ;;  %v596_v14 = vpack.c.bf16 %v393_v9, %v386_v7 }
  0x23   : > { %5520 = vmatpush3.bf16.msra.mxu0 %v6209_v21  ;;  %v6226_v15 = vld [vmem:[%s9432_s1 + $0x110] sm:$0xff]   ;;  %v604_v16 = vpack.c.bf16 %v408_v11, %v401_v10  ;;  %v405_v18 = vld [vmem:[%s7329_s15 + $0x188] sm:$0xff]  ;;  %v420_v20 = vld [vmem:[%s7329_s15 + $0x200] sm:$0xff] }
  0x24   : > { %5521 = vmatprep.subr.bf16.mxu0 %v6212_v24  ;;  %v398_v17 = vld [vmem:[%s7329_s15 + $0x150] sm:$0xff]  ;;  %v413_v19 = vld [vmem:[%s7329_s15 + $0x1c8] sm:$0xff]  ;;  %v400_v21 = vld [vmem:[%s7329_s15 + $0x160] sm:$0xff] }
  0x25   : > { %5632 = vmatpush3.bf16.msra.mxu1 %v6211_v23  ;;  %v601_v22 = vpack.c.bf16 %v405_v18, %v398_v17  ;;  %v407_v23 = vld [vmem:[%s7329_s15 + $0x198] sm:$0xff]  ;;  %v609_v24 = vpack.c.bf16 %v420_v20, %v413_v19  ;;  %v412_v31 = vld [vmem:[%s7329_s15 + $0x1c0] sm:$0xff]  ;;  %v414_v35 = vld [vmem:[%s7329_s15 + $0x1d0] sm:$0xff] }
  0x26   : > { %5633 = vmatprep.subr.bf16.mxu1 %v6214_v26  ;;  %v422_v26 = vld [vmem:[%s7329_s15 + $0x210] sm:$0xff]  ;;  %v419_v32 = vld [vmem:[%s7329_s15 + $0x1f8] sm:$0xff]  ;;  %v421_v36 = vld [vmem:[%s7329_s15 + $0x208] sm:$0xff] }
  0x27   : > { %5522 = vmatpush3.bf16.msra.mxu0 %v6213_v25  ;;  %v415_v25 = vld [vmem:[%s7329_s15 + $0x1d8] sm:$0xff]  ;;  %v6229_v39 = vld [vmem:[%s9432_s1 + $0x160] sm:$0xff]   ;;  %v610_v43 = vpack.c.bf16 %v421_v36, %v414_v35  ;;  %v426_v45 = vld [vmem:[%s7329_s15 + $0x230] sm:$0xff] }
  0x28   : > { %5523 = vmatprep.subr.bf16.mxu0 %v6216_v28  ;;  %v6228_v28 = vld [vmem:[%s9432_s1 + $0x118] sm:$0xff]   ;;  %v436_v41 = vld [vmem:[%s7329_s15 + $0x280] sm:$0xff]  ;;  %v441_v48 = vld [vmem:[%s7329_s15 + $0x2a8] sm:$0xff] }
  0x29   : > { %5634 = vmatpush3.bf16.msra.mxu1 %v6215_v27  ;;  %v6227_v27 = vld [vmem:[%s9432_s1 + $0x158] sm:$0xff]   ;;  %v428_v47 = vld [vmem:[%s7329_s15 + $0x240] sm:$0xff]  ;;  %v450_v55 = vld [vmem:[%s7329_s15 + $0x2f0] sm:$0xff] }
  0x2a   : > { %5635 = vmatprep.subr.bf16.mxu1 %v6218_v30  ;;  %v611_v30 = vpack.c.bf16 %v422_v26, %v415_v25  ;;  %v427_v33 = vld [vmem:[%s7329_s15 + $0x238] sm:$0xff]  ;;  %v448_v49 = vld [vmem:[%s7329_s15 + $0x2e0] sm:$0xff]  ;;  %v462_v62 = vld [vmem:[%s7329_s15 + $0x350] sm:$0xff] }
  0x2b   : > { %5524 = vmatpush3.bf16.msra.mxu0 %v6217_v29  ;;  %v603_v29 = vpack.c.bf16 %v407_v23, %v400_v21  ;;  %v435_v52 = vld [vmem:[%s7329_s15 + $0x278] sm:$0xff]  ;;  %v440_v59 = vld [vmem:[%s7329_s15 + $0x2a0] sm:$0xff]  ;;  %v449_v0 = vld [vmem:[%s7329_s15 + $0x2e8] sm:$0xff] }
  0x2c   : > { %5733 = vmatprep.subr.bf16.mxu0 %v6220_v38  ;;  %v429_v38 = vld [vmem:[%s7329_s15 + $0x248] sm:$0xff]  ;;  %v443_v53 = vld [vmem:[%s7329_s15 + $0x2b8] sm:$0xff]  ;;  %v6234_v3 = vld [vmem:[%s9432_s1 + $0x130] sm:$0xff]  }
  0x2d   : > { %5636 = vmatpush3.bf16.msra.mxu1 %v6219_v34  ;;  %v434_v34 = vld [vmem:[%s7329_s15 + $0x270] sm:$0xff]  ;;  %v618_v44 = vpack.c.bf16 %v436_v41, %v429_v38  ;;  %v625_v58 = vpack.c.bf16 %v450_v55, %v443_v53  ;;  %v457_v5 = vld [vmem:[%s7329_s15 + $0x328] sm:$0xff]  ;;  %v464_v6 = vld [vmem:[%s7329_s15 + $0x360] sm:$0xff] }
  0x2e   : > { %1167 = vmatmul.mubr.bf16.vlgmr.msra.gmra.mrb[0].mxu0 %v580_v37  ;;  %5956 = vmatprep.subr.bf16.mxu1 %v6222_v57  ;;  %v608_v37 = vpack.c.bf16 %v419_v32, %v412_v31  ;;  %v616_v40 = vpack.c.bf16 %v434_v34, %v427_v33  ;;  %v632_v9 = vpack.c.bf16 %v464_v6, %v457_v5  ;;  %v461_v10 = vld [vmem:[%s7329_s15 + $0x348] sm:$0xff]  ;;  %v6236_v17 = vld [vmem:[%s9432_s1 + $0x138] sm:$0xff]   ;;  %v478_v20 = vld [vmem:[%s7329_s15 + $0x3d0] sm:$0xff] }
  0x2f   : > { %5734 = vmatpush3.bf16.msra.mxu0 %v6221_v42  ;;  %1174 = vmatprep.mubr.bf16.mxu0 %v588_v50  ;;  %v6230_v42 = vld [vmem:[%s9432_s1 + $0x120] sm:$0xff]   ;;  %v6231_v50 = vld [vmem:[%s9432_s1 + $0x168] sm:$0xff]   ;;  %v471_v19 = vld [vmem:[%s7329_s15 + $0x398] sm:$0xff] }
  0x30   : > { %1328 = vmatmul.mubr.bf16.vlgmr.msra.gmra.mrb[0].mxu1 %v582_v46  ;;  %5735 = vmatprep.subr.bf16.mxu0 %v6223_v61  ;;  %v433_v46 = vld [vmem:[%s7329_s15 + $0x268] sm:$0xff]  ;;  %v455_v61 = vld [vmem:[%s7329_s15 + $0x318] sm:$0xff]  ;;  %v468_v23 = vld [vmem:[%s7329_s15 + $0x380] sm:$0xff] }
  0x31   : > { %1335 = vmatprep.mubr.bf16.mxu1 %v590_v54  ;;  %5957 = vmatpush3.bf16.msra.mxu1 %v6222_v57  ;;  %v615_v51 = vpack.c.bf16 %v433_v46, %v426_v45  ;;  %v623_v54 = vpack.c.bf16 %v448_v49, %v441_v48  ;;  %v617_v57 = vpack.c.bf16 %v435_v52, %v428_v47  ;;  %v469_v11 = vld [vmem:[%s7329_s15 + $0x388] sm:$0xff]  ;;  %v483_v25 = vld [vmem:[%s7329_s15 + $0x3f8] sm:$0xff]  ;;  %v490_v26 = vld [vmem:[%s7329_s15 + $0x430] sm:$0xff] }
  0x32   : > { %v630_v4 = vpack.c.bf16 %v462_v62, %v455_v61  ;;  %v485_v31 = vld [vmem:[%s7329_s15 + $0x408] sm:$0xff]  ;;  %v492_v32 = vld [vmem:[%s7329_s15 + $0x440] sm:$0xff]  ;;  %v482_v35 = vld [vmem:[%s7329_s15 + $0x3f0] sm:$0xff] }
  0x33   : > { %5736 = vmatpush3.bf16.msra.mxu0 %v6224_v2  ;;  %v646_v34 = vpack.c.bf16 %v492_v32, %v485_v31  ;;  %v489_v36 = vld [vmem:[%s7329_s15 + $0x428] sm:$0xff]  ;;  %v504_v38 = vld [vmem:[%s7329_s15 + $0x4a0] sm:$0xff]  ;;  %v491_v41 = vld [vmem:[%s7329_s15 + $0x438] sm:$0xff] }
  0x34   : > { %5737 = vmatprep.subr.bf16.mxu0 %v6225_v13  ;;  %v6235_v13 = vld [vmem:[%s9432_s1 + $0x178] sm:$0xff]   ;;  %v496_v47 = vld [vmem:[%s7329_s15 + $0x460] sm:$0xff]  ;;  %v505_v53 = vld [vmem:[%s7329_s15 + $0x4a8] sm:$0xff] }
  0x35   : > { %v503_v48 = vld [vmem:[%s7329_s15 + $0x498] sm:$0xff]  ;;  %v520_v55 = vld [vmem:[%s7329_s15 + $0x520] sm:$0xff]  ;;  %v525_v62 = vld [vmem:[%s7329_s15 + $0x548] sm:$0xff] }
  0x36   : > { %1175 = vmatmul.mubr.bf16.gmra.mrb[4].mxu0 %v587_v56  ;;  %v6232_v56 = vld [vmem:[%s9432_s1 + $0x128] sm:$0xff]   ;;  %v511_v49 = vld [vmem:[%s7329_s15 + $0x4d8] sm:$0xff]  ;;  %v650_v52 = vpack.c.bf16 %v503_v48, %v496_v47  ;;  %v512_v61 = vld [vmem:[%s7329_s15 + $0x4e0] sm:$0xff] }
  0x37   : > { %1182 = vmatprep.mubr.bf16.mxu0 %v595_v60  ;;  %5738 = vmatpush3.bf16.msra.mxu0 %v6226_v15  ;;  %v447_v60 = vld [vmem:[%s7329_s15 + $0x2d8] sm:$0xff]  ;;  %v456_v15 = vld [vmem:[%s7329_s15 + $0x320] sm:$0xff] }
  0x38   : > { %1336 = vmatmul.mubr.bf16.gmra.mrb[4].mxu1 %v589_v63  ;;  %5739 = vmatprep.subr.bf16.mxu0 %v6227_v27  ;;  %v442_v63 = vld [vmem:[%s7329_s15 + $0x2b0] sm:$0xff]  ;;  %v622_v2 = vpack.c.bf16 %v447_v60, %v440_v59  ;;  %v517_v60 = vld [vmem:[%s7329_s15 + $0x508] sm:$0xff]  ;;  %v524_v6 = vld [vmem:[%s7329_s15 + $0x540] sm:$0xff] }
  0x39   : > { %1343 = vmatprep.mubr.bf16.mxu1 %v597_v1  ;;  %v6233_v1 = vld [vmem:[%s9432_s1 + $0x170] sm:$0xff]   ;;  %v624_v7 = vpack.c.bf16 %v449_v0, %v442_v63  ;;  %v532_v63 = vld [vmem:[%s7329_s15 + $0x580] sm:$0xff]  ;;  %v519_v0 = vld [vmem:[%s7329_s15 + $0x518] sm:$0xff] }
  0x3a   : > { %v510_v59 = vld [vmem:[%s7329_s15 + $0x4d0] sm:$0xff]  ;;  %v659_v5 = vpack.c.bf16 %v519_v0, %v512_v61  ;;  %v552_v31 = vld [vmem:[%s7329_s15 + $0x620] sm:$0xff]  ;;  %v559_v32 = vld [vmem:[%s7329_s15 + $0x658] sm:$0xff] }
  0x3b   : > { %5740 = vmatpush3.bf16.msra.mxu0 %v6228_v28  ;;  %v470_v28 = vld [vmem:[%s7329_s15 + $0x390] sm:$0xff]  ;;  %v568_v48 = vld [vmem:[%s7329_s15 + $0x6a0] sm:$0xff]  ;;  %v383_v61 = vld [vmem:[%s7329_s15 + $0xd8] sm:$0xff] }
  0x3c   : > { %5741 = vmatprep.subr.bf16.mxu0 %v6229_v39  ;;  %v643_v39 = vpack.c.bf16 %v489_v36, %v482_v35  ;;  %v678_v35 = vpack.c.bf16 %v559_v32, %v552_v31  ;;  %v554_v36 = vld [vmem:[%s7329_s15 + $0x630] sm:$0xff]  ;;  %v397_v0 = vld [vmem:[%s7329_s15 + $0x148] sm:$0xff]  ;;  %v460_v32 = vld [vmem:[%s7329_s15 + $0x340] sm:$0xff] }
  0x3e   : > { %1183 = vmatmul.mubr.bf16.gmra.mrb[8].mxu0 %v594_v8  ;;  %v454_v8 = vld [vmem:[%s7329_s15 + $0x310] sm:$0xff] }
  0x3f   : > { %1190 = vmatprep.mubr.bf16.mxu0 %v602_v12  ;;  %5742 = vmatpush3.bf16.msra.mxu0 %v6230_v42  ;;  %v476_v12 = vld [vmem:[%s7329_s15 + $0x3c0] sm:$0xff] }
  0x40   : > { %1344 = vmatmul.mubr.bf16.gmra.mrb[8].mxu1 %v596_v14  ;;  %5743 = vmatprep.subr.bf16.mxu0 %v6231_v50  ;;  %v629_v14 = vpack.c.bf16 %v461_v10, %v454_v8  ;;  %v637_v18 = vpack.c.bf16 %v476_v12, %v469_v11  ;;  %v518_v50 = vld [vmem:[%s7329_s15 + $0x510] sm:$0xff]  ;;  %v533_v12 = vld [vmem:[%s7329_s15 + $0x588] sm:$0xff] }
  0x41   : > { %1351 = vmatprep.mubr.bf16.mxu1 %v604_v16  ;;  %v463_v16 = vld [vmem:[%s7329_s15 + $0x358] sm:$0xff]  ;;  %v546_v10 = vld [vmem:[%s7329_s15 + $0x5f0] sm:$0xff] }
  0x42   : > { %v631_v21 = vpack.c.bf16 %v463_v16, %v456_v15  ;;  %v526_v11 = vld [vmem:[%s7329_s15 + $0x550] sm:$0xff]  ;;  %v541_v15 = vld [vmem:[%s7329_s15 + $0x5c8] sm:$0xff]  ;;  %v548_v16 = vld [vmem:[%s7329_s15 + $0x600] sm:$0xff] }
  0x43   : > { %5744 = vmatpush3.bf16.msra.mxu0 %v6232_v56  ;;  %v658_v56 = vpack.c.bf16 %v518_v50, %v511_v49  ;;  %v575_v49 = vld [vmem:[%s7329_s15 + $0x6d8] sm:$0xff] }
  0x44   : > { %5745 = vmatprep.subr.bf16.mxu0 %v6233_v1  ;;  %v657_v1 = vpack.c.bf16 %v517_v60, %v510_v59  ;;  %v376_v60 = vld [vmem:[%s7329_s15 + $0xa0] sm:$0xff] }
  0x46   : > { %1191 = vmatmul.mubr.bf16.gmra.mrb[12].mxu0 %v601_v22  ;;  %v639_v22 = vpack.c.bf16 %v478_v20, %v471_v19  ;;  %v538_v19 = vld [vmem:[%s7329_s15 + $0x5b0] sm:$0xff]  ;;  %v545_v20 = vld [vmem:[%s7329_s15 + $0x5e8] sm:$0xff] }
  0x47   : > { %1198 = vmatprep.mubr.bf16.mxu0 %v609_v24  ;;  %5746 = vmatpush3.bf16.msra.mxu0 %v6234_v3  ;;  %v475_v24 = vld [vmem:[%s7329_s15 + $0x3b8] sm:$0xff] }
  0x48   : > { %1352 = vmatmul.mubr.bf16.gmra.mrb[12].mxu1 %v603_v29  ;;  %5747 = vmatprep.subr.bf16.mxu0 %v6235_v13  ;;  %v636_v27 = vpack.c.bf16 %v475_v24, %v468_v23  ;;  %v477_v29 = vld [vmem:[%s7329_s15 + $0x3c8] sm:$0xff]  ;;  %v527_v3 = vld [vmem:[%s7329_s15 + $0x558] sm:$0xff]  ;;  %v671_v23 = vpack.c.bf16 %v545_v20, %v538_v19  ;;  %v540_v24 = vld [vmem:[%s7329_s15 + $0x5c0] sm:$0xff] }
  0x49   : > { %1359 = vmatprep.mubr.bf16.mxu1 %v611_v30  ;;  %v644_v30 = vpack.c.bf16 %v490_v26, %v483_v25  ;;  %v638_v33 = vpack.c.bf16 %v477_v29, %v470_v28  ;;  %v547_v25 = vld [vmem:[%s7329_s15 + $0x5f8] sm:$0xff]  ;;  %v562_v28 = vld [vmem:[%s7329_s15 + $0x670] sm:$0xff]  ;;  %v432_v20 = vld [vmem:[%s7329_s15 + $0x260] sm:$0xff] }
  0x4a   : > { %v673_v29 = vpack.c.bf16 %v547_v25, %v540_v24  ;;  %v453_v24 = vld [vmem:[%s7329_s15 + $0x308] sm:$0xff] }
  0x4b   : > { %5748 = vmatpush3.bf16.msra.mxu0 %v6236_v17  ;;  %v666_v17 = vpack.c.bf16 %v533_v12, %v526_v11  ;;  %v418_v11 = vld [vmem:[%s7329_s15 + $0x1f0] sm:$0xff]  ;;  %v425_v12 = vld [vmem:[%s7329_s15 + $0x228] sm:$0xff] }
  0x4e   : > { %1199 = vmatmul.mubr.bf16.gmra.mrb[16].mxu0 %v608_v37  ;;  %v497_v37 = vld [vmem:[%s7329_s15 + $0x468] sm:$0xff] }
  0x4f   : > { %1206 = vmatprep.mubr.bf16.mxu0 %v616_v40  ;;  %v484_v40 = vld [vmem:[%s7329_s15 + $0x400] sm:$0xff]  ;;  %v651_v42 = vpack.c.bf16 %v504_v38, %v497_v37  ;;  %v561_v37 = vld [vmem:[%s7329_s15 + $0x668] sm:$0xff] }
  0x50   : > { %1360 = vmatmul.mubr.bf16.gmra.mrb[16].mxu1 %v610_v43  ;;  %v499_v43 = vld [vmem:[%s7329_s15 + $0x478] sm:$0xff]  ;;  %v645_v45 = vpack.c.bf16 %v491_v41, %v484_v40  ;;  %v576_v40 = vld [vmem:[%s7329_s15 + $0x6e0] sm:$0xff]  ;;  %v680_v41 = vpack.c.bf16 %v561_v37, %v554_v36  ;;  %v481_v36 = vld [vmem:[%s7329_s15 + $0x3e8] sm:$0xff] }
  0x51   : > { %1367 = vmatprep.mubr.bf16.mxu1 %v618_v44  ;;  %v506_v44 = vld [vmem:[%s7329_s15 + $0x4b0] sm:$0xff] }
  0x52   : > { %v653_v46 = vpack.c.bf16 %v506_v44, %v499_v43  ;;  %v566_v43 = vld [vmem:[%s7329_s15 + $0x690] sm:$0xff]  ;;  %v573_v44 = vld [vmem:[%s7329_s15 + $0x6c8] sm:$0xff] }
  0x53   : > { %v685_v47 = vpack.c.bf16 %v573_v44, %v566_v43  ;;  %v488_v44 = vld [vmem:[%s7329_s15 + $0x420] sm:$0xff] }
  0x56   : > { %1207 = vmatmul.mubr.bf16.gmra.mrb[20].mxu0 %v615_v51  ;;  %v498_v51 = vld [vmem:[%s7329_s15 + $0x470] sm:$0xff] }
  0x57   : > { %1214 = vmatprep.mubr.bf16.mxu0 %v623_v54  ;;  %v513_v54 = vld [vmem:[%s7329_s15 + $0x4e8] sm:$0xff] }
  0x58   : > { %1368 = vmatmul.mubr.bf16.gmra.mrb[20].mxu1 %v617_v57  ;;  %v652_v57 = vpack.c.bf16 %v505_v53, %v498_v51  ;;  %v362_v51 = vld [vmem:[%s7329_s15 + $0x30] sm:$0xff]  ;;  %v687_v53 = vpack.c.bf16 %v575_v49, %v568_v48  ;;  %v509_v48 = vld [vmem:[%s7329_s15 + $0x4c8] sm:$0xff] }
  0x59   : > { %1375 = vmatprep.mubr.bf16.mxu1 %v625_v58  ;;  %v660_v58 = vpack.c.bf16 %v520_v55, %v513_v54  ;;  %v360_v55 = vld [vmem:[%s7329_s15 + $0x20] sm:$0xff] }
  0x5e   : > { %1215 = vmatmul.mubr.bf16.gmra.mrb[24].mxu0 %v622_v2  ;;  %v665_v2 = vpack.c.bf16 %v532_v63, %v525_v62  ;;  %v390_v63 = vld [vmem:[%s7329_s15 + $0x110] sm:$0xff] }
  0x5f   : > { %1222 = vmatprep.mubr.bf16.mxu0 %v630_v4  ;;  %v534_v4 = vld [vmem:[%s7329_s15 + $0x590] sm:$0xff] }
  0x60   : > { %1376 = vmatmul.mubr.bf16.gmra.mrb[24].mxu1 %v624_v7  ;;  %v531_v7 = vld [vmem:[%s7329_s15 + $0x578] sm:$0xff]  ;;  %v667_v8 = vpack.c.bf16 %v534_v4, %v527_v3  ;;  %v374_v3 = vld [vmem:[%s7329_s15 + $0x90] sm:$0xff]  ;;  %v381_v4 = vld [vmem:[%s7329_s15 + $0xc8] sm:$0xff] }
  0x61   : > { %1383 = vmatprep.mubr.bf16.mxu1 %v632_v9  ;;  %v539_v9 = vld [vmem:[%s7329_s15 + $0x5b8] sm:$0xff]  ;;  %v664_v13 = vpack.c.bf16 %v531_v7, %v524_v6  ;;  %v396_v6 = vld [vmem:[%s7329_s15 + $0x140] sm:$0xff]  ;;  %v591_v7 = vpack.c.bf16 %v381_v4, %v374_v3 }
  0x62   : > { %v544_v4 = vld [vmem:[%s7329_s15 + $0x5e0] sm:$0xff] }
  0x66   : > { %1223 = vmatmul.mubr.bf16.gmra.mrb[28].mxu0 %v629_v14  ;;  %v672_v14 = vpack.c.bf16 %v546_v10, %v539_v9  ;;  %v411_v9 = vld [vmem:[%s7329_s15 + $0x1b8] sm:$0xff] }
  0x67   : > { %1230 = vmatprep.mubr.bf16.mxu0 %v637_v18  ;;  %v674_v18 = vpack.c.bf16 %v548_v16, %v541_v15  ;;  %v388_v15 = vld [vmem:[%s7329_s15 + $0x100] sm:$0xff]  ;;  %v395_v16 = vld [vmem:[%s7329_s15 + $0x138] sm:$0xff] }
  0x68   : > { %1384 = vmatmul.mubr.bf16.gmra.mrb[28].mxu1 %v631_v21  ;;  %v553_v21 = vld [vmem:[%s7329_s15 + $0x628] sm:$0xff]  ;;  %v598_v19 = vpack.c.bf16 %v395_v16, %v388_v15  ;;  %v480_v15 = vld [vmem:[%s7329_s15 + $0x3e0] sm:$0xff] }
  0x69   : > { %1391 = vmatprep.mubr.bf16.mxu1 %v639_v22  ;;  %v560_v22 = vld [vmem:[%s7329_s15 + $0x660] sm:$0xff] }
  0x6a   : > { %v679_v26 = vpack.c.bf16 %v560_v22, %v553_v21  ;;  %v439_v21 = vld [vmem:[%s7329_s15 + $0x298] sm:$0xff] }
  0x6b   : > { %v621_v25 = vpack.c.bf16 %v439_v21, %v432_v20  ;;  %v472_v21 = vld [vmem:[%s7329_s15 + $0x3a0] sm:$0xff] }
  0x6e   : > { %1231 = vmatmul.mubr.bf16.gmra.mrb[32].mxu0 %v636_v27  ;;  %v555_v27 = vld [vmem:[%s7329_s15 + $0x638] sm:$0xff] }
  0x6f   : > { %1238 = vmatprep.mubr.bf16.mxu0 %v644_v30  ;;  %v681_v30 = vpack.c.bf16 %v562_v28, %v555_v27  ;;  %v402_v27 = vld [vmem:[%s7329_s15 + $0x170] sm:$0xff]  ;;  %v409_v28 = vld [vmem:[%s7329_s15 + $0x1a8] sm:$0xff] }
  0x70   : > { %1392 = vmatmul.mubr.bf16.gmra.mrb[32].mxu1 %v638_v33  ;;  %v567_v33 = vld [vmem:[%s7329_s15 + $0x698] sm:$0xff]  ;;  %v605_v31 = vpack.c.bf16 %v409_v28, %v402_v27  ;;  %v486_v27 = vld [vmem:[%s7329_s15 + $0x410] sm:$0xff]  ;;  %v493_v28 = vld [vmem:[%s7329_s15 + $0x448] sm:$0xff] }
  0x71   : > { %1399 = vmatprep.mubr.bf16.mxu1 %v646_v34  ;;  %v574_v34 = vld [vmem:[%s7329_s15 + $0x6d0] sm:$0xff] }
  0x72   : > { %v686_v38 = vpack.c.bf16 %v574_v34, %v567_v33  ;;  %v467_v33 = vld [vmem:[%s7329_s15 + $0x378] sm:$0xff] }
  0x73   : > { %v635_v37 = vpack.c.bf16 %v467_v33, %v460_v32  ;;  %v500_v33 = vld [vmem:[%s7329_s15 + $0x480] sm:$0xff] }
  0x76   : > { %1239 = vmatmul.mubr.bf16.gmra.mrb[36].mxu0 %v643_v39  ;;  %v569_v39 = vld [vmem:[%s7329_s15 + $0x6a8] sm:$0xff] }
  0x77   : > { %1246 = vmatprep.mubr.bf16.mxu0 %v651_v42  ;;  %v688_v42 = vpack.c.bf16 %v576_v40, %v569_v39  ;;  %v416_v39 = vld [vmem:[%s7329_s15 + $0x1e0] sm:$0xff]  ;;  %v423_v40 = vld [vmem:[%s7329_s15 + $0x218] sm:$0xff] }
  0x78   : > { %1400 = vmatmul.mubr.bf16.gmra.mrb[36].mxu1 %v645_v45  ;;  %v361_v45 = vld [vmem:[%s7329_s15 + $0x28] sm:$0xff]  ;;  %v612_v43 = vpack.c.bf16 %v423_v40, %v416_v39  ;;  %v514_v40 = vld [vmem:[%s7329_s15 + $0x4f0] sm:$0xff] }
  0x79   : > { %1407 = vmatprep.mubr.bf16.mxu1 %v653_v46  ;;  %v368_v46 = vld [vmem:[%s7329_s15 + $0x60] sm:$0xff] }
  0x7a   : > { %v585_v50 = vpack.c.bf16 %v368_v46, %v361_v45  ;;  %v495_v45 = vld [vmem:[%s7329_s15 + $0x458] sm:$0xff] }
  0x7b   : > { %v649_v49 = vpack.c.bf16 %v495_v45, %v488_v44  ;;  %v7626_v45 = vld [vmem:[%s9438_s7] ss:$0 sm:$0xff] }
  0x7e   : > { %1247 = vmatmul.mubr.bf16.gmra.mrb[40].mxu0 %v650_v52  ;;  %v369_v52 = vld [vmem:[%s7329_s15 + $0x68] sm:$0xff] }
  0x7f   : > { %1254 = vmatprep.mubr.bf16.mxu0 %v658_v56  ;;  %v586_v54 = vpack.c.bf16 %v369_v52, %v362_v51  ;;  %v367_v56 = vld [vmem:[%s7329_s15 + $0x58] sm:$0xff]  ;;  %v430_v51 = vld [vmem:[%s7329_s15 + $0x250] sm:$0xff]  ;;  %v437_v52 = vld [vmem:[%s7329_s15 + $0x288] sm:$0xff] }
  0x80   : > { %1408 = vmatmul.mubr.bf16.gmra.mrb[40].mxu1 %v652_v57  ;;  %v375_v57 = vld [vmem:[%s7329_s15 + $0x98] sm:$0xff]  ;;  %v584_v59 = vpack.c.bf16 %v367_v56, %v360_v55  ;;  %v619_v55 = vpack.c.bf16 %v437_v52, %v430_v51  ;;  %v516_v56 = vld [vmem:[%s7329_s15 + $0x500] sm:$0xff] }
  0x81   : > { %1415 = vmatprep.mubr.bf16.mxu1 %v660_v58  ;;  %v382_v58 = vld [vmem:[%s7329_s15 + $0xd0] sm:$0xff] }
  0x82   : > { %v592_v62 = vpack.c.bf16 %v382_v58, %v375_v57  ;;  %v523_v57 = vld [vmem:[%s7329_s15 + $0x538] sm:$0xff] }
  0x86   : > { %1255 = vmatmul.mubr.bf16.gmra.mrb[44].mxu0 %v657_v1  ;;  %v593_v1 = vpack.c.bf16 %v383_v61, %v376_v60  ;;  %v537_v60 = vld [vmem:[%s7329_s15 + $0x5a8] sm:$0xff]  ;;  %v663_v61 = vpack.c.bf16 %v523_v57, %v516_v56 }
  0x87   : > { %1262 = vmatprep.mubr.bf16.mxu0 %v665_v2  ;;  %v600_v2 = vpack.c.bf16 %v397_v0, %v390_v63  ;;  %v444_v63 = vld [vmem:[%s7329_s15 + $0x2c0] sm:$0xff]  ;;  %v451_v0 = vld [vmem:[%s7329_s15 + $0x2f8] sm:$0xff] }
  0x88   : > { %1416 = vmatmul.mubr.bf16.gmra.mrb[44].mxu1 %v659_v5  ;;  %v389_v5 = vld [vmem:[%s7329_s15 + $0x108] sm:$0xff]  ;;  %v626_v3 = vpack.c.bf16 %v451_v0, %v444_v63  ;;  %v543_v63 = vld [vmem:[%s7329_s15 + $0x5d8] sm:$0xff]  ;;  %v550_v0 = vld [vmem:[%s7329_s15 + $0x610] sm:$0xff] }
  0x89   : > { %1423 = vmatprep.mubr.bf16.mxu1 %v667_v8  ;;  %v404_v8 = vld [vmem:[%s7329_s15 + $0x180] sm:$0xff]  ;;  %v599_v10 = vpack.c.bf16 %v396_v6, %v389_v5  ;;  %v551_v5 = vld [vmem:[%s7329_s15 + $0x618] sm:$0xff] }
  0x8a   : > { %v6237_v6 = vld [vmem:[%s9433_s2] sm:$0xff]  }
  0x8b   : > { %5990 = vmatprep.subr.bf16.mxu1 %v6237_v6 }
  0x8e   : > { %1263 = vmatmul.mubr.bf16.gmra.mrb[48].mxu0 %v664_v13  ;;  %v607_v13 = vpack.c.bf16 %v411_v9, %v404_v8  ;;  %v558_v8 = vld [vmem:[%s7329_s15 + $0x650] sm:$0xff]  ;;  %v565_v9 = vld [vmem:[%s7329_s15 + $0x688] sm:$0xff] }
  0x8f   : > { %1270 = vmatprep.mubr.bf16.mxu0 %v672_v14  ;;  %v614_v14 = vpack.c.bf16 %v425_v12, %v418_v11  ;;  %v684_v11 = vpack.c.bf16 %v565_v9, %v558_v8  ;;  %v458_v12 = vld [vmem:[%s7329_s15 + $0x330] sm:$0xff]  ;;  %v676_v8 = vpack.c.bf16 %v550_v0, %v543_v63  ;;  %v577_v0 = vld [vmem:[%s7329_s15 + $0x6e8] sm:$0xff] }
  0x90   : > { %1424 = vmatmul.mubr.bf16.gmra.mrb[48].mxu1 %v666_v17  ;;  %v403_v17 = vld [vmem:[%s7329_s15 + $0x178] sm:$0xff]  ;;  %v570_v63 = vld [vmem:[%s7329_s15 + $0x6b0] sm:$0xff] }
  0x91   : > { %1431 = vmatprep.mubr.bf16.mxu1 %v674_v18  ;;  %v410_v18 = vld [vmem:[%s7329_s15 + $0x1b0] sm:$0xff] }
  0x92   : > { %v606_v22 = vpack.c.bf16 %v410_v18, %v403_v17  ;;  %v572_v17 = vld [vmem:[%s7329_s15 + $0x6c0] sm:$0xff]  ;;  %v579_v18 = vld [vmem:[%s7329_s15 + $0x6f8] sm:$0xff] }
  0x93   : > { %v691_v20 = vpack.c.bf16 %v579_v18, %v572_v17  ;;  %v542_v18 = vld [vmem:[%s7329_s15 + $0x5d0] sm:$0xff] }
  0x96   : > { %1271 = vmatmul.mubr.bf16.gmra.mrb[52].mxu0 %v671_v23  ;;  %v446_v23 = vld [vmem:[%s7329_s15 + $0x2d0] sm:$0xff] }
  0x97   : > { %1278 = vmatprep.mubr.bf16.mxu0 %v679_v26  ;;  %v628_v26 = vpack.c.bf16 %v453_v24, %v446_v23  ;;  %v487_v23 = vld [vmem:[%s7329_s15 + $0x418] sm:$0xff]  ;;  %v494_v24 = vld [vmem:[%s7329_s15 + $0x450] sm:$0xff] }
  0x98   : > { %1432 = vmatmul.mubr.bf16.gmra.mrb[52].mxu1 %v673_v29  ;;  %v417_v29 = vld [vmem:[%s7329_s15 + $0x1e8] sm:$0xff] }
  0x99   : > { %1439 = vmatprep.mubr.bf16.mxu1 %v681_v30  ;;  %v424_v30 = vld [vmem:[%s7329_s15 + $0x220] sm:$0xff] }
  0x9a   : > { %v613_v34 = vpack.c.bf16 %v424_v30, %v417_v29  ;;  %v501_v29 = vld [vmem:[%s7329_s15 + $0x488] sm:$0xff]  ;;  %v508_v30 = vld [vmem:[%s7329_s15 + $0x4c0] sm:$0xff] }
  0x9b   : > { %v655_v32 = vpack.c.bf16 %v508_v30, %v501_v29 }
  0x9e   : > { %1279 = vmatmul.mubr.bf16.gmra.mrb[56].mxu0 %v678_v35  ;;  %v474_v35 = vld [vmem:[%s7329_s15 + $0x3b0] sm:$0xff] }
  0x9f   : > { %1286 = vmatprep.mubr.bf16.mxu0 %v686_v38  ;;  %v642_v38 = vpack.c.bf16 %v481_v36, %v474_v35  ;;  %v515_v35 = vld [vmem:[%s7329_s15 + $0x4f8] sm:$0xff]  ;;  %v522_v36 = vld [vmem:[%s7329_s15 + $0x530] sm:$0xff] }
  0xa0   : > { %1440 = vmatmul.mubr.bf16.gmra.mrb[56].mxu1 %v680_v41  ;;  %v431_v41 = vld [vmem:[%s7329_s15 + $0x258] sm:$0xff]  ;;  %v662_v39 = vpack.c.bf16 %v522_v36, %v515_v35 }
  0xa1   : > { %1447 = vmatprep.mubr.bf16.mxu1 %v688_v42  ;;  %v438_v42 = vld [vmem:[%s7329_s15 + $0x290] sm:$0xff] }
  0xa2   : > { %v620_v46 = vpack.c.bf16 %v438_v42, %v431_v41  ;;  %v521_v41 = vld [vmem:[%s7329_s15 + $0x528] sm:$0xff] }
  0xa3   : > { %v529_v42 = vld [vmem:[%s7329_s15 + $0x568] sm:$0xff] }
  0xa6   : > { %1287 = vmatmul.mubr.bf16.gmra.mrb[60].mxu0 %v685_v47  ;;  %v502_v47 = vld [vmem:[%s7329_s15 + $0x490] sm:$0xff] }
  0xa7   : > { %1488 = vmatprep.mubr.bf16.mxu0 %v585_v50  ;;  %v656_v50 = vpack.c.bf16 %v509_v48, %v502_v47  ;;  %v661_v47 = vpack.c.bf16 %v521_v41, %v514_v40  ;;  %v556_v40 = vld [vmem:[%s7329_s15 + $0x640] sm:$0xff]  ;;  %v563_v41 = vld [vmem:[%s7329_s15 + $0x678] sm:$0xff] }
  0xa8   : > { %1448 = vmatmul.mubr.bf16.gmra.mrb[60].mxu1 %v687_v53  ;;  %v445_v53 = vld [vmem:[%s7329_s15 + $0x2c8] sm:$0xff] }
  0xa9   : > { %5958 = vmatprep.mubr.msk.bf16.mxu1 %vm1085_vm0, %v586_v54  ;;  %v452_v54 = vld [vmem:[%s7329_s15 + $0x300] sm:$0xff] }
  0xaa   : > { %v627_v58 = vpack.c.bf16 %v452_v54, %v445_v53 }
  0xae   : > { %1489 = vmatmul.mubr.bf16.vlgmr.msra.gmra.mrb[64].mxu0 %v584_v59  ;;  %v530_v59 = vld [vmem:[%s7329_s15 + $0x570] sm:$0xff] }
  0xaf   : > { %1496 = vmatprep.mubr.bf16.mxu0 %v592_v62  ;;  %v670_v62 = vpack.c.bf16 %v537_v60, %v530_v59  ;;  %v528_v60 = vld [vmem:[%s7329_s15 + $0x560] sm:$0xff] }
  0xb0   : > { %5959 = vmatmul.mubr.msk.bf16.vlgmr.msra.gmra.mrb[64].mxu1 %vm1085_vm0, %v593_v1  ;;  %v459_v1 = vld [vmem:[%s7329_s15 + $0x338] sm:$0xff] }
  0xb1   : > { %5962 = vmatprep.mubr.msk.bf16.mxu1 %vm1085_vm0, %v600_v2  ;;  %v466_v2 = vld [vmem:[%s7329_s15 + $0x370] sm:$0xff]  ;;  %5991 = vmatpush3.bf16.msra.mxu1 %v6237_v6 }
  0xb6   : > { %1497 = vmatmul.mubr.bf16.gmra.mrb[68].mxu0 %v591_v7  ;;  %v634_v7 = vpack.c.bf16 %v466_v2, %v459_v1 }
  0xb7   : > { %1504 = vmatprep.mubr.bf16.mxu0 %v599_v10  ;;  %v677_v10 = vpack.c.bf16 %v551_v5, %v544_v4 }
  0xb8   : > { %5963 = vmatmul.mubr.msk.bf16.gmra.mrb[68].mxu1 %vm1085_vm0, %v607_v13  ;;  %v465_v13 = vld [vmem:[%s7329_s15 + $0x368] sm:$0xff] }
  0xb9   : > { %5966 = vmatprep.mubr.msk.bf16.mxu1 %vm1085_vm0, %v614_v14  ;;  %v473_v14 = vld [vmem:[%s7329_s15 + $0x3a8] sm:$0xff]  ;;  %v633_v16 = vpack.c.bf16 %v465_v13, %v458_v12 }
  0xbe   : > { %1505 = vmatmul.mubr.bf16.gmra.mrb[72].mxu0 %v598_v19  ;;  %v641_v19 = vpack.c.bf16 %v480_v15, %v473_v14 }
  0xbf   : > { %1512 = vmatprep.mubr.bf16.mxu0 %v606_v22  ;;  %v479_v22 = vld [vmem:[%s7329_s15 + $0x3d8] sm:$0xff] }
  0xc0   : > { %5967 = vmatmul.mubr.msk.bf16.gmra.mrb[72].mxu1 %vm1085_vm0, %v621_v25  ;;  %v640_v25 = vpack.c.bf16 %v479_v22, %v472_v21  ;;  %v557_v21 = vld [vmem:[%s7329_s15 + $0x648] sm:$0xff]  ;;  %v564_v22 = vld [vmem:[%s7329_s15 + $0x680] sm:$0xff] }
  0xc1   : > { %5970 = vmatprep.mubr.msk.bf16.mxu1 %vm1085_vm0, %v628_v26  ;;  %v648_v26 = vpack.c.bf16 %v494_v24, %v487_v23  ;;  %v683_v30 = vpack.c.bf16 %v564_v22, %v557_v21 }
  0xc6   : > { %1513 = vmatmul.mubr.bf16.gmra.mrb[76].mxu0 %v605_v31  ;;  %v647_v31 = vpack.c.bf16 %v493_v28, %v486_v27 }
  0xc7   : > { %1520 = vmatprep.mubr.bf16.mxu0 %v613_v34  ;;  %v507_v34 = vld [vmem:[%s7329_s15 + $0x4b8] sm:$0xff] }
  0xc8   : > { %5971 = vmatmul.mubr.msk.bf16.gmra.mrb[76].mxu1 %vm1085_vm0, %v635_v37  ;;  %v654_v37 = vpack.c.bf16 %v507_v34, %v500_v33 }
  0xc9   : > { %5974 = vmatprep.mubr.msk.bf16.mxu1 %vm1085_vm0, %v642_v38  ;;  %v6238_v38 = vld [vmem:[%s9433_s2 + $0x8] sm:$0xff]  }
  0xca   : > { %5992 = vmatprep.subr.bf16.mxu1 %v6238_v38 }
  0xcb   : > { %5993 = vmatpush3.bf16.msra.mxu1 %v6238_v38 }
  0xce   : > { %1521 = vmatmul.mubr.bf16.gmra.mrb[80].mxu0 %v612_v43  ;;  %v536_v43 = vld [vmem:[%s7329_s15 + $0x5a0] sm:$0xff] }
  0xcf   : > { %1528 = vmatprep.mubr.bf16.mxu0 %v620_v46 }
  0xd0   : > { %5975 = vmatmul.mubr.msk.bf16.gmra.mrb[80].mxu1 %vm1085_vm0, %v649_v49 }
  0xd1   : > { %5978 = vmatprep.mubr.msk.bf16.mxu1 %vm1085_vm0, %v656_v50  ;;  %v669_v50 = vpack.c.bf16 %v536_v43, %v529_v42  ;;  %v571_v43 = vld [vmem:[%s7329_s15 + $0x6b8] sm:$0xff] }
  0xd6   : > { %1529 = vmatmul.mubr.bf16.gmra.mrb[84].mxu0 %v619_v55 }
  0xd7   : > { %1536 = vmatprep.mubr.bf16.mxu0 %v627_v58 }
  0xd8   : > { %5979 = vmatmul.mubr.msk.bf16.gmra.mrb[84].mxu1 %vm1085_vm0, %v663_v61  ;;  %v535_v61 = vld [vmem:[%s7329_s15 + $0x598] sm:$0xff] }
  0xd9   : > { %5982 = vmatprep.mubr.msk.bf16.mxu1 %vm1085_vm0, %v670_v62  ;;  %v668_v4 = vpack.c.bf16 %v535_v61, %v528_v60 }
  0xde   : > { %1537 = vmatmul.mubr.bf16.gmra.mrb[88].mxu0 %v626_v3 }
  0xdf   : > { %1544 = vmatprep.mubr.bf16.mxu0 %v634_v7 }
  0xe0   : > { %5983 = vmatmul.mubr.msk.bf16.gmra.mrb[88].mxu1 %vm1085_vm0, %v677_v10 }
  0xe1   : > { %5986 = vmatprep.mubr.msk.bf16.mxu1 %vm1085_vm0, %v684_v11 }
  0xe6   : > { %1545 = vmatmul.mubr.bf16.gmra.mrb[92].mxu0 %v633_v16 }
  0xe7   : > { %1552 = vmatprep.mubr.bf16.mxu0 %v641_v19  ;;  %v549_v19 = vld [vmem:[%s7329_s15 + $0x608] sm:$0xff] }
  0xe8   : > { %5987 = vmatmul.mubr.msk.bf16.gmra.mrb[92].mxu1 %vm1085_vm0, %v691_v20 }
  0xee   : > { %1553 = vmatmul.mubr.bf16.gmra.mrb[96].mxu0 %v640_v25 }
  0xef   : > { %1560 = vmatprep.mubr.bf16.mxu0 %v648_v26  ;;  %v675_v26 = vpack.c.bf16 %v549_v19, %v542_v18 }
  0xf6   : > { %1561 = vmatmul.mubr.bf16.gmra.mrb[100].mxu0 %v647_v31 }
  0xf7   : > { %1568 = vmatprep.mubr.bf16.mxu0 %v655_v32 }
  0xfe   : > { %1569 = vmatmul.mubr.bf16.gmra.mrb[104].mxu0 %v654_v37 }
  0xff   : > { %1576 = vmatprep.mubr.bf16.mxu0 %v662_v39 }
 0x101   : > { %v5525_v44 = vpop.f32.mrb[0].mxu0 }
 0x102   : > { %v5526_v46 = vpop.f32.mrb[1].mxu0 }
 0x103   : > { %v5527_v48 = vadd.f32 %v5526_v46, %v5525_v44  ;;  %v5528_v49 = vpop.f32.mrb[2].mxu0  ;;  %v5637_v51 = vpop.f32.mrb[0].mxu1  ;;  %v578_v44 = vld [vmem:[%s7329_s15 + $0x6f0] sm:$0xff] }
 0x104   : > { %v5529_v52 = vpop.f32.mrb[3].mxu0  ;;  %v5638_v55 = vpop.f32.mrb[1].mxu1 }
 0x105   : > { %v1169_v53 = vadd.f32 %v5527_v48, %v7626_v45  ;;  %v5530_v54 = vadd.f32 %v5529_v52, %v5528_v49  ;;  %v5639_v56 = vadd.f32 %v5638_v55, %v5637_v51  ;;  %v5640_v57 = vpop.f32.mrb[2].mxu1  ;;  %v682_v49 = vpack.c.bf16 %v563_v41, %v556_v40 }
 0x106   : > { %1577 = vmatmul.mubr.bf16.gmra.mrb[108].mxu0 %v661_v47  ;;  %v5641_v59 = vpop.f32.mrb[3].mxu1 }
 0x107   : > { %v1172_v58 = vadd.f32 %v5530_v54, %v7626_v45  ;;  %1584 = vmatprep.mubr.bf16.mxu0 %v669_v50  ;;  %v5642_v62 = vadd.f32 %v5641_v59, %v5640_v57  ;;  %v7634_v1 = vadd.f32 %v5639_v56, %v1169_v53  ;;  %v690_v53 = vpack.c.bf16 %v578_v44, %v571_v43 }
 0x109   : > { %v5531_v2 = vpop.f32.mrb[4].mxu0  ;;  %v7636_v5 = vadd.f32 %v5642_v62, %v1172_v58 }
 0x10a   : > { %v5532_v3 = vpop.f32.mrb[5].mxu0 }
 0x10b   : > { %v5533_v6 = vadd.f32 %v5532_v3, %v5531_v2  ;;  %v5534_v7 = vpop.f32.mrb[6].mxu0  ;;  %v5643_v9 = vpop.f32.mrb[4].mxu1 }
 0x10c   : > { %v5535_v10 = vpop.f32.mrb[7].mxu0  ;;  %v5644_v13 = vpop.f32.mrb[5].mxu1 }
 0x10d   : > { %v1177_v11 = vadd.f32 %v5533_v6, %v7626_v45  ;;  %v5536_v12 = vadd.f32 %v5535_v10, %v5534_v7  ;;  %v5645_v14 = vadd.f32 %v5644_v13, %v5643_v9  ;;  %v5646_v15 = vpop.f32.mrb[6].mxu1  ;;  %v689_v7 = vpack.c.bf16 %v577_v0, %v570_v63 }
 0x10e   : > { %1585 = vmatmul.mubr.bf16.gmra.mrb[112].mxu0 %v668_v4  ;;  %v5647_v17 = vpop.f32.mrb[7].mxu1 }
 0x10f   : > { %v1180_v16 = vadd.f32 %v5536_v12, %v7626_v45  ;;  %1592 = vmatprep.mubr.bf16.mxu0 %v676_v8  ;;  %v5648_v20 = vadd.f32 %v5647_v17, %v5646_v15  ;;  %v7644_v23 = vadd.f32 %v5645_v14, %v1177_v11 }
 0x111   : > { %v5537_v24 = vpop.f32.mrb[8].mxu0  ;;  %v7646_v27 = vadd.f32 %v5648_v20, %v1180_v16 }
 0x112   : > { %v5538_v25 = vpop.f32.mrb[9].mxu0 }
 0x113   : > { %v5539_v28 = vadd.f32 %v5538_v25, %v5537_v24  ;;  %v5540_v29 = vpop.f32.mrb[10].mxu0  ;;  %v5649_v31 = vpop.f32.mrb[8].mxu1 }
 0x114   : > { %v5541_v32 = vpop.f32.mrb[11].mxu0  ;;  %v5650_v35 = vpop.f32.mrb[9].mxu1 }
 0x115   : > { %v1185_v33 = vadd.f32 %v5539_v28, %v7626_v45  ;;  %v5542_v34 = vadd.f32 %v5541_v32, %v5540_v29  ;;  %v5651_v36 = vadd.f32 %v5650_v35, %v5649_v31  ;;  %v5652_v37 = vpop.f32.mrb[10].mxu1 }
 0x116   : > { %1593 = vmatmul.mubr.bf16.gmra.mrb[116].mxu0 %v675_v26  ;;  %v5653_v39 = vpop.f32.mrb[11].mxu1 }
 0x117   : > { %v1188_v38 = vadd.f32 %v5542_v34, %v7626_v45  ;;  %1600 = vmatprep.mubr.bf16.mxu0 %v683_v30  ;;  %v5654_v42 = vadd.f32 %v5653_v39, %v5652_v37  ;;  %v7654_v46 = vadd.f32 %v5651_v36, %v1185_v33 }
 0x119   : > { %v5543_v47 = vpop.f32.mrb[12].mxu0  ;;  %v7656_v50 = vadd.f32 %v5654_v42, %v1188_v38 }
 0x11a   : > { %v5544_v48 = vpop.f32.mrb[13].mxu0 }
 0x11b   : > { %v5545_v51 = vadd.f32 %v5544_v48, %v5543_v47  ;;  %v5546_v52 = vpop.f32.mrb[14].mxu0  ;;  %v5655_v54 = vpop.f32.mrb[12].mxu1 }
 0x11c   : > { %v5547_v55 = vpop.f32.mrb[15].mxu0  ;;  %v5656_v58 = vpop.f32.mrb[13].mxu1 }
 0x11d   : > { %v1193_v56 = vadd.f32 %v5545_v51, %v7626_v45  ;;  %v5548_v57 = vadd.f32 %v5547_v55, %v5546_v52  ;;  %v5657_v59 = vadd.f32 %v5656_v58, %v5655_v54  ;;  %v5658_v60 = vpop.f32.mrb[14].mxu1 }
 0x11e   : > { %1601 = vmatmul.mubr.bf16.gmra.mrb[120].mxu0 %v682_v49  ;;  %v5659_v62 = vpop.f32.mrb[15].mxu1 }
 0x11f   : > { %v1196_v61 = vadd.f32 %v5548_v57, %v7626_v45  ;;  %1608 = vmatprep.mubr.bf16.mxu0 %v690_v53  ;;  %v5660_v2 = vadd.f32 %v5659_v62, %v5658_v60  ;;  %v7662_v3 = vadd.f32 %v5657_v59, %v1193_v56 }
 0x121   : > { %v5549_v4 = vpop.f32.mrb[16].mxu0  ;;  %v7664_v8 = vadd.f32 %v5660_v2, %v1196_v61 }
 0x122   : > { %v5550_v6 = vpop.f32.mrb[17].mxu0 }
 0x123   : > { %v5551_v9 = vadd.f32 %v5550_v6, %v5549_v4  ;;  %v5552_v10 = vpop.f32.mrb[18].mxu0  ;;  %v5661_v11 = vpop.f32.mrb[16].mxu1 }
 0x124   : > { %v5553_v12 = vpop.f32.mrb[19].mxu0  ;;  %v5662_v15 = vpop.f32.mrb[17].mxu1 }
 0x125   : > { %v1201_v13 = vadd.f32 %v5551_v9, %v7626_v45  ;;  %v5554_v14 = vadd.f32 %v5553_v12, %v5552_v10  ;;  %v5663_v16 = vadd.f32 %v5662_v15, %v5661_v11  ;;  %v5664_v17 = vpop.f32.mrb[18].mxu1 }
 0x126   : > { %1609 = vmatmul.mubr.bf16.gmra.mrb[124].mxu0 %v689_v7  ;;  %v5665_v19 = vpop.f32.mrb[19].mxu1 }
 0x127   : > { %v1204_v18 = vadd.f32 %v5554_v14, %v7626_v45  ;;  %v5666_v20 = vadd.f32 %v5665_v19, %v5664_v17  ;;  %v7668_v21 = vadd.f32 %v5663_v16, %v1201_v13 }
 0x129   : > { %v5555_v22 = vpop.f32.mrb[20].mxu0  ;;  %v7670_v25 = vadd.f32 %v5666_v20, %v1204_v18 }
 0x12a   : > { %v5556_v24 = vpop.f32.mrb[21].mxu0 }
 0x12b   : > { %v5557_v26 = vadd.f32 %v5556_v24, %v5555_v22  ;;  %v5558_v28 = vpop.f32.mrb[22].mxu0  ;;  %v5667_v29 = vpop.f32.mrb[20].mxu1 }
 0x12c   : > { %v5559_v30 = vpop.f32.mrb[23].mxu0  ;;  %v5668_v33 = vpop.f32.mrb[21].mxu1 }
 0x12d   : > { %v1209_v31 = vadd.f32 %v5557_v26, %v7626_v45  ;;  %v5560_v32 = vadd.f32 %v5559_v30, %v5558_v28  ;;  %v5669_v34 = vadd.f32 %v5668_v33, %v5667_v29  ;;  %v5670_v35 = vpop.f32.mrb[22].mxu1 }
 0x12e   : > { %v5671_v37 = vpop.f32.mrb[23].mxu1 }
 0x12f   : > { %v1212_v36 = vadd.f32 %v5560_v32, %v7626_v45  ;;  %v5672_v38 = vadd.f32 %v5671_v37, %v5670_v35  ;;  %v7674_v39 = vadd.f32 %v5669_v34, %v1209_v31 }
 0x131   : > { %v5561_v40 = vpop.f32.mrb[24].mxu0  ;;  %v7676_v42 = vadd.f32 %v5672_v38, %v1212_v36 }
 0x132   : > { %v5562_v41 = vpop.f32.mrb[25].mxu0 }
 0x133   : > { %v5563_v43 = vadd.f32 %v5562_v41, %v5561_v40  ;;  %v5564_v44 = vpop.f32.mrb[26].mxu0  ;;  %v5673_v47 = vpop.f32.mrb[24].mxu1 }
 0x134   : > { %v5565_v48 = vpop.f32.mrb[27].mxu0  ;;  %v5674_v52 = vpop.f32.mrb[25].mxu1 }
 0x135   : > { %v1217_v49 = vadd.f32 %v5563_v43, %v7626_v45  ;;  %v5566_v51 = vadd.f32 %v5565_v48, %v5564_v44  ;;  %v5675_v53 = vadd.f32 %v5674_v52, %v5673_v47  ;;  %v5676_v54 = vpop.f32.mrb[26].mxu1 }
 0x136   : > { %v5677_v56 = vpop.f32.mrb[27].mxu1 }
 0x137   : > { %v1220_v55 = vadd.f32 %v5566_v51, %v7626_v45  ;;  %v5678_v57 = vadd.f32 %v5677_v56, %v5676_v54  ;;  %v7680_v58 = vadd.f32 %v5675_v53, %v1217_v49 }
 0x139   : > { %v5567_v59 = vpop.f32.mrb[28].mxu0  ;;  %v7682_v61 = vadd.f32 %v5678_v57, %v1220_v55 }
 0x13a   : > { %v5568_v60 = vpop.f32.mrb[29].mxu0 }
 0x13b   : > { %v5569_v62 = vadd.f32 %v5568_v60, %v5567_v59  ;;  %v5570_v63 = vpop.f32.mrb[30].mxu0  ;;  %v5679_v0 = vpop.f32.mrb[28].mxu1 }
 0x13c   : > { %v5571_v2 = vpop.f32.mrb[31].mxu0  ;;  %v5680_v7 = vpop.f32.mrb[29].mxu1 }
 0x13d   : > { %v1225_v4 = vadd.f32 %v5569_v62, %v7626_v45  ;;  %v5572_v6 = vadd.f32 %v5571_v2, %v5570_v63  ;;  %v5681_v9 = vadd.f32 %v5680_v7, %v5679_v0  ;;  %v5682_v10 = vpop.f32.mrb[30].mxu1 }
 0x13e   : > { %v5683_v12 = vpop.f32.mrb[31].mxu1 }
 0x13f   : > { %v1228_v11 = vadd.f32 %v5572_v6, %v7626_v45  ;;  %v5684_v13 = vadd.f32 %v5683_v12, %v5682_v10  ;;  %v7686_v14 = vadd.f32 %v5681_v9, %v1225_v4 }
 0x141   : > { %v5573_v15 = vpop.f32.mrb[32].mxu0  ;;  %v7688_v17 = vadd.f32 %v5684_v13, %v1228_v11 }
 0x142   : > { %v5574_v16 = vpop.f32.mrb[33].mxu0 }
 0x143   : > { %v5575_v18 = vadd.f32 %v5574_v16, %v5573_v15  ;;  %v5576_v19 = vpop.f32.mrb[34].mxu0  ;;  %v5685_v20 = vpop.f32.mrb[32].mxu1 }
 0x144   : > { %v5577_v22 = vpop.f32.mrb[35].mxu0  ;;  %v5686_v28 = vpop.f32.mrb[33].mxu1 }
 0x145   : > { %v1233_v24 = vadd.f32 %v5575_v18, %v7626_v45  ;;  %v5578_v26 = vadd.f32 %v5577_v22, %v5576_v19  ;;  %v5687_v29 = vadd.f32 %v5686_v28, %v5685_v20  ;;  %v5688_v30 = vpop.f32.mrb[34].mxu1 }
 0x146   : > { %v5689_v32 = vpop.f32.mrb[35].mxu1 }
 0x147   : > { %v1236_v31 = vadd.f32 %v5578_v26, %v7626_v45  ;;  %v7692_v33 = vadd.f32 %v5687_v29, %v1233_v24  ;;  %v5690_v34 = vadd.f32 %v5689_v32, %v5688_v30 }
 0x149   : > { %v5579_v35 = vpop.f32.mrb[36].mxu0  ;;  %v7694_v36 = vadd.f32 %v5690_v34, %v1236_v31 }
 0x14a   : > { %v5580_v37 = vpop.f32.mrb[37].mxu0 }
 0x14b   : > { %v5581_v38 = vadd.f32 %v5580_v37, %v5579_v35  ;;  %v5582_v40 = vpop.f32.mrb[38].mxu0  ;;  %v5691_v41 = vpop.f32.mrb[36].mxu1 }
 0x14c   : > { %v5583_v43 = vpop.f32.mrb[39].mxu0  ;;  %v5692_v48 = vpop.f32.mrb[37].mxu1 }
 0x14d   : > { %v1241_v44 = vadd.f32 %v5581_v38, %v7626_v45  ;;  %v5584_v47 = vadd.f32 %v5583_v43, %v5582_v40  ;;  %v5693_v49 = vadd.f32 %v5692_v48, %v5691_v41  ;;  %v5694_v51 = vpop.f32.mrb[38].mxu1 }
 0x14e   : > { %v5695_v53 = vpop.f32.mrb[39].mxu1 }
 0x14f   : > { %v1244_v52 = vadd.f32 %v5584_v47, %v7626_v45  ;;  %v7698_v54 = vadd.f32 %v5693_v49, %v1241_v44  ;;  %v5696_v55 = vadd.f32 %v5695_v53, %v5694_v51 }
 0x151   : > { %v5585_v56 = vpop.f32.mrb[40].mxu0  ;;  %v7700_v57 = vadd.f32 %v5696_v55, %v1244_v52 }
 0x152   : > { %v5586_v59 = vpop.f32.mrb[41].mxu0 }
 0x153   : > { %v5587_v60 = vadd.f32 %v5586_v59, %v5585_v56  ;;  %v5588_v62 = vpop.f32.mrb[42].mxu0  ;;  %v5697_v63 = vpop.f32.mrb[40].mxu1 }
 0x154   : > { %v5589_v0 = vpop.f32.mrb[43].mxu0  ;;  %v5698_v6 = vpop.f32.mrb[41].mxu1 }
 0x155   : > { %v1249_v2 = vadd.f32 %v5587_v60, %v7626_v45  ;;  %v5590_v4 = vadd.f32 %v5589_v0, %v5588_v62  ;;  %v5699_v7 = vadd.f32 %v5698_v6, %v5697_v63  ;;  %v5700_v9 = vpop.f32.mrb[42].mxu1 }
 0x156   : > { %v5701_v11 = vpop.f32.mrb[43].mxu1 }
 0x157   : > { %v1252_v10 = vadd.f32 %v5590_v4, %v7626_v45  ;;  %v7704_v12 = vadd.f32 %v5699_v7, %v1249_v2  ;;  %v5702_v13 = vadd.f32 %v5701_v11, %v5700_v9 }
 0x159   : > { %v5591_v15 = vpop.f32.mrb[44].mxu0  ;;  %v7706_v16 = vadd.f32 %v5702_v13, %v1252_v10 }
 0x15a   : > { %v5592_v18 = vpop.f32.mrb[45].mxu0 }
 0x15b   : > { %v5593_v19 = vadd.f32 %v5592_v18, %v5591_v15  ;;  %v5594_v20 = vpop.f32.mrb[46].mxu0  ;;  %v5703_v22 = vpop.f32.mrb[44].mxu1 }
 0x15c   : > { %v5595_v24 = vpop.f32.mrb[47].mxu0  ;;  %v5704_v29 = vpop.f32.mrb[45].mxu1 }
 0x15d   : > { %v1257_v26 = vadd.f32 %v5593_v19, %v7626_v45  ;;  %v5596_v28 = vadd.f32 %v5595_v24, %v5594_v20  ;;  %v5705_v30 = vadd.f32 %v5704_v29, %v5703_v22  ;;  %v5706_v31 = vpop.f32.mrb[46].mxu1 }
 0x15e   : > { %v5707_v34 = vpop.f32.mrb[47].mxu1 }
 0x15f   : > { %v1260_v32 = vadd.f32 %v5596_v28, %v7626_v45  ;;  %v7710_v35 = vadd.f32 %v5705_v30, %v1257_v26  ;;  %v5708_v37 = vadd.f32 %v5707_v34, %v5706_v31 }
 0x161   : > { %v5597_v38 = vpop.f32.mrb[48].mxu0  ;;  %v7712_v40 = vadd.f32 %v5708_v37, %v1260_v32 }
 0x162   : > { %v5598_v41 = vpop.f32.mrb[49].mxu0 }
 0x163   : > { %v5599_v43 = vadd.f32 %v5598_v41, %v5597_v38  ;;  %v5600_v44 = vpop.f32.mrb[50].mxu0  ;;  %v5709_v47 = vpop.f32.mrb[48].mxu1 }
 0x164   : > { %v5601_v48 = vpop.f32.mrb[51].mxu0  ;;  %v5710_v52 = vpop.f32.mrb[49].mxu1 }
 0x165   : > { %v1265_v49 = vadd.f32 %v5599_v43, %v7626_v45  ;;  %v5602_v51 = vadd.f32 %v5601_v48, %v5600_v44  ;;  %v5711_v53 = vadd.f32 %v5710_v52, %v5709_v47  ;;  %v5712_v55 = vpop.f32.mrb[50].mxu1  ;;  %v6239_v43 = vld [vmem:[%s9434_s3] sm:$0xff]  }
 0x166   : > { %v5713_v59 = vpop.f32.mrb[51].mxu1  ;;  %6026 = vmatprep.subr.bf16.mxu0 %v6239_v43 }
 0x167   : > { %v1268_v56 = vadd.f32 %v5602_v51, %v7626_v45  ;;  %v7716_v60 = vadd.f32 %v5711_v53, %v1265_v49  ;;  %v5714_v62 = vadd.f32 %v5713_v59, %v5712_v55  ;;  %6027 = vmatpush3.bf16.msra.mxu0 %v6239_v43 }
 0x169   : > { %v5603_v63 = vpop.f32.mrb[52].mxu0  ;;  %v7718_v0 = vadd.f32 %v5714_v62, %v1268_v56 }
 0x16a   : > { %v5604_v2 = vpop.f32.mrb[53].mxu0 }
 0x16b   : > { %v5605_v4 = vadd.f32 %v5604_v2, %v5603_v63  ;;  %v5606_v6 = vpop.f32.mrb[54].mxu0  ;;  %v5715_v7 = vpop.f32.mrb[52].mxu1 }
 0x16c   : > { %v5607_v9 = vpop.f32.mrb[55].mxu0  ;;  %v5716_v13 = vpop.f32.mrb[53].mxu1 }
 0x16d   : > { %v1273_v10 = vadd.f32 %v5605_v4, %v7626_v45  ;;  %v5608_v11 = vadd.f32 %v5607_v9, %v5606_v6  ;;  %v5717_v15 = vadd.f32 %v5716_v13, %v5715_v7  ;;  %v5718_v18 = vpop.f32.mrb[54].mxu1 }
 0x16e   : > { %v5719_v20 = vpop.f32.mrb[55].mxu1 }
 0x16f   : > { %v1276_v19 = vadd.f32 %v5608_v11, %v7626_v45  ;;  %v7722_v22 = vadd.f32 %v5717_v15, %v1273_v10  ;;  %v5720_v24 = vadd.f32 %v5719_v20, %v5718_v18 }
 0x171   : > { %v5609_v26 = vpop.f32.mrb[56].mxu0  ;;  %v7724_v28 = vadd.f32 %v5720_v24, %v1276_v19 }
 0x172   : > { %v5610_v29 = vpop.f32.mrb[57].mxu0 }
 0x173   : > { %v5611_v30 = vadd.f32 %v5610_v29, %v5609_v26  ;;  %v5612_v31 = vpop.f32.mrb[58].mxu0  ;;  %v5721_v32 = vpop.f32.mrb[56].mxu1 }
 0x174   : > { %v5613_v34 = vpop.f32.mrb[59].mxu0  ;;  %v5722_v41 = vpop.f32.mrb[57].mxu1 }
 0x175   : > { %v1281_v37 = vadd.f32 %v5611_v30, %v7626_v45  ;;  %v5614_v38 = vadd.f32 %v5613_v34, %v5612_v31  ;;  %v5723_v44 = vadd.f32 %v5722_v41, %v5721_v32  ;;  %v5724_v47 = vpop.f32.mrb[58].mxu1 }
 0x176   : > { %v5725_v49 = vpop.f32.mrb[59].mxu1 }
 0x177   : > { %v1284_v48 = vadd.f32 %v5614_v38, %v7626_v45  ;;  %v7731_v51 = vadd.f32 %v5723_v44, %v1281_v37  ;;  %v5726_v52 = vadd.f32 %v5725_v49, %v5724_v47 }
 0x179   : > { %v5615_v53 = vpop.f32.mrb[60].mxu0  ;;  %v7733_v55 = vadd.f32 %v5726_v52, %v1284_v48 }
 0x17a   : > { %v5616_v56 = vpop.f32.mrb[61].mxu0 }
 0x17b   : > { %v5617_v59 = vadd.f32 %v5616_v56, %v5615_v53  ;;  %v5618_v62 = vpop.f32.mrb[62].mxu0  ;;  %v5727_v63 = vpop.f32.mrb[60].mxu1 }
 0x17c   : > { %v5619_v2 = vpop.f32.mrb[63].mxu0  ;;  %v5728_v7 = vpop.f32.mrb[61].mxu1 }
 0x17d   : > { %v1289_v4 = vadd.f32 %v5617_v59, %v7626_v45  ;;  %v5620_v6 = vadd.f32 %v5619_v2, %v5618_v62  ;;  %v5729_v9 = vadd.f32 %v5728_v7, %v5727_v63  ;;  %v5730_v10 = vpop.f32.mrb[62].mxu1 }
 0x17e   : > { %v5731_v13 = vpop.f32.mrb[63].mxu1 }
 0x17f   : > { %v1292_v11 = vadd.f32 %v5620_v6, %v7626_v45  ;;  %v7737_v15 = vadd.f32 %v5729_v9, %v1289_v4  ;;  %v5732_v18 = vadd.f32 %v5731_v13, %v5730_v10 }
 0x181   : > { %v5749_v19 = vpop.f32.mrb[64].mxu0  ;;  %v7739_v20 = vadd.f32 %v5732_v18, %v1292_v11 }
 0x182   : > { %v5750_v24 = vpop.f32.mrb[65].mxu0 }
 0x183   : > { %v5751_v26 = vadd.f32 %v5750_v24, %v5749_v19  ;;  %v5752_v29 = vpop.f32.mrb[66].mxu0  ;;  %v5960_v31 = vpop.f32.mrb[64].mxu1 }
 0x184   : > { %v5753_v30 = vpop.f32.mrb[67].mxu0  ;;  %v1651_v37 = vpop.f32.mrb[65].mxu1 }
 0x185   : > { %v5754_v32 = vadd.f32 %v5753_v30, %v5752_v29  ;;  %v1491_v34 = vadd.f32 %v5751_v26, %v7634_v1  ;;  %v5961_v38 = vpop.f32.mrb[66].mxu1 }
 0x186   : > { %v1654_v43 = vpop.f32.mrb[67].mxu1 }
 0x187   : > { %v1652_v41 = vadd.f32 %v1651_v37, %v1491_v34  ;;  %v1494_v45 = vadd.f32 %v5754_v32, %v7636_v5 }
 0x189   : > { %v1655_v44 = vadd.f32 %v1654_v43, %v1494_v45  ;;  %v5755_v47 = vpop.f32.mrb[68].mxu0  ;;  %v1778_v49 = vmax.f32 %v1652_v41, 0.0 }
 0x18a   : > { %v5756_v48 = vpop.f32.mrb[69].mxu0 }
 0x18b   : > { %v1779_v52 = vmax.f32 %v1655_v44, 0.0  ;;  %v5757_v53 = vadd.f32 %v5756_v48, %v5755_v47  ;;  %v5758_v56 = vpop.f32.mrb[70].mxu0  ;;  %v5964_v62 = vpop.f32.mrb[68].mxu1 }
 0x18c   : > { %v5759_v59 = vpop.f32.mrb[71].mxu0  ;;  %v1667_v4 = vpop.f32.mrb[69].mxu1 }
 0x18d   : > { %v1810_v63 = vpack.c.bf16 %v1779_v52, %v1778_v49  ;;  %v1499_v2 = vadd.f32 %v5757_v53, %v7644_v23  ;;  %v5760_v1 = vadd.f32 %v5759_v59, %v5758_v56  ;;  %v5965_v6 = vpop.f32.mrb[70].mxu1 }
 0x18e   : > { %v1670_v9 = vpop.f32.mrb[71].mxu1 }
 0x18f   : > { %v1660_v7 = vadd.f32 %v5960_v31, %v1499_v2  ;;  %v1502_v5 = vadd.f32 %v5760_v1, %v7646_v27  ;;  %5994 = vmatprep.mubr.msk.bf16.mxu1 %vm1843_vm1, %v1810_v63 }
 0x191   : > { %v1663_v10 = vadd.f32 %v5961_v38, %v1502_v5  ;;  %v5761_v11 = vpop.f32.mrb[72].mxu0  ;;  %v1780_v18 = vmax.f32 %v1660_v7, 0.0 }
 0x192   : > { %v5762_v13 = vpop.f32.mrb[73].mxu0 }
 0x193   : > { %v1781_v19 = vmax.f32 %v1663_v10, 0.0  ;;  %v5763_v24 = vadd.f32 %v5762_v13, %v5761_v11  ;;  %v5764_v26 = vpop.f32.mrb[74].mxu0  ;;  %v5968_v30 = vpop.f32.mrb[72].mxu1 }
 0x194   : > { %v5765_v29 = vpop.f32.mrb[75].mxu0  ;;  %v1683_v37 = vpop.f32.mrb[73].mxu1 }
 0x195   : > { %v1811_v32 = vpack.c.bf16 %v1781_v19, %v1780_v18  ;;  %v5766_v23 = vadd.f32 %v5765_v29, %v5764_v26  ;;  %v1507_v34 = vadd.f32 %v5763_v24, %v7654_v46  ;;  %v5969_v31 = vpop.f32.mrb[74].mxu1 }
 0x196   : > { %v1686_v38 = vpop.f32.mrb[75].mxu1 }
 0x197   : > { %v1668_v41 = vadd.f32 %v1667_v4, %v1507_v34  ;;  %5995 = vmatmul.mubr.msk.bf16.vlgmr.msra.gmra.mrb[96].mxu1 %vm1843_vm1, %v1811_v32  ;;  %v1510_v27 = vadd.f32 %v5766_v23, %v7656_v50 }
 0x199   : > { %v1671_v45 = vadd.f32 %v1670_v9, %v1510_v27  ;;  %v5767_v43 = vpop.f32.mrb[76].mxu0  ;;  %v1782_v47 = vmax.f32 %v1668_v41, 0.0 }
 0x19a   : > { %v5768_v44 = vpop.f32.mrb[77].mxu0 }
 0x19b   : > { %v1783_v48 = vmax.f32 %v1671_v45, 0.0  ;;  %v5769_v49 = vadd.f32 %v5768_v44, %v5767_v43  ;;  %v5770_v52 = vpop.f32.mrb[78].mxu0  ;;  %v7749_v56 = vpop.f32.mrb[76].mxu1 }
 0x19c   : > { %v5771_v53 = vpop.f32.mrb[79].mxu0  ;;  %v1699_v2 = vpop.f32.mrb[77].mxu1 }
 0x19d   : > { %v1812_v59 = vpack.c.bf16 %v1783_v48, %v1782_v47  ;;  %v1515_v46 = vadd.f32 %v5769_v49, %v7662_v3  ;;  %v5772_v63 = vadd.f32 %v5771_v53, %v5770_v52  ;;  %v7752_v1 = vpop.f32.mrb[78].mxu1 }
 0x19e   : > { %v1702_v7 = vpop.f32.mrb[79].mxu1 }
 0x19f   : > { %v1676_v4 = vadd.f32 %v5964_v62, %v1515_v46  ;;  %v1518_v50 = vadd.f32 %v5772_v63, %v7664_v8  ;;  %5998 = vmatprep.mubr.msk.bf16.mxu1 %vm1843_vm1, %v1812_v59 }
 0x1a1   : > { %v1679_v5 = vadd.f32 %v5965_v6, %v1518_v50  ;;  %v5773_v9 = vpop.f32.mrb[80].mxu0  ;;  %v1784_v11 = vmax.f32 %v1676_v4, 0.0 }
 0x1a2   : > { %v5774_v10 = vpop.f32.mrb[81].mxu0 }
 0x1a3   : > { %v1785_v13 = vmax.f32 %v1679_v5, 0.0  ;;  %v5775_v18 = vadd.f32 %v5774_v10, %v5773_v9  ;;  %v5776_v19 = vpop.f32.mrb[82].mxu0  ;;  %v7756_v26 = vpop.f32.mrb[80].mxu1 }
 0x1a4   : > { %v5777_v24 = vpop.f32.mrb[83].mxu0  ;;  %v7759_v62 = vpop.f32.mrb[81].mxu1 }
 0x1a5   : > { %v1813_v3 = vpack.c.bf16 %v1785_v13, %v1784_v11  ;;  %v5778_v29 = vadd.f32 %v5777_v24, %v5776_v19  ;;  %v1523_v32 = vadd.f32 %v5775_v18, %v7668_v21  ;;  %v7761_v8 = vpop.f32.mrb[82].mxu1 }
 0x1a6   : > { %v7765_v34 = vpop.f32.mrb[83].mxu1 }
 0x1a7   : > { %v1684_v23 = vadd.f32 %v1683_v37, %v1523_v32  ;;  %5999 = vmatmul.mubr.msk.bf16.gmra.mrb[100].mxu1 %vm1843_vm1, %v1813_v3  ;;  %v1526_v6 = vadd.f32 %v5778_v29, %v7670_v25 }
 0x1a9   : > { %v1687_v41 = vadd.f32 %v1686_v38, %v1526_v6  ;;  %v5779_v27 = vpop.f32.mrb[84].mxu0  ;;  %v1786_v43 = vmax.f32 %v1684_v23, 0.0 }
 0x1aa   : > { %v5780_v45 = vpop.f32.mrb[85].mxu0 }
 0x1ab   : > { %v1787_v44 = vmax.f32 %v1687_v41, 0.0  ;;  %v5781_v47 = vadd.f32 %v5780_v45, %v5779_v27  ;;  %v5782_v48 = vpop.f32.mrb[86].mxu0  ;;  %v7767_v21 = vpop.f32.mrb[84].mxu1 }
 0x1ac   : > { %v5783_v49 = vpop.f32.mrb[87].mxu0  ;;  %v7770_v59 = vpop.f32.mrb[85].mxu1 }
 0x1ad   : > { %v1814_v52 = vpack.c.bf16 %v1787_v44, %v1786_v43  ;;  %v1531_v53 = vadd.f32 %v5781_v47, %v7674_v39  ;;  %v5784_v37 = vadd.f32 %v5783_v49, %v5782_v48  ;;  %v7772_v46 = vpop.f32.mrb[86].mxu1 }
 0x1ae   : > { %v7776_v63 = vpop.f32.mrb[87].mxu1 }
 0x1af   : > { %v1692_v25 = vadd.f32 %v5968_v30, %v1531_v53  ;;  %v1534_v38 = vadd.f32 %v5784_v37, %v7676_v42  ;;  %6002 = vmatprep.mubr.msk.bf16.mxu1 %vm1843_vm1, %v1814_v52 }
 0x1b1   : > { %v1695_v4 = vadd.f32 %v5969_v31, %v1534_v38  ;;  %v5785_v50 = vpop.f32.mrb[88].mxu0  ;;  %v1788_v9 = vmax.f32 %v1692_v25, 0.0 }
 0x1b2   : > { %v5786_v5 = vpop.f32.mrb[89].mxu0 }
 0x1b3   : > { %v1789_v10 = vmax.f32 %v1695_v4, 0.0  ;;  %v5787_v11 = vadd.f32 %v5786_v5, %v5785_v50  ;;  %v5788_v13 = vpop.f32.mrb[90].mxu0  ;;  %v7778_v18 = vpop.f32.mrb[88].mxu1 }
 0x1b4   : > { %v5789_v39 = vpop.f32.mrb[91].mxu0  ;;  %v7781_v3 = vpop.f32.mrb[89].mxu1 }
 0x1b5   : > { %v1815_v19 = vpack.c.bf16 %v1789_v10, %v1788_v9  ;;  %v5790_v24 = vadd.f32 %v5789_v39, %v5788_v13  ;;  %v1539_v30 = vadd.f32 %v5787_v11, %v7680_v58  ;;  %v7783_v42 = vpop.f32.mrb[90].mxu1 }
 0x1b6   : > { %v7787_v32 = vpop.f32.mrb[91].mxu1 }
 0x1b7   : > { %v1700_v29 = vadd.f32 %v1699_v2, %v1539_v30  ;;  %6003 = vmatmul.mubr.msk.bf16.gmra.mrb[104].mxu1 %vm1843_vm1, %v1815_v19  ;;  %v1542_v31 = vadd.f32 %v5790_v24, %v7682_v61 }
 0x1b9   : > { %v1703_v23 = vadd.f32 %v1702_v7, %v1542_v31  ;;  %v5791_v6 = vpop.f32.mrb[92].mxu0  ;;  %v1790_v27 = vmax.f32 %v1700_v29, 0.0 }
 0x1ba   : > { %v5792_v41 = vpop.f32.mrb[93].mxu0 }
 0x1bb   : > { %v1791_v45 = vmax.f32 %v1703_v23, 0.0  ;;  %v5793_v43 = vadd.f32 %v5792_v41, %v5791_v6  ;;  %v5794_v44 = vpop.f32.mrb[94].mxu0  ;;  %v7789_v58 = vpop.f32.mrb[92].mxu1 }
 0x1bc   : > { %v5795_v47 = vpop.f32.mrb[95].mxu0  ;;  %v7792_v52 = vpop.f32.mrb[93].mxu1 }
 0x1bd   : > { %v1816_v48 = vpack.c.bf16 %v1791_v45, %v1790_v27  ;;  %v1547_v49 = vadd.f32 %v5793_v43, %v7686_v14  ;;  %v5796_v2 = vadd.f32 %v5795_v47, %v5794_v44  ;;  %v7794_v53 = vpop.f32.mrb[94].mxu1 }
 0x1be   : > { %v7799_v37 = vpop.f32.mrb[95].mxu1 }
 0x1bf   : > { %v1708_v61 = vadd.f32 %v7749_v56, %v1547_v49  ;;  %v1550_v7 = vadd.f32 %v5796_v2, %v7688_v17  ;;  %6006 = vmatprep.mubr.msk.bf16.mxu1 %vm1843_vm1, %v1816_v48 }
 0x1c1   : > { %v1711_v25 = vadd.f32 %v7752_v1, %v1550_v7  ;;  %v5797_v38 = vpop.f32.mrb[96].mxu0  ;;  %v1792_v50 = vmax.f32 %v1708_v61, 0.0 }
 0x1c2   : > { %v5798_v4 = vpop.f32.mrb[97].mxu0 }
 0x1c3   : > { %v1793_v5 = vmax.f32 %v1711_v25, 0.0  ;;  %v5799_v14 = vadd.f32 %v5798_v4, %v5797_v38  ;;  %v5800_v9 = vpop.f32.mrb[98].mxu0 }
 0x1c4   : > { %v5801_v10 = vpop.f32.mrb[99].mxu0 }
 0x1c5   : > { %v1817_v11 = vpack.c.bf16 %v1793_v5, %v1792_v50  ;;  %v5802_v13 = vadd.f32 %v5801_v10, %v5800_v9  ;;  %v1555_v39 = vadd.f32 %v5799_v14, %v7692_v33 }
 0x1c7   : > { %v1716_v56 = vadd.f32 %v7759_v62, %v1555_v39  ;;  %6007 = vmatmul.mubr.msk.bf16.gmra.mrb[108].mxu1 %vm1843_vm1, %v1817_v11  ;;  %v1558_v17 = vadd.f32 %v5802_v13, %v7694_v36 }
 0x1c9   : > { %v1719_v19 = vadd.f32 %v7765_v34, %v1558_v17  ;;  %v5803_v1 = vpop.f32.mrb[100].mxu0  ;;  %v1794_v30 = vmax.f32 %v1716_v56, 0.0 }
 0x1ca   : > { %v5804_v24 = vpop.f32.mrb[101].mxu0 }
 0x1cb   : > { %v1795_v29 = vmax.f32 %v1719_v19, 0.0  ;;  %v5805_v31 = vadd.f32 %v5804_v24, %v5803_v1  ;;  %v5806_v23 = vpop.f32.mrb[102].mxu0 }
 0x1cc   : > { %v5807_v6 = vpop.f32.mrb[103].mxu0 }
 0x1cd   : > { %v1818_v41 = vpack.c.bf16 %v1795_v29, %v1794_v30  ;;  %v1563_v27 = vadd.f32 %v5805_v31, %v7698_v54  ;;  %v5808_v45 = vadd.f32 %v5807_v6, %v5806_v23 }
 0x1cf   : > { %v1724_v33 = vadd.f32 %v7756_v26, %v1563_v27  ;;  %v1566_v62 = vadd.f32 %v5808_v45, %v7700_v57  ;;  %6010 = vmatprep.mubr.msk.bf16.mxu1 %vm1843_vm1, %v1818_v41 }
 0x1d1   : > { %v1727_v36 = vadd.f32 %v7761_v8, %v1566_v62  ;;  %v5809_v34 = vpop.f32.mrb[104].mxu0  ;;  %v1796_v44 = vmax.f32 %v1724_v33, 0.0 }
 0x1d2   : > { %v5810_v43 = vpop.f32.mrb[105].mxu0 }
 0x1d3   : > { %v1797_v47 = vmax.f32 %v1727_v36, 0.0  ;;  %v5811_v48 = vadd.f32 %v5810_v43, %v5809_v34  ;;  %v5812_v49 = vpop.f32.mrb[106].mxu0 }
 0x1d4   : > { %v5813_v2 = vpop.f32.mrb[107].mxu0 }
 0x1d5   : > { %v1819_v61 = vpack.c.bf16 %v1797_v47, %v1796_v44  ;;  %v5814_v7 = vadd.f32 %v5813_v2, %v5812_v49  ;;  %v1571_v54 = vadd.f32 %v5811_v48, %v7704_v12 }
 0x1d7   : > { %v1732_v25 = vadd.f32 %v7770_v59, %v1571_v54  ;;  %6011 = vmatmul.mubr.msk.bf16.gmra.mrb[112].mxu1 %vm1843_vm1, %v1819_v61  ;;  %v1574_v57 = vadd.f32 %v5814_v7, %v7706_v16 }
 0x1d9   : > { %v1735_v26 = vadd.f32 %v7776_v63, %v1574_v57  ;;  %v5815_v8 = vpop.f32.mrb[108].mxu0  ;;  %v1798_v4 = vmax.f32 %v1732_v25, 0.0 }
 0x1da   : > { %v5816_v38 = vpop.f32.mrb[109].mxu0 }
 0x1db   : > { %v1799_v50 = vmax.f32 %v1735_v26, 0.0  ;;  %v5817_v5 = vadd.f32 %v5816_v38, %v5815_v8  ;;  %v5818_v14 = vpop.f32.mrb[110].mxu0 }
 0x1dc   : > { %v5819_v9 = vpop.f32.mrb[111].mxu0 }
 0x1dd   : > { %v1820_v10 = vpack.c.bf16 %v1799_v50, %v1798_v4  ;;  %v1579_v11 = vadd.f32 %v5817_v5, %v7710_v35  ;;  %v5820_v13 = vadd.f32 %v5819_v9, %v5818_v14 }
 0x1df   : > { %v1740_v12 = vadd.f32 %v7767_v21, %v1579_v11  ;;  %v1582_v59 = vadd.f32 %v5820_v13, %v7712_v40  ;;  %6014 = vmatprep.mubr.msk.bf16.mxu1 %vm1843_vm1, %v1820_v10  ;;  %v6240_v11 = vld [vmem:[%s9435_s4] sm:$0xff]  }
 0x1e0   : > { %6060 = vmatprep.subr.bf16.mxu1 %v6240_v11 }
 0x1e1   : > { %v1743_v16 = vadd.f32 %v7772_v46, %v1582_v59  ;;  %v5821_v63 = vpop.f32.mrb[112].mxu0  ;;  %v1800_v56 = vmax.f32 %v1740_v12, 0.0  ;;  %6061 = vmatpush3.bf16.msra.mxu1 %v6240_v11 }
 0x1e2   : > { %v5822_v39 = vpop.f32.mrb[113].mxu0 }
 0x1e3   : > { %v1801_v17 = vmax.f32 %v1743_v16, 0.0  ;;  %v5823_v19 = vadd.f32 %v5822_v39, %v5821_v63  ;;  %v5824_v1 = vpop.f32.mrb[114].mxu0 }
 0x1e4   : > { %v5825_v24 = vpop.f32.mrb[115].mxu0 }
 0x1e5   : > { %v1821_v30 = vpack.c.bf16 %v1801_v17, %v1800_v56  ;;  %v5826_v29 = vadd.f32 %v5825_v24, %v5824_v1  ;;  %v1587_v35 = vadd.f32 %v5823_v19, %v7716_v60  ;;  %v6243_v56 = vld [vmem:[%s9435_s4 + $0x18] sm:$0xff]  }
 0x1e7   : > { %v1748_v31 = vadd.f32 %v7781_v3, %v1587_v35  ;;  %6015 = vmatmul.mubr.msk.bf16.gmra.mrb[116].mxu1 %vm1843_vm1, %v1821_v30  ;;  %v1590_v40 = vadd.f32 %v5826_v29, %v7718_v0  ;;  %v6244_v35 = vld [vmem:[%s9435_s4 + $0x20] sm:$0xff]  }
 0x1e9   : > { %v1751_v21 = vadd.f32 %v7787_v32, %v1590_v40  ;;  %v5827_v46 = vpop.f32.mrb[116].mxu0  ;;  %v1802_v6 = vmax.f32 %v1748_v31, 0.0  ;;  %v6245_v40 = vld [vmem:[%s9435_s4 + $0x28] sm:$0xff]  }
 0x1ea   : > { %v5828_v23 = vpop.f32.mrb[117].mxu0 }
 0x1eb   : > { %v1803_v41 = vmax.f32 %v1751_v21, 0.0  ;;  %v5829_v27 = vadd.f32 %v5828_v23, %v5827_v46  ;;  %v5830_v45 = vpop.f32.mrb[118].mxu0  ;;  %v6246_v21 = vld [vmem:[%s9435_s4 + $0x30] sm:$0xff]  }
 0x1ec   : > { %v5831_v33 = vpop.f32.mrb[119].mxu0 }
 0x1ed   : > { %v1822_v62 = vpack.c.bf16 %v1803_v41, %v1802_v6  ;;  %v1595_v36 = vadd.f32 %v5829_v27, %v7722_v22  ;;  %v5832_v34 = vadd.f32 %v5831_v33, %v5830_v45 }
 0x1ef   : > { %v1756_v60 = vadd.f32 %v7778_v18, %v1595_v36  ;;  %v1598_v3 = vadd.f32 %v5832_v34, %v7724_v28  ;;  %6018 = vmatprep.mubr.msk.bf16.mxu1 %vm1843_vm1, %v1822_v62 }
 0x1f1   : > { %v1759_v0 = vadd.f32 %v7783_v42, %v1598_v3  ;;  %v5833_v32 = vpop.f32.mrb[120].mxu0  ;;  %v1804_v44 = vmax.f32 %v1756_v60, 0.0 }
 0x1f2   : > { %v5834_v43 = vpop.f32.mrb[121].mxu0 }
 0x1f3   : > { %v1805_v47 = vmax.f32 %v1759_v0, 0.0  ;;  %v5835_v48 = vadd.f32 %v5834_v43, %v5833_v32  ;;  %v5836_v49 = vpop.f32.mrb[122].mxu0 }
 0x1f4   : > { %v5837_v2 = vpop.f32.mrb[123].mxu0 }
 0x1f5   : > { %v1823_v61 = vpack.c.bf16 %v1805_v47, %v1804_v44  ;;  %v5838_v7 = vadd.f32 %v5837_v2, %v5836_v49  ;;  %v1603_v22 = vadd.f32 %v5835_v48, %v7731_v51 }
 0x1f7   : > { %v1764_v54 = vadd.f32 %v7792_v52, %v1603_v22  ;;  %6019 = vmatmul.mubr.msk.bf16.gmra.mrb[120].mxu1 %vm1843_vm1, %v1823_v61  ;;  %v1606_v28 = vadd.f32 %v5838_v7, %v7733_v55 }
 0x1f9   : > { %v1767_v18 = vadd.f32 %v7799_v37, %v1606_v28  ;;  %v5839_v42 = vpop.f32.mrb[124].mxu0  ;;  %v1806_v57 = vmax.f32 %v1764_v54, 0.0 }
 0x1fa   : > { %v5840_v25 = vpop.f32.mrb[125].mxu0 }
 0x1fb   : > { %v1807_v26 = vmax.f32 %v1767_v18, 0.0  ;;  %v5841_v8 = vadd.f32 %v5840_v25, %v5839_v42  ;;  %v5842_v38 = vpop.f32.mrb[126].mxu0 }
 0x1fc   : > { %v5843_v4 = vpop.f32.mrb[127].mxu0 }
 0x1fd   : > { %v1824_v50 = vpack.c.bf16 %v1807_v26, %v1806_v57  ;;  %v1611_v5 = vadd.f32 %v5841_v8, %v7737_v15  ;;  %v5844_v14 = vadd.f32 %v5843_v4, %v5842_v38  ;;  %v6241_v15 = vld [vmem:[%s9435_s4 + $0x8] sm:$0xff]  }
 0x1fe   : > { %6062 = vmatprep.subr.bf16.mxu1 %v6241_v15 }
 0x1ff   : > { %v1772_v51 = vadd.f32 %v7789_v58, %v1611_v5  ;;  %v1614_v52 = vadd.f32 %v5844_v14, %v7739_v20  ;;  %6022 = vmatprep.mubr.msk.bf16.mxu1 %vm1843_vm1, %v1824_v50  ;;  %v7852_v20 = vld [vmem:[%s9438_s7 + $0x1] ss:$0 sm:$0xff]  ;;  %v6242_v58 = vld [vmem:[%s9435_s4 + $0x10] sm:$0xff]   ;;  %6063 = vmatpush3.bf16.msra.mxu1 %v6241_v15 }
 0x200   : > { %6064 = vmatprep.subr.bf16.mxu1 %v6242_v58 }
 0x201   : > { %v1775_v55 = vadd.f32 %v7794_v53, %v1614_v52  ;;  %v1808_v37 = vmax.f32 %v1772_v51, 0.0 }
 0x203   : > { %v1809_v9 = vmax.f32 %v1775_v55, 0.0  ;;  %6065 = vmatpush3.bf16.msra.mxu1 %v6242_v58 }
 0x204   : > { %6066 = vmatprep.subr.bf16.mxu1 %v6243_v56 }
 0x205   : > { %v1825_v10 = vpack.c.bf16 %v1809_v9, %v1808_v37 }
 0x207   : > { %6023 = vmatmul.mubr.msk.bf16.gmra.mrb[124].mxu1 %vm1843_vm1, %v1825_v10 }
 0x208   : > { %6067 = vmatpush3.bf16.msra.mxu1 %v6243_v56 }
 0x209   : > { %6068 = vmatprep.subr.bf16.mxu1 %v6244_v35 }
 0x20c   : > { %6069 = vmatpush3.bf16.msra.mxu1 %v6244_v35 }
 0x20d   : > { %6070 = vmatprep.subr.bf16.mxu1 %v6245_v40 }
 0x210   : > { %6071 = vmatpush3.bf16.msra.mxu1 %v6245_v40 }
 0x211   : > { %6072 = vmatprep.subr.bf16.mxu1 %v6246_v21 }
 0x214   : > { %6073 = vmatpush3.bf16.msra.mxu1 %v6246_v21 }
 0x26a   : > { %v5996_v53 = vpop.f32.mrb[96].mxu1 }
 0x26b   : > { %v1935_v13 = vadd.f32 %v5996_v53, %v7852_v20  ;;  %v1926_v12 = vpop.f32.mrb[97].mxu1 }
 0x26c   : > { %v1927_v59 = vadd.f32 %v1926_v12, %v7852_v20  ;;  %v5997_v16 = vpop.f32.mrb[98].mxu1 }
 0x26d   : > { %v1938_v63 = vadd.f32 %v5997_v16, %v7852_v20  ;;  %v1929_v39 = vpop.f32.mrb[99].mxu1  ;;  %v2055_v19 = vmax.f32 %v1935_v13, 0.0 }
 0x26e   : > { %v1930_v17 = vadd.f32 %v1929_v39, %v7852_v20  ;;  %v2053_v24 = vmax.f32 %v1927_v59, 0.0 }
 0x26f   : > { %v2056_v1 = vmax.f32 %v1938_v63, 0.0 }
 0x270   : > { %v2054_v30 = vmax.f32 %v1930_v17, 0.0 }
 0x271   : > { %v2086_v29 = vpack.c.bf16 %v2056_v1, %v2055_v19 }
 0x272   : > { %v2085_v31 = vpack.c.bf16 %v2054_v30, %v2053_v24 }
 0x274   : > { %6028 = vmatprep.mubr.msk.bf16.mxu0 %vm1085_vm0, %v2085_v31 }
 0x275   : > { %6029 = vmatmul.mubr.msk.bf16.vlgmr.msra.gmra.mrb[128].mxu0 %vm1085_vm0, %v2086_v29 }
 0x27a   : > { %v6000_v46 = vpop.f32.mrb[100].mxu1 }
 0x27b   : > { %v1951_v23 = vadd.f32 %v6000_v46, %v7852_v20  ;;  %v1942_v6 = vpop.f32.mrb[101].mxu1 }
 0x27c   : > { %v1943_v41 = vadd.f32 %v1942_v6, %v7852_v20  ;;  %v6001_v27 = vpop.f32.mrb[102].mxu1 }
 0x27d   : > { %v1954_v45 = vadd.f32 %v6001_v27, %v7852_v20  ;;  %v1945_v33 = vpop.f32.mrb[103].mxu1  ;;  %v2059_v36 = vmax.f32 %v1951_v23, 0.0 }
 0x27e   : > { %v1946_v62 = vadd.f32 %v1945_v33, %v7852_v20  ;;  %v2057_v60 = vmax.f32 %v1943_v41, 0.0 }
 0x27f   : > { %v2060_v34 = vmax.f32 %v1954_v45, 0.0 }
 0x280   : > { %v2058_v3 = vmax.f32 %v1946_v62, 0.0 }
 0x281   : > { %v2088_v0 = vpack.c.bf16 %v2060_v34, %v2059_v36 }
 0x282   : > { %v2087_v32 = vpack.c.bf16 %v2058_v3, %v2057_v60 }
 0x284   : > { %6032 = vmatprep.mubr.msk.bf16.mxu0 %vm1085_vm0, %v2087_v32 }
 0x285   : > { %6033 = vmatmul.mubr.msk.bf16.gmra.mrb[132].mxu0 %vm1085_vm0, %v2088_v0 }
 0x28a   : > { %v6004_v43 = vpop.f32.mrb[104].mxu1 }
 0x28b   : > { %v1967_v44 = vadd.f32 %v6004_v43, %v7852_v20  ;;  %v1958_v47 = vpop.f32.mrb[105].mxu1 }
 0x28c   : > { %v1959_v48 = vadd.f32 %v1958_v47, %v7852_v20  ;;  %v6005_v49 = vpop.f32.mrb[106].mxu1 }
 0x28d   : > { %v1970_v2 = vadd.f32 %v6005_v49, %v7852_v20  ;;  %v1961_v61 = vpop.f32.mrb[107].mxu1  ;;  %v2063_v22 = vmax.f32 %v1967_v44, 0.0  ;;  %v6247_v44 = vld [vmem:[%s9435_s4 + $0x38] sm:$0xff]  }
 0x28e   : > { %v1962_v7 = vadd.f32 %v1961_v61, %v7852_v20  ;;  %v2061_v28 = vmax.f32 %v1959_v48, 0.0  ;;  %6074 = vmatprep.subr.bf16.mxu1 %v6247_v44 }
 0x28f   : > { %v2064_v54 = vmax.f32 %v1970_v2, 0.0  ;;  %6075 = vmatpush3.bf16.msra.mxu1 %v6247_v44 }
 0x290   : > { %v2062_v18 = vmax.f32 %v1962_v7, 0.0 }
 0x291   : > { %v2090_v42 = vpack.c.bf16 %v2064_v54, %v2063_v22 }
 0x292   : > { %v2089_v25 = vpack.c.bf16 %v2062_v18, %v2061_v28 }
 0x294   : > { %6036 = vmatprep.mubr.msk.bf16.mxu0 %vm1085_vm0, %v2089_v25 }
 0x295   : > { %6037 = vmatmul.mubr.msk.bf16.gmra.mrb[136].mxu0 %vm1085_vm0, %v2090_v42 }
 0x29a   : > { %v6008_v57 = vpop.f32.mrb[108].mxu1 }
 0x29b   : > { %v1983_v26 = vadd.f32 %v6008_v57, %v7852_v20  ;;  %v1974_v8 = vpop.f32.mrb[109].mxu1 }
 0x29c   : > { %v1975_v38 = vadd.f32 %v1974_v8, %v7852_v20  ;;  %v6009_v4 = vpop.f32.mrb[110].mxu1 }
 0x29d   : > { %v1986_v50 = vadd.f32 %v6009_v4, %v7852_v20  ;;  %v1977_v5 = vpop.f32.mrb[111].mxu1  ;;  %v2067_v51 = vmax.f32 %v1983_v26, 0.0 }
 0x29e   : > { %v1978_v14 = vadd.f32 %v1977_v5, %v7852_v20  ;;  %v2065_v55 = vmax.f32 %v1975_v38, 0.0 }
 0x29f   : > { %v2068_v52 = vmax.f32 %v1986_v50, 0.0 }
 0x2a0   : > { %v2066_v37 = vmax.f32 %v1978_v14, 0.0 }
 0x2a1   : > { %v2092_v9 = vpack.c.bf16 %v2068_v52, %v2067_v51  ;;  %v6248_v51 = vld [vmem:[%s9436_s5] sm:$0xff]  }
 0x2a2   : > { %v2091_v10 = vpack.c.bf16 %v2066_v37, %v2065_v55  ;;  %6108 = vmatprep.subr.bf16.mxu0 %v6248_v51  ;;  %v7926_v52 = vld [vmem:[%s9438_s7 + $0x2] ss:$0 sm:$0xff] }
 0x2a3   : > { %6109 = vmatpush3.bf16.msra.mxu0 %v6248_v51 }
 0x2a4   : > { %6040 = vmatprep.mubr.msk.bf16.mxu0 %vm1085_vm0, %v2091_v10 }
 0x2a5   : > { %6041 = vmatmul.mubr.msk.bf16.gmra.mrb[140].mxu0 %vm1085_vm0, %v2092_v9 }
 0x2aa   : > { %v6012_v11 = vpop.f32.mrb[112].mxu1 }
 0x2ab   : > { %v1999_v15 = vadd.f32 %v6012_v11, %v7852_v20  ;;  %v1990_v58 = vpop.f32.mrb[113].mxu1 }
 0x2ac   : > { %v1991_v53 = vadd.f32 %v1990_v58, %v7852_v20  ;;  %v6013_v13 = vpop.f32.mrb[114].mxu1 }
 0x2ad   : > { %v2002_v12 = vadd.f32 %v6013_v13, %v7852_v20  ;;  %v1993_v59 = vpop.f32.mrb[115].mxu1  ;;  %v2071_v63 = vmax.f32 %v1999_v15, 0.0 }
 0x2ae   : > { %v1994_v16 = vadd.f32 %v1993_v59, %v7852_v20  ;;  %v2069_v56 = vmax.f32 %v1991_v53, 0.0 }
 0x2af   : > { %v2072_v39 = vmax.f32 %v2002_v12, 0.0 }
 0x2b0   : > { %v2070_v17 = vmax.f32 %v1994_v16, 0.0 }
 0x2b1   : > { %v2094_v19 = vpack.c.bf16 %v2072_v39, %v2071_v63 }
 0x2b2   : > { %v2093_v1 = vpack.c.bf16 %v2070_v17, %v2069_v56 }
 0x2b4   : > { %6044 = vmatprep.mubr.msk.bf16.mxu0 %vm1085_vm0, %v2093_v1 }
 0x2b5   : > { %6045 = vmatmul.mubr.msk.bf16.gmra.mrb[144].mxu0 %vm1085_vm0, %v2094_v19 }
 0x2ba   : > { %v6016_v24 = vpop.f32.mrb[116].mxu1 }
 0x2bb   : > { %v2015_v30 = vadd.f32 %v6016_v24, %v7852_v20  ;;  %v2006_v29 = vpop.f32.mrb[117].mxu1 }
 0x2bc   : > { %v2007_v35 = vadd.f32 %v2006_v29, %v7852_v20  ;;  %v6017_v31 = vpop.f32.mrb[118].mxu1 }
 0x2bd   : > { %v2018_v40 = vadd.f32 %v6017_v31, %v7852_v20  ;;  %v2009_v21 = vpop.f32.mrb[119].mxu1  ;;  %v2075_v23 = vmax.f32 %v2015_v30, 0.0 }
 0x2be   : > { %v2010_v46 = vadd.f32 %v2009_v21, %v7852_v20  ;;  %v2073_v41 = vmax.f32 %v2007_v35, 0.0 }
 0x2bf   : > { %v2076_v6 = vmax.f32 %v2018_v40, 0.0 }
 0x2c0   : > { %v2074_v27 = vmax.f32 %v2010_v46, 0.0 }
 0x2c1   : > { %v2096_v45 = vpack.c.bf16 %v2076_v6, %v2075_v23 }
 0x2c2   : > { %v2095_v33 = vpack.c.bf16 %v2074_v27, %v2073_v41 }
 0x2c4   : > { %6048 = vmatprep.mubr.msk.bf16.mxu0 %vm1085_vm0, %v2095_v33 }
 0x2c5   : > { %6049 = vmatmul.mubr.msk.bf16.gmra.mrb[148].mxu0 %vm1085_vm0, %v2096_v45 }
 0x2ca   : > { %v6020_v62 = vpop.f32.mrb[120].mxu1 }
 0x2cb   : > { %v2031_v36 = vadd.f32 %v6020_v62, %v7852_v20  ;;  %v2022_v34 = vpop.f32.mrb[121].mxu1 }
 0x2cc   : > { %v2023_v60 = vadd.f32 %v2022_v34, %v7852_v20  ;;  %v6021_v3 = vpop.f32.mrb[122].mxu1 }
 0x2cd   : > { %v2034_v0 = vadd.f32 %v6021_v3, %v7852_v20  ;;  %v2025_v32 = vpop.f32.mrb[123].mxu1  ;;  %v2079_v47 = vmax.f32 %v2031_v36, 0.0 }
 0x2ce   : > { %v2026_v43 = vadd.f32 %v2025_v32, %v7852_v20  ;;  %v2077_v49 = vmax.f32 %v2023_v60, 0.0 }
 0x2cf   : > { %v2080_v48 = vmax.f32 %v2034_v0, 0.0 }
 0x2d0   : > { %v2078_v2 = vmax.f32 %v2026_v43, 0.0 }
 0x2d1   : > { %v2098_v61 = vpack.c.bf16 %v2080_v48, %v2079_v47 }
 0x2d2   : > { %v2097_v7 = vpack.c.bf16 %v2078_v2, %v2077_v49 }
 0x2d4   : > { %6052 = vmatprep.mubr.msk.bf16.mxu0 %vm1085_vm0, %v2097_v7 }
 0x2d5   : > { %6053 = vmatmul.mubr.msk.bf16.gmra.mrb[152].mxu0 %vm1085_vm0, %v2098_v61 }
 0x2da   : > { %v6024_v22 = vpop.f32.mrb[124].mxu1 }
 0x2db   : > { %v2047_v54 = vadd.f32 %v6024_v22, %v7852_v20  ;;  %v2038_v28 = vpop.f32.mrb[125].mxu1 }
 0x2dc   : > { %v2039_v18 = vadd.f32 %v2038_v28, %v7852_v20  ;;  %v6025_v42 = vpop.f32.mrb[126].mxu1 }
 0x2dd   : > { %v2050_v25 = vadd.f32 %v6025_v42, %v7852_v20  ;;  %v2041_v57 = vpop.f32.mrb[127].mxu1  ;;  %v2083_v8 = vmax.f32 %v2047_v54, 0.0 }
 0x2de   : > { %v2042_v26 = vadd.f32 %v2041_v57, %v7852_v20  ;;  %v2081_v4 = vmax.f32 %v2039_v18, 0.0 }
 0x2df   : > { %v2084_v38 = vmax.f32 %v2050_v25, 0.0 }
 0x2e0   : > { %v2082_v50 = vmax.f32 %v2042_v26, 0.0 }
 0x2e1   : > { %v2100_v5 = vpack.c.bf16 %v2084_v38, %v2083_v8 }
 0x2e2   : > { %v2099_v14 = vpack.c.bf16 %v2082_v50, %v2081_v4 }
 0x2e4   : > { %6056 = vmatprep.mubr.msk.bf16.mxu0 %vm1085_vm0, %v2099_v14 }
 0x2e5   : > { %6057 = vmatmul.mubr.msk.bf16.gmra.mrb[156].mxu0 %vm1085_vm0, %v2100_v5 }
 0x348   : > { %v6030_v20 = vpop.f32.mrb[128].mxu0 }
 0x349   : > { %v2201_v55 = vadd.f32 %v6030_v20, %v7926_v52  ;;  %v2192_v37 = vpop.f32.mrb[129].mxu0 }
 0x34a   : > { %v2193_v9 = vadd.f32 %v2192_v37, %v7926_v52  ;;  %v6031_v10 = vpop.f32.mrb[130].mxu0 }
 0x34b   : > { %v2321_v11 = vmax.f32 %v2201_v55, 0.0  ;;  %v2204_v15 = vadd.f32 %v6031_v10, %v7926_v52  ;;  %v2195_v58 = vpop.f32.mrb[131].mxu0 }
 0x34c   : > { %v2319_v53 = vmax.f32 %v2193_v9, 0.0  ;;  %v2196_v13 = vadd.f32 %v2195_v58, %v7926_v52 }
 0x34d   : > { %5169 = vst [vmem:[%s7933_s19 + $0x10] sm:$0xff] %v2321_v11  ;;  %v2322_v12 = vmax.f32 %v2204_v15, 0.0 }
 0x34e   : > { %5167 = vst [vmem:[%s7933_s19] sm:$0xff] %v2319_v53  ;;  %v2320_v59 = vmax.f32 %v2196_v13, 0.0 }
 0x34f   : > { %v2352_v16 = vpack.c.bf16 %v2322_v12, %v2321_v11  ;;  %5170 = vst [vmem:[%s7933_s19 + $0x18] sm:$0xff] %v2322_v12 }
 0x350   : > { %v2351_v63 = vpack.c.bf16 %v2320_v59, %v2319_v53  ;;  %5168 = vst [vmem:[%s7933_s19 + $0x8] sm:$0xff] %v2320_v59 }
 0x352   : > { %6076 = vmatprep.mubr.bf16.mxu1 %v2351_v63 }
 0x353   : > { %6077 = vmatmul.mubr.bf16.vlgmr.msra.gmra.mrb[128].mxu1 %v2352_v16 }
 0x358   : > { %v6034_v39 = vpop.f32.mrb[132].mxu0 }
 0x359   : > { %v2217_v56 = vadd.f32 %v6034_v39, %v7926_v52  ;;  %v2208_v17 = vpop.f32.mrb[133].mxu0 }
 0x35a   : > { %v2209_v19 = vadd.f32 %v2208_v17, %v7926_v52  ;;  %v6035_v1 = vpop.f32.mrb[134].mxu0 }
 0x35b   : > { %v2325_v24 = vmax.f32 %v2217_v56, 0.0  ;;  %v2220_v30 = vadd.f32 %v6035_v1, %v7926_v52  ;;  %v2211_v29 = vpop.f32.mrb[135].mxu0 }
 0x35c   : > { %v2323_v35 = vmax.f32 %v2209_v19, 0.0  ;;  %v2212_v31 = vadd.f32 %v2211_v29, %v7926_v52 }
 0x35d   : > { %5173 = vst [vmem:[%s7933_s19 + $0x30] sm:$0xff] %v2325_v24  ;;  %v2326_v40 = vmax.f32 %v2220_v30, 0.0 }
 0x35e   : > { %5171 = vst [vmem:[%s7933_s19 + $0x20] sm:$0xff] %v2323_v35  ;;  %v2324_v21 = vmax.f32 %v2212_v31, 0.0 }
 0x35f   : > { %v2354_v46 = vpack.c.bf16 %v2326_v40, %v2325_v24  ;;  %5174 = vst [vmem:[%s7933_s19 + $0x38] sm:$0xff] %v2326_v40 }
 0x360   : > { %v2353_v23 = vpack.c.bf16 %v2324_v21, %v2323_v35  ;;  %5172 = vst [vmem:[%s7933_s19 + $0x28] sm:$0xff] %v2324_v21 }
 0x362   : > { %6080 = vmatprep.mubr.bf16.mxu1 %v2353_v23 }
 0x363   : > { %6081 = vmatmul.mubr.bf16.gmra.mrb[132].mxu1 %v2354_v46 }
 0x368   : > { %v6038_v6 = vpop.f32.mrb[136].mxu0 }
 0x369   : > { %v2233_v41 = vadd.f32 %v6038_v6, %v7926_v52  ;;  %v2224_v27 = vpop.f32.mrb[137].mxu0 }
 0x36a   : > { %v2225_v45 = vadd.f32 %v2224_v27, %v7926_v52  ;;  %v6039_v33 = vpop.f32.mrb[138].mxu0 }
 0x36b   : > { %v2329_v62 = vmax.f32 %v2233_v41, 0.0  ;;  %v2236_v36 = vadd.f32 %v6039_v33, %v7926_v52  ;;  %v2227_v34 = vpop.f32.mrb[139].mxu0 }
 0x36c   : > { %v2327_v60 = vmax.f32 %v2225_v45, 0.0  ;;  %v2228_v3 = vadd.f32 %v2227_v34, %v7926_v52 }
 0x36d   : > { %5177 = vst [vmem:[%s7933_s19 + $0x50] sm:$0xff] %v2329_v62  ;;  %v2330_v0 = vmax.f32 %v2236_v36, 0.0 }
 0x36e   : > { %5175 = vst [vmem:[%s7933_s19 + $0x40] sm:$0xff] %v2327_v60  ;;  %v2328_v32 = vmax.f32 %v2228_v3, 0.0 }
 0x36f   : > { %v2356_v43 = vpack.c.bf16 %v2330_v0, %v2329_v62  ;;  %5178 = vst [vmem:[%s7933_s19 + $0x58] sm:$0xff] %v2330_v0 }
 0x370   : > { %v2355_v44 = vpack.c.bf16 %v2328_v32, %v2327_v60  ;;  %5176 = vst [vmem:[%s7933_s19 + $0x48] sm:$0xff] %v2328_v32 }
 0x372   : > { %6084 = vmatprep.mubr.bf16.mxu1 %v2355_v44 }
 0x373   : > { %6085 = vmatmul.mubr.bf16.gmra.mrb[136].mxu1 %v2356_v43 }
 0x378   : > { %v6042_v47 = vpop.f32.mrb[140].mxu0 }
 0x379   : > { %v2249_v48 = vadd.f32 %v6042_v47, %v7926_v52  ;;  %v2240_v49 = vpop.f32.mrb[141].mxu0 }
 0x37a   : > { %v2241_v2 = vadd.f32 %v2240_v49, %v7926_v52  ;;  %v6043_v61 = vpop.f32.mrb[142].mxu0 }
 0x37b   : > { %v2333_v7 = vmax.f32 %v2249_v48, 0.0  ;;  %v2252_v22 = vadd.f32 %v6043_v61, %v7926_v52  ;;  %v2243_v54 = vpop.f32.mrb[143].mxu0 }
 0x37c   : > { %v2331_v28 = vmax.f32 %v2241_v2, 0.0  ;;  %v2244_v18 = vadd.f32 %v2243_v54, %v7926_v52  ;;  %v6249_v54 = vld [vmem:[%s9437_s6] ss:$28 sps:$4 sm:$0xff]  }
 0x37d   : > { %5181 = vst [vmem:[%s7933_s19 + $0x70] sm:$0xff] %v2333_v7  ;;  %v2334_v42 = vmax.f32 %v2252_v22, 0.0 }
 0x37e   : > { %5179 = vst [vmem:[%s7933_s19 + $0x60] sm:$0xff] %v2331_v28  ;;  %v2332_v25 = vmax.f32 %v2244_v18, 0.0  ;;  %v8010_v18 = vld [vmem:[%s9438_s7 + $0x3] ss:$0 sm:$0xff] }
 0x37f   : > { %v2358_v57 = vpack.c.bf16 %v2334_v42, %v2333_v7  ;;  %5182 = vst [vmem:[%s7933_s19 + $0x78] sm:$0xff] %v2334_v42  ;;  %v6252_v42 = vld [vmem:[%s9437_s6 + $0x38] ss:$28 sps:$4 sm:$0xff]  }
 0x380   : > { %v2357_v26 = vpack.c.bf16 %v2332_v25, %v2331_v28  ;;  %5180 = vst [vmem:[%s7933_s19 + $0x68] sm:$0xff] %v2332_v25  ;;  %v6251_v28 = vld [vmem:[%s9437_s6 + $0x4] ss:$28 sps:$4 sm:$0xff]  }
 0x381   : > { %3083 = vmatprep.subr.bf16.mxu1 %v6251_v28 }
 0x382   : > { %6088 = vmatprep.mubr.bf16.mxu1 %v2357_v26  ;;  %3084 = vmatpush1.bf16.msra.mxu1 %v6249_v54 }
 0x383   : > { %6089 = vmatmul.mubr.bf16.gmra.mrb[140].mxu1 %v2358_v57 }
 0x388   : > { %v6046_v8 = vpop.f32.mrb[144].mxu0 }
 0x389   : > { %v2265_v38 = vadd.f32 %v6046_v8, %v7926_v52  ;;  %v2256_v4 = vpop.f32.mrb[145].mxu0 }
 0x38a   : > { %v2257_v50 = vadd.f32 %v2256_v4, %v7926_v52  ;;  %v6047_v5 = vpop.f32.mrb[146].mxu0 }
 0x38b   : > { %v2337_v14 = vmax.f32 %v2265_v38, 0.0  ;;  %v2268_v51 = vadd.f32 %v6047_v5, %v7926_v52  ;;  %v2259_v20 = vpop.f32.mrb[147].mxu0 }
 0x38c   : > { %v2335_v55 = vmax.f32 %v2257_v50, 0.0  ;;  %v2260_v37 = vadd.f32 %v2259_v20, %v7926_v52 }
 0x38d   : > { %5185 = vst [vmem:[%s7933_s19 + $0x90] sm:$0xff] %v2337_v14  ;;  %v2338_v9 = vmax.f32 %v2268_v51, 0.0 }
 0x38e   : > { %5183 = vst [vmem:[%s7933_s19 + $0x80] sm:$0xff] %v2335_v55  ;;  %v2336_v10 = vmax.f32 %v2260_v37, 0.0 }
 0x38f   : > { %v2360_v11 = vpack.c.bf16 %v2338_v9, %v2337_v14  ;;  %5186 = vst [vmem:[%s7933_s19 + $0x98] sm:$0xff] %v2338_v9 }
 0x390   : > { %v2359_v15 = vpack.c.bf16 %v2336_v10, %v2335_v55  ;;  %5184 = vst [vmem:[%s7933_s19 + $0x88] sm:$0xff] %v2336_v10 }
 0x392   : > { %6092 = vmatprep.mubr.bf16.mxu1 %v2359_v15 }
 0x393   : > { %6093 = vmatmul.mubr.bf16.gmra.mrb[144].mxu1 %v2360_v11 }
 0x398   : > { %v6050_v58 = vpop.f32.mrb[148].mxu0 }
 0x399   : > { %v2281_v53 = vadd.f32 %v6050_v58, %v7926_v52  ;;  %v2272_v13 = vpop.f32.mrb[149].mxu0 }
 0x39a   : > { %v2273_v12 = vadd.f32 %v2272_v13, %v7926_v52  ;;  %v6051_v59 = vpop.f32.mrb[150].mxu0 }
 0x39b   : > { %v2341_v16 = vmax.f32 %v2281_v53, 0.0  ;;  %v2284_v63 = vadd.f32 %v6051_v59, %v7926_v52  ;;  %v2275_v39 = vpop.f32.mrb[151].mxu0 }
 0x39c   : > { %v2339_v56 = vmax.f32 %v2273_v12, 0.0  ;;  %v2276_v17 = vadd.f32 %v2275_v39, %v7926_v52 }
 0x39d   : > { %5189 = vst [vmem:[%s7933_s19 + $0xb0] sm:$0xff] %v2341_v16  ;;  %v2342_v19 = vmax.f32 %v2284_v63, 0.0 }
 0x39e   : > { %5187 = vst [vmem:[%s7933_s19 + $0xa0] sm:$0xff] %v2339_v56  ;;  %v2340_v1 = vmax.f32 %v2276_v17, 0.0 }
 0x39f   : > { %v2362_v24 = vpack.c.bf16 %v2342_v19, %v2341_v16  ;;  %5190 = vst [vmem:[%s7933_s19 + $0xb8] sm:$0xff] %v2342_v19 }
 0x3a0   : > { %v2361_v30 = vpack.c.bf16 %v2340_v1, %v2339_v56  ;;  %5188 = vst [vmem:[%s7933_s19 + $0xa8] sm:$0xff] %v2340_v1 }
 0x3a2   : > { %6096 = vmatprep.mubr.bf16.mxu1 %v2361_v30 }
 0x3a3   : > { %6097 = vmatmul.mubr.bf16.gmra.mrb[148].mxu1 %v2362_v24 }
 0x3a8   : > { %v6054_v29 = vpop.f32.mrb[152].mxu0 }
 0x3a9   : > { %v2297_v35 = vadd.f32 %v6054_v29, %v7926_v52  ;;  %v2288_v31 = vpop.f32.mrb[153].mxu0 }
 0x3aa   : > { %v2289_v40 = vadd.f32 %v2288_v31, %v7926_v52  ;;  %v6055_v21 = vpop.f32.mrb[154].mxu0 }
 0x3ab   : > { %v2345_v46 = vmax.f32 %v2297_v35, 0.0  ;;  %v2300_v23 = vadd.f32 %v6055_v21, %v7926_v52  ;;  %v2291_v6 = vpop.f32.mrb[155].mxu0 }
 0x3ac   : > { %v2343_v41 = vmax.f32 %v2289_v40, 0.0  ;;  %v2292_v27 = vadd.f32 %v2291_v6, %v7926_v52 }
 0x3ad   : > { %5193 = vst [vmem:[%s7933_s19 + $0xd0] sm:$0xff] %v2345_v46  ;;  %v2346_v45 = vmax.f32 %v2300_v23, 0.0 }
 0x3ae   : > { %5191 = vst [vmem:[%s7933_s19 + $0xc0] sm:$0xff] %v2343_v41  ;;  %v2344_v33 = vmax.f32 %v2292_v27, 0.0 }
 0x3af   : > { %v2364_v62 = vpack.c.bf16 %v2346_v45, %v2345_v46  ;;  %5194 = vst [vmem:[%s7933_s19 + $0xd8] sm:$0xff] %v2346_v45 }
 0x3b0   : > { %v2363_v36 = vpack.c.bf16 %v2344_v33, %v2343_v41  ;;  %5192 = vst [vmem:[%s7933_s19 + $0xc8] sm:$0xff] %v2344_v33 }
 0x3b2   : > { %6100 = vmatprep.mubr.bf16.mxu1 %v2363_v36 }
 0x3b3   : > { %6101 = vmatmul.mubr.bf16.gmra.mrb[152].mxu1 %v2364_v62 }
 0x3b8   : > { %v6058_v34 = vpop.f32.mrb[156].mxu0 }
 0x3b9   : > { %v2313_v60 = vadd.f32 %v6058_v34, %v7926_v52  ;;  %v2304_v3 = vpop.f32.mrb[157].mxu0 }
 0x3ba   : > { %v2305_v0 = vadd.f32 %v2304_v3, %v7926_v52  ;;  %v6059_v32 = vpop.f32.mrb[158].mxu0 }
 0x3bb   : > { %v2349_v43 = vmax.f32 %v2313_v60, 0.0  ;;  %v2316_v44 = vadd.f32 %v6059_v32, %v7926_v52  ;;  %v2307_v47 = vpop.f32.mrb[159].mxu0 }
 0x3bc   : > { %v2347_v48 = vmax.f32 %v2305_v0, 0.0  ;;  %v2308_v49 = vadd.f32 %v2307_v47, %v7926_v52  ;;  %v6254_v52 = vld [vmem:[%s9437_s6 + $0x3c] ss:$28 sps:$4 sm:$0xff]  }
 0x3bd   : > { %5197 = vst [vmem:[%s7933_s19 + $0xf0] sm:$0xff] %v2349_v43  ;;  %v2350_v2 = vmax.f32 %v2316_v44, 0.0  ;;  %3085 = vmatprep.subr.bf16.mxu1 %v6254_v52 }
 0x3be   : > { %5195 = vst [vmem:[%s7933_s19 + $0xe0] sm:$0xff] %v2347_v48  ;;  %v2348_v61 = vmax.f32 %v2308_v49, 0.0  ;;  %3086 = vmatpush1.bf16.msra.mxu1 %v6252_v42 }
 0x3bf   : > { %v2366_v7 = vpack.c.bf16 %v2350_v2, %v2349_v43  ;;  %5198 = vst [vmem:[%s7933_s19 + $0xf8] sm:$0xff] %v2350_v2 }
 0x3c0   : > { %v2365_v22 = vpack.c.bf16 %v2348_v61, %v2347_v48  ;;  %5196 = vst [vmem:[%s7933_s19 + $0xe8] sm:$0xff] %v2348_v61 }
 0x3c2   : > { %6104 = vmatprep.mubr.bf16.mxu1 %v2365_v22 }
 0x3c3   : > { %6105 = vmatmul.mubr.bf16.gmra.mrb[156].mxu1 %v2366_v7 }
 0x426   : > { %v6078_v25 = vpop.f32.mrb[128].mxu1 }
 0x427   : > { %v2475_v57 = vadd.f32 %v6078_v25, %v8010_v18  ;;  %v2466_v26 = vpop.f32.mrb[129].mxu1 }
 0x428   : > { %v2467_v8 = vadd.f32 %v2466_v26, %v8010_v18  ;;  %v6079_v38 = vpop.f32.mrb[130].mxu1 }
 0x429   : > { %v2478_v4 = vadd.f32 %v6079_v38, %v8010_v18  ;;  %v2469_v50 = vpop.f32.mrb[131].mxu1  ;;  %v2595_v14 = vmax.f32 %v2475_v57, 0.0 }
 0x42a   : > { %v2470_v5 = vadd.f32 %v2469_v50, %v8010_v18  ;;  %v2593_v20 = vmax.f32 %v2467_v8, 0.0 }
 0x42b   : > { %v2596_v51 = vmax.f32 %v2478_v4, 0.0 }
 0x42c   : > { %v2594_v55 = vmax.f32 %v2470_v5, 0.0 }
 0x42d   : > { %v2626_v37 = vpack.c.bf16 %v2596_v51, %v2595_v14 }
 0x42e   : > { %v2625_v9 = vpack.c.bf16 %v2594_v55, %v2593_v20 }
 0x430   : > { %6110 = vmatprep.mubr.msk.bf16.mxu0 %vm1085_vm0, %v2625_v9 }
 0x431   : > { %6111 = vmatmul.mubr.msk.bf16.vlgmr.msra.gmra.mrb[160].mxu0 %vm1085_vm0, %v2626_v37 }
 0x436   : > { %v6082_v10 = vpop.f32.mrb[132].mxu1 }
 0x437   : > { %v2491_v11 = vadd.f32 %v6082_v10, %v8010_v18  ;;  %v2482_v15 = vpop.f32.mrb[133].mxu1 }
 0x438   : > { %v2483_v58 = vadd.f32 %v2482_v15, %v8010_v18  ;;  %v6083_v53 = vpop.f32.mrb[134].mxu1 }
 0x439   : > { %v2494_v13 = vadd.f32 %v6083_v53, %v8010_v18  ;;  %v2485_v12 = vpop.f32.mrb[135].mxu1  ;;  %v2599_v16 = vmax.f32 %v2491_v11, 0.0 }
 0x43a   : > { %v2486_v59 = vadd.f32 %v2485_v12, %v8010_v18  ;;  %v2597_v39 = vmax.f32 %v2483_v58, 0.0 }
 0x43b   : > { %v2600_v63 = vmax.f32 %v2494_v13, 0.0 }
 0x43c   : > { %v2598_v56 = vmax.f32 %v2486_v59, 0.0  ;;  %v6257_v59 = vld [vmem:[%s9437_s6 + $0xc] ss:$28 sps:$4 sm:$0xff]  }
 0x43d   : > { %v2628_v17 = vpack.c.bf16 %v2600_v63, %v2599_v16  ;;  %v6255_v63 = vld [vmem:[%s9437_s6 + $0x8] ss:$28 sps:$4 sm:$0xff]   ;;  %3276 = vmatprep.subr.bf16.mxu0 %v6257_v59 }
 0x43e   : > { %v2627_v19 = vpack.c.bf16 %v2598_v56, %v2597_v39  ;;  %3277 = vmatpush1.bf16.msra.mxu0 %v6255_v63 }
 0x440   : > { %6114 = vmatprep.mubr.msk.bf16.mxu0 %vm1085_vm0, %v2627_v19 }
 0x441   : > { %6115 = vmatmul.mubr.msk.bf16.gmra.mrb[164].mxu0 %vm1085_vm0, %v2628_v17 }
 0x446   : > { %v6086_v1 = vpop.f32.mrb[136].mxu1 }
 0x447   : > { %v2507_v24 = vadd.f32 %v6086_v1, %v8010_v18  ;;  %v2498_v30 = vpop.f32.mrb[137].mxu1 }
 0x448   : > { %v2499_v29 = vadd.f32 %v2498_v30, %v8010_v18  ;;  %v6087_v35 = vpop.f32.mrb[138].mxu1  ;;  %v6260_v30 = vld [vmem:[%s9437_s6 + $0x44] ss:$28 sps:$4 sm:$0xff]  }
 0x449   : > { %v2510_v31 = vadd.f32 %v6087_v35, %v8010_v18  ;;  %v2501_v40 = vpop.f32.mrb[139].mxu1  ;;  %v2603_v46 = vmax.f32 %v2507_v24, 0.0  ;;  %v6258_v35 = vld [vmem:[%s9437_s6 + $0x40] ss:$28 sps:$4 sm:$0xff]   ;;  %3278 = vmatprep.subr.bf16.mxu0 %v6260_v30 }
 0x44a   : > { %v2502_v21 = vadd.f32 %v2501_v40, %v8010_v18  ;;  %v2601_v6 = vmax.f32 %v2499_v29, 0.0  ;;  %3279 = vmatpush1.bf16.msra.mxu0 %v6258_v35 }
 0x44b   : > { %v2604_v23 = vmax.f32 %v2510_v31, 0.0 }
 0x44c   : > { %v2602_v41 = vmax.f32 %v2502_v21, 0.0 }
 0x44d   : > { %v2630_v27 = vpack.c.bf16 %v2604_v23, %v2603_v46 }
 0x44e   : > { %v2629_v45 = vpack.c.bf16 %v2602_v41, %v2601_v6  ;;  %v7173_v6 = vmov 0  }
 0x44f   : > { %3115 = vmatprep.mubr.bf16.mxu1 %v7173_v6 }
 0x450   : > { %6118 = vmatprep.mubr.msk.bf16.mxu0 %vm1085_vm0, %v2629_v45 }
 0x451   : > { %6119 = vmatmul.mubr.msk.bf16.gmra.mrb[168].mxu0 %vm1085_vm0, %v2630_v27  ;;  %v6263_v27 = vld [vmem:[%s9437_s6 + $0x14] ss:$28 sps:$4 sm:$0xff]  }
 0x452   : > { %3469 = vmatprep.subr.bf16.mxu1 %v6263_v27 }
 0x456   : > { %v6090_v33 = vpop.f32.mrb[140].mxu1 }
 0x457   : > { %v2523_v62 = vadd.f32 %v6090_v33, %v8010_v18  ;;  %v2514_v36 = vpop.f32.mrb[141].mxu1 }
 0x458   : > { %v2515_v34 = vadd.f32 %v2514_v36, %v8010_v18  ;;  %v6091_v60 = vpop.f32.mrb[142].mxu1 }
 0x459   : > { %v2526_v3 = vadd.f32 %v6091_v60, %v8010_v18  ;;  %v2517_v0 = vpop.f32.mrb[143].mxu1  ;;  %v2607_v43 = vmax.f32 %v2523_v62, 0.0 }
 0x45a   : > { %v2518_v32 = vadd.f32 %v2517_v0, %v8010_v18  ;;  %v2605_v47 = vmax.f32 %v2515_v34, 0.0 }
 0x45b   : > { %v2608_v44 = vmax.f32 %v2526_v3, 0.0 }
 0x45c   : > { %v2606_v48 = vmax.f32 %v2518_v32, 0.0 }
 0x45d   : > { %v2632_v49 = vpack.c.bf16 %v2608_v44, %v2607_v43 }
 0x45e   : > { %v2631_v2 = vpack.c.bf16 %v2606_v48, %v2605_v47 }
 0x460   : > { %6122 = vmatprep.mubr.msk.bf16.mxu0 %vm1085_vm0, %v2631_v2  ;;  %v6267_v2 = vld [vmem:[%s9437_s6 + $0x18] ss:$28 sps:$4 sm:$0xff]  }
 0x461   : > { %6123 = vmatmul.mubr.msk.bf16.gmra.mrb[172].mxu0 %vm1085_vm0, %v2632_v49  ;;  %6142 = vmatprep.subr.bf16.mxu0 %v6267_v2 }
 0x466   : > { %v6094_v61 = vpop.f32.mrb[144].mxu1 }
 0x467   : > { %v2539_v7 = vadd.f32 %v6094_v61, %v8010_v18  ;;  %v2530_v22 = vpop.f32.mrb[145].mxu1 }
 0x468   : > { %v2531_v54 = vadd.f32 %v2530_v22, %v8010_v18  ;;  %v6095_v28 = vpop.f32.mrb[146].mxu1 }
 0x469   : > { %v2542_v52 = vadd.f32 %v6095_v28, %v8010_v18  ;;  %v2533_v42 = vpop.f32.mrb[147].mxu1  ;;  %v2611_v57 = vmax.f32 %v2539_v7, 0.0 }
 0x46a   : > { %v2534_v25 = vadd.f32 %v2533_v42, %v8010_v18  ;;  %v2609_v8 = vmax.f32 %v2531_v54, 0.0 }
 0x46b   : > { %v2612_v26 = vmax.f32 %v2542_v52, 0.0 }
 0x46c   : > { %v2610_v38 = vmax.f32 %v2534_v25, 0.0 }
 0x46d   : > { %v2634_v4 = vpack.c.bf16 %v2612_v26, %v2611_v57 }
 0x46e   : > { %v2633_v50 = vpack.c.bf16 %v2610_v38, %v2609_v8 }
 0x470   : > { %6126 = vmatprep.mubr.msk.bf16.mxu0 %vm1085_vm0, %v2633_v50  ;;  %v6261_v50 = vld [vmem:[%s9437_s6 + $0x10] ss:$28 sps:$4 sm:$0xff]  }
 0x471   : > { %6127 = vmatmul.mubr.msk.bf16.gmra.mrb[176].mxu0 %vm1085_vm0, %v2634_v4 }
 0x476   : > { %v6098_v5 = vpop.f32.mrb[148].mxu1 }
 0x477   : > { %v2555_v14 = vadd.f32 %v6098_v5, %v8010_v18  ;;  %v2546_v51 = vpop.f32.mrb[149].mxu1 }
 0x478   : > { %v2547_v20 = vadd.f32 %v2546_v51, %v8010_v18  ;;  %v6099_v55 = vpop.f32.mrb[150].mxu1  ;;  %v6268_v51 = vld [vmem:[%s9437_s6 + $0x50] ss:$28 sps:$4 sm:$0xff]  }
 0x479   : > { %v2558_v37 = vadd.f32 %v6099_v55, %v8010_v18  ;;  %v2549_v9 = vpop.f32.mrb[151].mxu1  ;;  %v2615_v11 = vmax.f32 %v2555_v14, 0.0  ;;  %v6266_v14 = vld [vmem:[%s9437_s6 + $0x4c] ss:$28 sps:$4 sm:$0xff]  }
 0x47a   : > { %v2550_v10 = vadd.f32 %v2549_v9, %v8010_v18  ;;  %v2613_v58 = vmax.f32 %v2547_v20, 0.0  ;;  %v6264_v20 = vld [vmem:[%s9437_s6 + $0x48] ss:$28 sps:$4 sm:$0xff]  }
 0x47b   : > { %v2616_v15 = vmax.f32 %v2558_v37, 0.0 }
 0x47c   : > { %v2614_v53 = vmax.f32 %v2550_v10, 0.0 }
 0x47d   : > { %v2636_v13 = vpack.c.bf16 %v2616_v15, %v2615_v11 }
 0x47e   : > { %v2635_v12 = vpack.c.bf16 %v2614_v53, %v2613_v58 }
 0x480   : > { %6130 = vmatprep.mubr.msk.bf16.mxu0 %vm1085_vm0, %v2635_v12 }
 0x481   : > { %6131 = vmatmul.mubr.msk.bf16.gmra.mrb[180].mxu0 %vm1085_vm0, %v2636_v13 }
 0x486   : > { %v6102_v16 = vpop.f32.mrb[152].mxu1 }
 0x487   : > { %v2571_v39 = vadd.f32 %v6102_v16, %v8010_v18  ;;  %v2562_v56 = vpop.f32.mrb[153].mxu1 }
 0x488   : > { %v2563_v17 = vadd.f32 %v2562_v56, %v8010_v18  ;;  %v6103_v19 = vpop.f32.mrb[154].mxu1 }
 0x489   : > { %v2574_v1 = vadd.f32 %v6103_v19, %v8010_v18  ;;  %v2565_v24 = vpop.f32.mrb[155].mxu1  ;;  %v2619_v31 = vmax.f32 %v2571_v39, 0.0 }
 0x48a   : > { %v2566_v29 = vadd.f32 %v2565_v24, %v8010_v18  ;;  %v2617_v21 = vmax.f32 %v2563_v17, 0.0 }
 0x48b   : > { %v2620_v40 = vmax.f32 %v2574_v1, 0.0 }
 0x48c   : > { %v2618_v46 = vmax.f32 %v2566_v29, 0.0 }
 0x48d   : > { %v2638_v23 = vpack.c.bf16 %v2620_v40, %v2619_v31 }
 0x48e   : > { %v2637_v41 = vpack.c.bf16 %v2618_v46, %v2617_v21 }
 0x490   : > { %6134 = vmatprep.mubr.msk.bf16.mxu0 %vm1085_vm0, %v2637_v41 }
 0x491   : > { %6135 = vmatmul.mubr.msk.bf16.gmra.mrb[184].mxu0 %vm1085_vm0, %v2638_v23 }
 0x496   : > { %v6106_v45 = vpop.f32.mrb[156].mxu1 }
 0x497   : > { %v2587_v33 = vadd.f32 %v6106_v45, %v8010_v18  ;;  %v2578_v62 = vpop.f32.mrb[157].mxu1 }
 0x498   : > { %v2579_v36 = vadd.f32 %v2578_v62, %v8010_v18  ;;  %v6107_v34 = vpop.f32.mrb[158].mxu1 }
 0x499   : > { %v2590_v60 = vadd.f32 %v6107_v34, %v8010_v18  ;;  %v2581_v3 = vpop.f32.mrb[159].mxu1  ;;  %v2623_v32 = vmax.f32 %v2587_v33, 0.0 }
 0x49a   : > { %v2582_v0 = vadd.f32 %v2581_v3, %v8010_v18  ;;  %v2621_v44 = vmax.f32 %v2579_v36, 0.0  ;;  %v8086_v18 = vld [vmem:[%s9438_s7 + $0x4] ss:$0 sm:$0xff] }
 0x49b   : > { %v2624_v43 = vmax.f32 %v2590_v60, 0.0 }
 0x49c   : > { %v2622_v47 = vmax.f32 %v2582_v0, 0.0 }
 0x49d   : > { %v2640_v48 = vpack.c.bf16 %v2624_v43, %v2623_v32 }
 0x49e   : > { %v2639_v49 = vpack.c.bf16 %v2622_v47, %v2621_v44 }
 0x4a0   : > { %6138 = vmatprep.mubr.msk.bf16.mxu0 %vm1085_vm0, %v2639_v49 }
 0x4a1   : > { %6139 = vmatmul.mubr.msk.bf16.gmra.mrb[188].mxu0 %vm1085_vm0, %v2640_v48 }
 0x4a2   : > { %3308 = vmatprep.mubr.bf16.mxu0 %v7173_v6 }
 0x504   : > { %v6112_v61 = vpop.f32.mrb[160].mxu0 }
 0x505   : > { %v2741_v7 = vadd.f32 %v6112_v61, %v8086_v18  ;;  %v2732_v22 = vpop.f32.mrb[161].mxu0 }
 0x506   : > { %v2733_v54 = vadd.f32 %v2732_v22, %v8086_v18  ;;  %v6113_v28 = vpop.f32.mrb[162].mxu0 }
 0x507   : > { %v2744_v52 = vadd.f32 %v6113_v28, %v8086_v18  ;;  %v2735_v42 = vpop.f32.mrb[163].mxu0  ;;  %v2861_v57 = vmax.f32 %v2741_v7, 0.0 }
 0x508   : > { %v2736_v25 = vadd.f32 %v2735_v42, %v8086_v18  ;;  %v2859_v8 = vmax.f32 %v2733_v54, 0.0 }
 0x509   : > { %v2862_v26 = vmax.f32 %v2744_v52, 0.0 }
 0x50a   : > { %v2860_v38 = vmax.f32 %v2736_v25, 0.0 }
 0x50b   : > { %v8092_v4 = vpack.c.bf16 %v2862_v26, %v2861_v57 }
 0x50c   : > { %v8097_v5 = vpack.c.bf16 %v2860_v38, %v2859_v8 }
 0x50e   : > { %5443 = vmatmul.mubr.msk.bf16.vlgmr.msra.gmra.mrb[160].mxu1 %vm1843_vm1, %v8097_v5  ;;  %5459 = vmatmul.mubr.msk.bf16.vlgmr.msra.gmra.mrb[192].mxu0 %vm1843_vm1, %v8097_v5 }
 0x50f   : > { %3470 = vmatpush1.bf16.msra.mxu1 %v6261_v50  ;;  %3125 = vmatprep.mubr.bf16.mxu1 %v7173_v6 }
 0x510   : > { %3318 = vmatprep.mubr.bf16.mxu0 %v7173_v6  ;;  %3471 = vmatprep.subr.bf16.mxu1 %v6266_v14 }
 0x511   : > { %6143 = vmatpush3.bf16.msra.mxu0 %v6267_v2 }
 0x512   : > { %6144 = vmatprep.subr.bf16.mxu0 %v6268_v51 }
 0x513   : > { %3472 = vmatpush1.bf16.msra.mxu1 %v6264_v20 }
 0x514   : > { %v6116_v55 = vpop.f32.mrb[164].mxu0 }
 0x515   : > { %v2757_v37 = vadd.f32 %v6116_v55, %v8086_v18  ;;  %v2748_v9 = vpop.f32.mrb[165].mxu0  ;;  %6145 = vmatpush3.bf16.msra.mxu0 %v6268_v51 }
 0x516   : > { %v2749_v10 = vadd.f32 %v2748_v9, %v8086_v18  ;;  %v6117_v11 = vpop.f32.mrb[166].mxu0  ;;  %5444 = vmatmul.mubr.msk.bf16.gmra.mrb[164].mxu1 %vm1843_vm1, %v8092_v4  ;;  %5460 = vmatmul.mubr.msk.bf16.gmra.mrb[196].mxu0 %vm1843_vm1, %v8092_v4 }
 0x517   : > { %v2760_v15 = vadd.f32 %v6117_v11, %v8086_v18  ;;  %v2751_v58 = vpop.f32.mrb[167].mxu0  ;;  %3135 = vmatprep.mubr.bf16.mxu1 %v7173_v6  ;;  %3328 = vmatprep.mubr.bf16.mxu0 %v7173_v6  ;;  %v2865_v13 = vmax.f32 %v2757_v37, 0.0 }
 0x518   : > { %v2752_v53 = vadd.f32 %v2751_v58, %v8086_v18  ;;  %v2863_v59 = vmax.f32 %v2749_v10, 0.0 }
 0x519   : > { %v2866_v12 = vmax.f32 %v2760_v15, 0.0 }
 0x51a   : > { %v2864_v16 = vmax.f32 %v2752_v53, 0.0 }
 0x51b   : > { %v8124_v63 = vpack.c.bf16 %v2866_v12, %v2865_v13 }
 0x51c   : > { %v8126_v39 = vpack.c.bf16 %v2864_v16, %v2863_v59 }
 0x51e   : > { %5445 = vmatmul.mubr.msk.bf16.gmra.mrb[168].mxu1 %vm1843_vm1, %v8126_v39  ;;  %5461 = vmatmul.mubr.msk.bf16.gmra.mrb[200].mxu0 %vm1843_vm1, %v8126_v39 }
 0x51f   : > { %3145 = vmatprep.mubr.bf16.mxu1 %v7173_v6  ;;  %3338 = vmatprep.mubr.bf16.mxu0 %v7173_v6 }
 0x524   : > { %v6120_v56 = vpop.f32.mrb[168].mxu0 }
 0x525   : > { %v2773_v17 = vadd.f32 %v6120_v56, %v8086_v18  ;;  %v2764_v19 = vpop.f32.mrb[169].mxu0 }
 0x526   : > { %v2765_v1 = vadd.f32 %v2764_v19, %v8086_v18  ;;  %v6121_v24 = vpop.f32.mrb[170].mxu0  ;;  %5446 = vmatmul.mubr.msk.bf16.gmra.mrb[172].mxu1 %vm1843_vm1, %v8124_v63  ;;  %5462 = vmatmul.mubr.msk.bf16.gmra.mrb[204].mxu0 %vm1843_vm1, %v8124_v63 }
 0x527   : > { %v2776_v30 = vadd.f32 %v6121_v24, %v8086_v18  ;;  %v2767_v29 = vpop.f32.mrb[171].mxu0  ;;  %3155 = vmatprep.mubr.bf16.mxu1 %v7173_v6  ;;  %3348 = vmatprep.mubr.bf16.mxu0 %v7173_v6  ;;  %v2869_v31 = vmax.f32 %v2773_v17, 0.0 }
 0x528   : > { %v2768_v35 = vadd.f32 %v2767_v29, %v8086_v18  ;;  %v2867_v21 = vmax.f32 %v2765_v1, 0.0 }
 0x529   : > { %v2870_v40 = vmax.f32 %v2776_v30, 0.0 }
 0x52a   : > { %v2868_v46 = vmax.f32 %v2768_v35, 0.0 }
 0x52b   : > { %v8144_v23 = vpack.c.bf16 %v2870_v40, %v2869_v31 }
 0x52c   : > { %v8146_v41 = vpack.c.bf16 %v2868_v46, %v2867_v21 }
 0x52e   : > { %5447 = vmatmul.mubr.msk.bf16.gmra.mrb[176].mxu1 %vm1843_vm1, %v8146_v41  ;;  %5463 = vmatmul.mubr.msk.bf16.gmra.mrb[208].mxu0 %vm1843_vm1, %v8146_v41 }
 0x52f   : > { %3165 = vmatprep.mubr.bf16.mxu1 %v7173_v6  ;;  %3358 = vmatprep.mubr.bf16.mxu0 %v7173_v6 }
 0x534   : > { %v6124_v27 = vpop.f32.mrb[172].mxu0 }
 0x535   : > { %v2789_v45 = vadd.f32 %v6124_v27, %v8086_v18  ;;  %v2780_v33 = vpop.f32.mrb[173].mxu0 }
 0x536   : > { %v2781_v62 = vadd.f32 %v2780_v33, %v8086_v18  ;;  %v6125_v36 = vpop.f32.mrb[174].mxu0  ;;  %5448 = vmatmul.mubr.msk.bf16.gmra.mrb[180].mxu1 %vm1843_vm1, %v8144_v23  ;;  %5464 = vmatmul.mubr.msk.bf16.gmra.mrb[212].mxu0 %vm1843_vm1, %v8144_v23 }
 0x537   : > { %v2792_v34 = vadd.f32 %v6125_v36, %v8086_v18  ;;  %v2783_v60 = vpop.f32.mrb[175].mxu0  ;;  %3175 = vmatprep.mubr.bf16.mxu1 %v7173_v6  ;;  %3368 = vmatprep.mubr.bf16.mxu0 %v7173_v6  ;;  %v2873_v0 = vmax.f32 %v2789_v45, 0.0 }
 0x538   : > { %v2784_v3 = vadd.f32 %v2783_v60, %v8086_v18  ;;  %v2871_v43 = vmax.f32 %v2781_v62, 0.0 }
 0x539   : > { %v2874_v32 = vmax.f32 %v2792_v34, 0.0 }
 0x53a   : > { %v2872_v44 = vmax.f32 %v2784_v3, 0.0 }
 0x53b   : > { %v8164_v47 = vpack.c.bf16 %v2874_v32, %v2873_v0 }
 0x53c   : > { %v8166_v48 = vpack.c.bf16 %v2872_v44, %v2871_v43 }
 0x53e   : > { %5449 = vmatmul.mubr.msk.bf16.gmra.mrb[184].mxu1 %vm1843_vm1, %v8166_v48  ;;  %5465 = vmatmul.mubr.msk.bf16.gmra.mrb[216].mxu0 %vm1843_vm1, %v8166_v48 }
 0x53f   : > { %3185 = vmatprep.mubr.bf16.mxu1 %v7173_v6  ;;  %3378 = vmatprep.mubr.bf16.mxu0 %v7173_v6 }
 0x544   : > { %v6128_v49 = vpop.f32.mrb[176].mxu0 }
 0x545   : > { %v2805_v2 = vadd.f32 %v6128_v49, %v8086_v18  ;;  %v2796_v61 = vpop.f32.mrb[177].mxu0 }
 0x546   : > { %v2797_v7 = vadd.f32 %v2796_v61, %v8086_v18  ;;  %v6129_v22 = vpop.f32.mrb[178].mxu0  ;;  %5450 = vmatmul.mubr.msk.bf16.gmra.mrb[188].mxu1 %vm1843_vm1, %v8164_v47  ;;  %5466 = vmatmul.mubr.msk.bf16.gmra.mrb[220].mxu0 %vm1843_vm1, %v8164_v47 }
 0x547   : > { %v2808_v54 = vadd.f32 %v6129_v22, %v8086_v18  ;;  %v2799_v28 = vpop.f32.mrb[179].mxu0  ;;  %3195 = vmatprep.mubr.bf16.mxu1 %v7173_v6  ;;  %3388 = vmatprep.mubr.bf16.mxu0 %v7173_v6  ;;  %v2877_v42 = vmax.f32 %v2805_v2, 0.0 }
 0x548   : > { %v2800_v52 = vadd.f32 %v2799_v28, %v8086_v18  ;;  %v2875_v57 = vmax.f32 %v2797_v7, 0.0 }
 0x549   : > { %v2878_v25 = vmax.f32 %v2808_v54, 0.0 }
 0x54a   : > { %v2876_v26 = vmax.f32 %v2800_v52, 0.0 }
 0x54b   : > { %v8184_v8 = vpack.c.bf16 %v2878_v25, %v2877_v42 }
 0x54c   : > { %v8186_v38 = vpack.c.bf16 %v2876_v26, %v2875_v57 }
 0x54e   : > { %5451 = vmatmul.mubr.msk.bf16.gmra.mrb[192].mxu1 %vm1843_vm1, %v8186_v38  ;;  %5467 = vmatmul.mubr.msk.bf16.gmra.mrb[224].mxu0 %vm1843_vm1, %v8186_v38 }
 0x54f   : > { %3205 = vmatprep.mubr.bf16.mxu1 %v7173_v6  ;;  %3398 = vmatprep.mubr.bf16.mxu0 %v7173_v6 }
 0x554   : > { %v6132_v50 = vpop.f32.mrb[180].mxu0 }
 0x555   : > { %v2821_v14 = vadd.f32 %v6132_v50, %v8086_v18  ;;  %v2812_v51 = vpop.f32.mrb[181].mxu0 }
 0x556   : > { %v2813_v20 = vadd.f32 %v2812_v51, %v8086_v18  ;;  %v6133_v55 = vpop.f32.mrb[182].mxu0  ;;  %5452 = vmatmul.mubr.msk.bf16.gmra.mrb[196].mxu1 %vm1843_vm1, %v8184_v8  ;;  %5468 = vmatmul.mubr.msk.bf16.gmra.mrb[228].mxu0 %vm1843_vm1, %v8184_v8 }
 0x557   : > { %v2824_v37 = vadd.f32 %v6133_v55, %v8086_v18  ;;  %v2815_v9 = vpop.f32.mrb[183].mxu0  ;;  %3215 = vmatprep.mubr.bf16.mxu1 %v7173_v6  ;;  %3408 = vmatprep.mubr.bf16.mxu0 %v7173_v6  ;;  %v2881_v11 = vmax.f32 %v2821_v14, 0.0 }
 0x558   : > { %v2816_v10 = vadd.f32 %v2815_v9, %v8086_v18  ;;  %v2879_v58 = vmax.f32 %v2813_v20, 0.0 }
 0x559   : > { %v2882_v15 = vmax.f32 %v2824_v37, 0.0 }
 0x55a   : > { %v2880_v53 = vmax.f32 %v2816_v10, 0.0 }
 0x55b   : > { %v8204_v13 = vpack.c.bf16 %v2882_v15, %v2881_v11 }
 0x55c   : > { %v8206_v12 = vpack.c.bf16 %v2880_v53, %v2879_v58 }
 0x55e   : > { %5453 = vmatmul.mubr.msk.bf16.gmra.mrb[200].mxu1 %vm1843_vm1, %v8206_v12  ;;  %5469 = vmatmul.mubr.msk.bf16.gmra.mrb[232].mxu0 %vm1843_vm1, %v8206_v12 }
 0x55f   : > { %3225 = vmatprep.mubr.bf16.mxu1 %v7173_v6  ;;  %3418 = vmatprep.mubr.bf16.mxu0 %v7173_v6 }
 0x564   : > { %v6136_v59 = vpop.f32.mrb[184].mxu0 }
 0x565   : > { %v2837_v16 = vadd.f32 %v6136_v59, %v8086_v18  ;;  %v2828_v56 = vpop.f32.mrb[185].mxu0 }
 0x566   : > { %v2829_v17 = vadd.f32 %v2828_v56, %v8086_v18  ;;  %v6137_v19 = vpop.f32.mrb[186].mxu0  ;;  %5454 = vmatmul.mubr.msk.bf16.gmra.mrb[204].mxu1 %vm1843_vm1, %v8204_v13  ;;  %5470 = vmatmul.mubr.msk.bf16.gmra.mrb[236].mxu0 %vm1843_vm1, %v8204_v13 }
 0x567   : > { %v2840_v1 = vadd.f32 %v6137_v19, %v8086_v18  ;;  %v2831_v24 = vpop.f32.mrb[187].mxu0  ;;  %3235 = vmatprep.mubr.bf16.mxu1 %v7173_v6  ;;  %3428 = vmatprep.mubr.bf16.mxu0 %v7173_v6  ;;  %v2885_v29 = vmax.f32 %v2837_v16, 0.0 }
 0x568   : > { %v2832_v30 = vadd.f32 %v2831_v24, %v8086_v18  ;;  %v2883_v31 = vmax.f32 %v2829_v17, 0.0 }
 0x569   : > { %v2886_v35 = vmax.f32 %v2840_v1, 0.0 }
 0x56a   : > { %v2884_v40 = vmax.f32 %v2832_v30, 0.0 }
 0x56b   : > { %v8224_v21 = vpack.c.bf16 %v2886_v35, %v2885_v29 }
 0x56c   : > { %v8226_v46 = vpack.c.bf16 %v2884_v40, %v2883_v31 }
 0x56e   : > { %5455 = vmatmul.mubr.msk.bf16.gmra.mrb[208].mxu1 %vm1843_vm1, %v8226_v46  ;;  %5471 = vmatmul.mubr.msk.bf16.gmra.mrb[240].mxu0 %vm1843_vm1, %v8226_v46 }
 0x56f   : > { %3245 = vmatprep.mubr.bf16.mxu1 %v7173_v6  ;;  %3438 = vmatprep.mubr.bf16.mxu0 %v7173_v6 }
 0x574   : > { %v6140_v27 = vpop.f32.mrb[188].mxu0 }
 0x575   : > { %v2853_v45 = vadd.f32 %v6140_v27, %v8086_v18  ;;  %v2844_v33 = vpop.f32.mrb[189].mxu0 }
 0x576   : > { %v2845_v62 = vadd.f32 %v2844_v33, %v8086_v18  ;;  %v6141_v36 = vpop.f32.mrb[190].mxu0  ;;  %5456 = vmatmul.mubr.msk.bf16.gmra.mrb[212].mxu1 %vm1843_vm1, %v8224_v21  ;;  %5472 = vmatmul.mubr.msk.bf16.gmra.mrb[244].mxu0 %vm1843_vm1, %v8224_v21 }
 0x577   : > { %v2856_v34 = vadd.f32 %v6141_v36, %v8086_v18  ;;  %v2847_v60 = vpop.f32.mrb[191].mxu0  ;;  %3255 = vmatprep.mubr.bf16.mxu1 %v7173_v6  ;;  %3448 = vmatprep.mubr.bf16.mxu0 %v7173_v6  ;;  %v2889_v0 = vmax.f32 %v2853_v45, 0.0 }
 0x578   : > { %v2848_v3 = vadd.f32 %v2847_v60, %v8086_v18  ;;  %v2887_v43 = vmax.f32 %v2845_v62, 0.0  ;;  %v2928_v18 = vlaneseq }
 0x579   : > { %v2890_v32 = vmax.f32 %v2856_v34, 0.0 }
 0x57a   : > { %v2888_v44 = vmax.f32 %v2848_v3, 0.0 }
 0x57b   : > { %v8244_v49 = vpack.c.bf16 %v2890_v32, %v2889_v0 }
 0x57c   : > { %v8246_v2 = vpack.c.bf16 %v2888_v44, %v2887_v43 }
 0x57e   : > { %5457 = vmatmul.mubr.msk.bf16.gmra.mrb[216].mxu1 %vm1843_vm1, %v8246_v2  ;;  %5473 = vmatmul.mubr.msk.bf16.gmra.mrb[248].mxu0 %vm1843_vm1, %v8246_v2 }
 0x57f   : > { %3265 = vmatprep.mubr.bf16.mxu1 %v7173_v6  ;;  %3458 = vmatprep.mubr.bf16.mxu0 %v7173_v6 }
 0x586   : > { %5458 = vmatmul.mubr.msk.bf16.gmra.mrb[220].mxu1 %vm1843_vm1, %v8244_v49  ;;  %5474 = vmatmul.mubr.msk.bf16.gmra.mrb[252].mxu0 %vm1843_vm1, %v8244_v49 }
 0x587   : > { %6146 = vmatprep.mubr.msk.bf16.mxu0 %vm1843_vm1, %v8097_v5  ;;  %3501 = vmatprep.mubr.bf16.mxu1 %v7173_v6 }
 0x58e   : > { %5475 = vmatmul.mubr.msk.bf16.vlgmr.msra.gmra.mrb[224].mxu1 %vm1843_vm1, %v8097_v5  ;;  %6147 = vmatmul.mubr.msk.bf16.vlgmr.msra.gmra.mrb[0].mxu0 %vm1843_vm1, %v8092_v4  ;;  %v5427_v5 = vld [vmem:[%s9438_s7 + $0x5] ss:$8 sm:$0xf] }
 0x58f   : > { %6150 = vmatprep.mubr.msk.bf16.mxu0 %vm1843_vm1, %v8126_v39  ;;  %3511 = vmatprep.mubr.bf16.mxu1 %v7173_v6 }
 0x596   : > { %5476 = vmatmul.mubr.msk.bf16.gmra.mrb[228].mxu1 %vm1843_vm1, %v8092_v4  ;;  %6151 = vmatmul.mubr.msk.bf16.gmra.mrb[4].mxu0 %vm1843_vm1, %v8124_v63  ;;  %v8320_v4 = vshrl.u32 %v2928_v18, 7 }
 0x597   : > { %6154 = vmatprep.mubr.msk.bf16.mxu0 %vm1843_vm1, %v8146_v41  ;;  %3521 = vmatprep.mubr.bf16.mxu1 %v7173_v6 }
 0x598   : > { %9445 = vst [vmem:[#allocation2_spill] sm:$0xff] %v8320_v4 }
 0x59e   : > { %5477 = vmatmul.mubr.msk.bf16.gmra.mrb[232].mxu1 %vm1843_vm1, %v8126_v39  ;;  %6155 = vmatmul.mubr.msk.bf16.gmra.mrb[8].mxu0 %vm1843_vm1, %v8144_v23 }
 0x59f   : > { %6158 = vmatprep.mubr.msk.bf16.mxu0 %vm1843_vm1, %v8166_v48  ;;  %3531 = vmatprep.mubr.bf16.mxu1 %v7173_v6 }
 0x5a6   : > { %5478 = vmatmul.mubr.msk.bf16.gmra.mrb[236].mxu1 %vm1843_vm1, %v8124_v63  ;;  %6159 = vmatmul.mubr.msk.bf16.gmra.mrb[12].mxu0 %vm1843_vm1, %v8164_v47  ;;  %v5428_v63 = vld [vmem:[%s9438_s7 + $0x5] ss:$8 sm:$0xf0] }
 0x5a7   : > { %6162 = vmatprep.mubr.msk.bf16.mxu0 %vm1843_vm1, %v8186_v38  ;;  %3541 = vmatprep.mubr.bf16.mxu1 %v7173_v6  ;;  %v8329_v39 = vor.u32 %v5428_v63, %v5427_v5 }
 0x5a9   : > { %9446 = vst [vmem:[#allocation3_spill] sm:$0xff] %v8329_v39 }
 0x5ae   : > { %5479 = vmatmul.mubr.msk.bf16.gmra.mrb[240].mxu1 %vm1843_vm1, %v8146_v41  ;;  %6163 = vmatmul.mubr.msk.bf16.gmra.mrb[16].mxu0 %vm1843_vm1, %v8184_v8  ;;  %v2938_v41 = vsub.s32 2, %v8320_v4 }
 0x5af   : > { %6166 = vmatprep.mubr.msk.bf16.mxu0 %vm1843_vm1, %v8206_v12  ;;  %3551 = vmatprep.mubr.bf16.mxu1 %v7173_v6 }
 0x5b0   : > { %v8341_v7 = vrot.slane %v8329_v39, %v2938_v41 }
 0x5b6   : > { %5480 = vmatmul.mubr.msk.bf16.gmra.mrb[244].mxu1 %vm1843_vm1, %v8144_v23  ;;  %6167 = vmatmul.mubr.msk.bf16.gmra.mrb[20].mxu0 %vm1843_vm1, %v8204_v13  ;;  %v2930_v23 = vsub.s32 0, %v8320_v4 }
 0x5b7   : > { %6170 = vmatprep.mubr.msk.bf16.mxu0 %vm1843_vm1, %v8226_v46  ;;  %3561 = vmatprep.mubr.bf16.mxu1 %v7173_v6 }
 0x5b8   : > { %v8338_v61 = vrot.slane %v8329_v39, %v2930_v23 }
 0x5be   : > { %5481 = vmatmul.mubr.msk.bf16.gmra.mrb[248].mxu1 %vm1843_vm1, %v8166_v48  ;;  %6171 = vmatmul.mubr.msk.bf16.gmra.mrb[24].mxu0 %vm1843_vm1, %v8224_v21  ;;  %v2942_v48 = vsub.s32 3, %v8320_v4 }
 0x5bf   : > { %6174 = vmatprep.mubr.msk.bf16.mxu0 %vm1843_vm1, %v8246_v2  ;;  %3571 = vmatprep.mubr.bf16.mxu1 %v7173_v6 }
 0x5c0   : > { %v8347_v54 = vrot.slane %v8329_v39, %v2942_v48 }
 0x5c6   : > { %5482 = vmatmul.mubr.msk.bf16.gmra.mrb[252].mxu1 %vm1843_vm1, %v8164_v47  ;;  %6175 = vmatmul.mubr.msk.bf16.gmra.mrb[28].mxu0 %vm1843_vm1, %v8244_v49  ;;  %v2934_v47 = vsub.s32 1, %v8320_v4 }
 0x5c7   : > { %3581 = vmatprep.mubr.bf16.mxu1 %v7173_v6 }
 0x5c8   : > { %v8344_v22 = vrot.slane %v8329_v39, %v2934_v47 }
 0x5ce   : > { %5483 = vmatmul.mubr.msk.bf16.gmra.mrb[0].mxu1 %vm1843_vm1, %v8186_v38 }
 0x5cf   : > { %3591 = vmatprep.mubr.bf16.mxu1 %v7173_v6 }
 0x5d6   : > { %5484 = vmatmul.mubr.msk.bf16.gmra.mrb[4].mxu1 %vm1843_vm1, %v8184_v8 }
 0x5d7   : > { %3601 = vmatprep.mubr.bf16.mxu1 %v7173_v6 }
 0x5de   : > { %5485 = vmatmul.mubr.msk.bf16.gmra.mrb[8].mxu1 %vm1843_vm1, %v8206_v12 }
 0x5df   : > { %3611 = vmatprep.mubr.bf16.mxu1 %v7173_v6 }
 0x5e1   : > { %v3117_v28 = vpop.f32.mrb[160].mxu1  ;;  %v3310_v52 = vpop.f32.mrb[192].mxu0 }
 0x5e2   : > { %v3118_v42 = vadd.f32 %v3117_v28, %v8338_v61  ;;  %v3311_v25 = vadd.f32 %v3310_v52, %v8341_v7  ;;  %v3119_v57 = vpop.f32.mrb[161].mxu1  ;;  %v3312_v26 = vpop.f32.mrb[193].mxu0 }
 0x5e3   : > { %v3120_v8 = vadd.f32 %v3119_v57, %v8344_v22  ;;  %v3313_v38 = vadd.f32 %v3312_v26, %v8347_v54  ;;  %v3121_v50 = vpop.f32.mrb[162].mxu1  ;;  %v3314_v14 = vpop.f32.mrb[194].mxu0 }
 0x5e4   : > { %v3823_v51 = vsub.f32 0.0, %v3118_v42  ;;  %v3825_v20 = vsub.f32 0.0, %v3311_v25  ;;  %v3122_v55 = vadd.f32 %v3121_v50, %v8338_v61  ;;  %v3315_v37 = vadd.f32 %v3314_v14, %v8341_v7  ;;  %v3123_v9 = vpop.f32.mrb[163].mxu1  ;;  %v3316_v10 = vpop.f32.mrb[195].mxu0 }
 0x5e5   : > { %v3824_v11 = vsub.f32 0.0, %v3120_v8  ;;  %v3826_v15 = vsub.f32 0.0, %v3313_v38  ;;  %v3124_v58 = vadd.f32 %v3123_v9, %v8344_v22  ;;  %v3317_v53 = vadd.f32 %v3316_v10, %v8347_v54 }
 0x5e6   : > { %v4047_v12 = vmul.f32 1.442695, %v3823_v51  ;;  %v4051_v59 = vmul.f32 1.442695, %v3825_v20  ;;  %v3830_v16 = vsub.f32 0.0, %v3122_v55  ;;  %v3832_v56 = vsub.f32 0.0, %v3315_v37  ;;  %5486 = vmatmul.mubr.msk.bf16.gmra.mrb[12].mxu1 %vm1843_vm1, %v8204_v13 }
 0x5e7   : > { %v4049_v17 = vmul.f32 1.442695, %v3824_v11  ;;  %v4053_v19 = vmul.f32 1.442695, %v3826_v15  ;;  %v3831_v1 = vsub.f32 0.0, %v3124_v58  ;;  %v3833_v24 = vsub.f32 0.0, %v3317_v53  ;;  %3621 = vmatprep.mubr.bf16.mxu1 %v7173_v6 }
 0x5e8   : > { %6269 = vpow2.f32 %v4047_v12  ;;  %v4061_v30 = vmul.f32 1.442695, %v3830_v16  ;;  %v4065_v29 = vmul.f32 1.442695, %v3832_v56 }
 0x5e9   : > { %6271 = vpow2.f32 %v4051_v59  ;;  %v3127_v35 = vpop.f32.mrb[164].mxu1  ;;  %v3320_v31 = vpop.f32.mrb[196].mxu0  ;;  %v4063_v40 = vmul.f32 1.442695, %v3831_v1  ;;  %v4067_v62 = vmul.f32 1.442695, %v3833_v24 }
 0x5ea   : > { %6273 = vpow2.f32 %v4049_v17  ;;  %v3128_v27 = vadd.f32 %v3127_v35, %v8338_v61  ;;  %v3321_v45 = vadd.f32 %v3320_v31, %v8341_v7  ;;  %v3129_v33 = vpop.f32.mrb[165].mxu1  ;;  %v3322_v13 = vpop.f32.mrb[197].mxu0 }
 0x5eb   : > { %6275 = vpow2.f32 %v4053_v19  ;;  %v3130_v36 = vadd.f32 %v3129_v33, %v8344_v22  ;;  %v3323_v34 = vadd.f32 %v3322_v13, %v8347_v54  ;;  %v3131_v60 = vpop.f32.mrb[166].mxu1  ;;  %v3324_v3 = vpop.f32.mrb[198].mxu0 }
 0x5ec   : > { %6277 = vpow2.f32 %v4061_v30  ;;  %v3837_v0 = vsub.f32 0.0, %v3128_v27  ;;  %v3839_v32 = vsub.f32 0.0, %v3321_v45  ;;  %v3132_v43 = vadd.f32 %v3131_v60, %v8338_v61  ;;  %v3133_v44 = vpop.f32.mrb[167].mxu1  ;;  %v3326_v18 = vpop.f32.mrb[199].mxu0 }
 0x5ed   : > { %6279 = vpow2.f32 %v4065_v29  ;;  %v3838_v5 = vsub.f32 0.0, %v3130_v36  ;;  %v3840_v63 = vsub.f32 0.0, %v3323_v34  ;;  %v3325_v26 = vadd.f32 %v3324_v3, %v8341_v7 }
 0x5ee   : > { %6281 = vpow2.f32 %v4063_v40  ;;  %v4075_v23 = vmul.f32 1.442695, %v3837_v0  ;;  %v4079_v41 = vmul.f32 1.442695, %v3839_v32  ;;  %v3844_v47 = vsub.f32 0.0, %v3132_v43  ;;  %5487 = vmatmul.mubr.msk.bf16.gmra.mrb[16].mxu1 %vm1843_vm1, %v8226_v46 }
 0x5ef   : > { %6283 = vpow2.f32 %v4067_v62  ;;  %v4077_v48 = vmul.f32 1.442695, %v3838_v5  ;;  %v4081_v28 = vmul.f32 1.442695, %v3840_v63  ;;  %3631 = vmatprep.mubr.bf16.mxu1 %v7173_v6  ;;  %v3134_v37 = vadd.f32 %v3133_v44, %v8344_v22 }
 0x5f0   : > { %6285 = vpow2.f32 %v4075_v23  ;;  %v4089_v52 = vmul.f32 1.442695, %v3844_v47  ;;  %v3846_v12 = vsub.f32 0.0, %v3325_v26  ;;  %v3327_v56 = vadd.f32 %v3326_v18, %v8347_v54 }
 0x5f1   : > { %6287 = vpow2.f32 %v4079_v41  ;;  %v3137_v42 = vpop.f32.mrb[168].mxu1  ;;  %v3330_v25 = vpop.f32.mrb[200].mxu0  ;;  %v3845_v1 = vsub.f32 0.0, %v3134_v37 }
 0x5f2   : > { %v6270_v57 = vpop.eup %6269  ;;  %6289 = vpow2.f32 %v4077_v48  ;;  %v3139_v8 = vpop.f32.mrb[169].mxu1  ;;  %v3138_v29 = vadd.f32 %v3137_v42, %v8338_v61  ;;  %v4093_v27 = vmul.f32 1.442695, %v3846_v12  ;;  %v3331_v45 = vadd.f32 %v3330_v25, %v8341_v7 }
 0x5f3   : > { %v3332_v38 = vpop.f32.mrb[201].mxu0  ;;  %v6272_v50 = vpop.eup %6271  ;;  %v4495_v14 = vadd.f32 1.0, %v6270_v57  ;;  %6291 = vpow2.f32 %v4081_v28  ;;  %v3847_v34 = vsub.f32 0.0, %v3327_v56  ;;  %v3140_v60 = vadd.f32 %v3139_v8, %v8344_v22 }
 0x5f4   : > { %v3141_v46 = vpop.f32.mrb[170].mxu1  ;;  %v3334_v51 = vpop.f32.mrb[202].mxu0  ;;  %v4497_v55 = vadd.f32 1.0, %v6272_v50  ;;  %6293 = vpow2.f32 %v4089_v52  ;;  %v4091_v44 = vmul.f32 1.442695, %v3845_v1  ;;  %v3333_v18 = vadd.f32 %v3332_v38, %v8347_v54 }
 0x5f5   : > { %v6274_v20 = vpop.eup %6273  ;;  %v3143_v9 = vpop.f32.mrb[171].mxu1  ;;  %6295 = vrcp.f32 %v4495_v14  ;;  %v3851_v47 = vsub.f32 0.0, %v3138_v29  ;;  %v3142_v48 = vadd.f32 %v3141_v46, %v8338_v61  ;;  %v3853_v42 = vsub.f32 0.0, %v3331_v45 }
 0x5f6   : > { %v6276_v10 = vpop.eup %6275  ;;  %v4496_v11 = vadd.f32 1.0, %v6274_v20  ;;  %v8371_v15 = vpop.f32.mrb[203].mxu0  ;;  %6297 = vrcp.f32 %v4497_v55  ;;  %5488 = vmatmul.mubr.msk.bf16.gmra.mrb[20].mxu1 %vm1843_vm1, %v8224_v21  ;;  %v3335_v25 = vadd.f32 %v3334_v51, %v8341_v7  ;;  %v3852_v8 = vsub.f32 0.0, %v3140_v60 }
 0x5f7   : > { %v6278_v58 = vpop.eup %6277  ;;  %v4498_v53 = vadd.f32 1.0, %v6276_v10  ;;  %3641 = vmatprep.mubr.bf16.mxu1 %v7173_v6  ;;  %v3144_v38 = vadd.f32 %v3143_v9, %v8344_v22  ;;  %v4095_v14 = vmul.f32 1.442695, %v3847_v34  ;;  %v3854_v46 = vsub.f32 0.0, %v3333_v18 }
 0x5f8   : > { %v6280_v59 = vpop.eup %6279  ;;  %6299 = vrcp.f32 %v4496_v11  ;;  %v4502_v16 = vadd.f32 1.0, %v6278_v58  ;;  %v3337_v51 = vadd.f32 %v8371_v15, %v8347_v54  ;;  %v3858_v55 = vsub.f32 0.0, %v3142_v48 }
 0x5f9   : > { %v6282_v17 = vpop.eup %6281  ;;  %6301 = vrcp.f32 %v4498_v53  ;;  %v4504_v19 = vadd.f32 1.0, %v6280_v59  ;;  %v3147_v35 = vpop.f32.mrb[172].mxu1  ;;  %v4107_v11 = vmul.f32 1.442695, %v3853_v42  ;;  %v3860_v58 = vsub.f32 0.0, %v3335_v25 }
 0x5fa   : > { %v6284_v24 = vpop.eup %6283  ;;  %6303 = vrcp.f32 %v4502_v16  ;;  %v4503_v30 = vadd.f32 1.0, %v6282_v17  ;;  %v3340_v31 = vpop.f32.mrb[204].mxu0  ;;  %v3148_v37 = vadd.f32 %v3147_v35, %v8338_v61  ;;  %v4105_v16 = vmul.f32 1.442695, %v3852_v8 }
 0x5fb   : > { %v6286_v40 = vpop.eup %6285  ;;  %6305 = vrcp.f32 %v4504_v19  ;;  %v4505_v21 = vadd.f32 1.0, %v6284_v24  ;;  %v8379_v33 = vpop.f32.mrb[173].mxu1  ;;  %v3341_v15 = vadd.f32 %v3340_v31, %v8341_v7  ;;  %v3859_v56 = vsub.f32 0.0, %v3144_v38 }
 0x5fc   : > { %v8381_v13 = vpop.f32.mrb[205].mxu0  ;;  %v6288_v62 = vpop.eup %6287  ;;  %6307 = vrcp.f32 %v4503_v30  ;;  %v4509_v36 = vadd.f32 1.0, %v6286_v40  ;;  %v4109_v1 = vmul.f32 1.442695, %v3854_v46  ;;  %v3861_v24 = vsub.f32 0.0, %v3337_v51 }
 0x5fd   : > { %v8384_v3 = vpop.f32.mrb[174].mxu1  ;;  %v8386_v0 = vpop.f32.mrb[206].mxu0  ;;  %6309 = vrcp.f32 %v4505_v21  ;;  %v4511_v43 = vadd.f32 1.0, %v6288_v62  ;;  %v4117_v35 = vmul.f32 1.442695, %v3858_v55  ;;  %v3865_v31 = vsub.f32 0.0, %v3148_v37 }
 0x5fe   : > { %v6290_v32 = vpop.eup %6289  ;;  %v8389_v5 = vpop.f32.mrb[175].mxu1  ;;  %6311 = vrcp.f32 %v4509_v36  ;;  %5489 = vmatmul.mubr.msk.bf16.gmra.mrb[24].mxu1 %vm1843_vm1, %v8246_v2  ;;  %v4103_v2 = vmul.f32 1.442695, %v3851_v47  ;;  %v4121_v45 = vmul.f32 1.442695, %v3860_v58  ;;  %v3867_v62 = vsub.f32 0.0, %v3341_v15 }
 0x5ff   : > { %v8391_v63 = vpop.f32.mrb[207].mxu0  ;;  %v6292_v23 = vpop.eup %6291  ;;  %v4510_v41 = vadd.f32 1.0, %v6290_v32  ;;  %6313 = vrcp.f32 %v4511_v43  ;;  %3651 = vmatprep.mubr.bf16.mxu1 %v7173_v6  ;;  %v4119_v34 = vmul.f32 1.442695, %v3859_v56  ;;  %v4123_v32 = vmul.f32 1.442695, %v3861_v24 }
 0x600   : > { %v6294_v28 = vpop.eup %6293  ;;  %v4512_v52 = vadd.f32 1.0, %v6292_v23  ;;  %v3150_v8 = vadd.f32 %v8379_v33, %v8344_v22  ;;  %v3343_v51 = vadd.f32 %v8381_v13, %v8347_v54 }
 0x601   : > { %v6296_v57 = vpop.eup %6295  ;;  %6315 = vrcp.f32 %v4510_v41  ;;  %v4516_v26 = vadd.f32 1.0, %v6294_v28  ;;  %v8411_v9 = vpop.f32.mrb[176].mxu1 }
 0x602   : > { %v6298_v50 = vpop.eup %6297  ;;  %4943 = vst [vmem:[%s8398_s23] sm:$0xff] %v6296_v57  ;;  %6317 = vrcp.f32 %v4512_v52  ;;  %v8413_v6 = vpop.f32.mrb[208].mxu0  ;;  %v3866_v58 = vsub.f32 0.0, %v3150_v8  ;;  %v3868_v56 = vsub.f32 0.0, %v3343_v51 }
 0x603   : > { %v6300_v20 = vpop.eup %6299  ;;  %4945 = vst [vmem:[%s8398_s23 + $0x10] sm:$0xff] %v6298_v50  ;;  %6319 = vrcp.f32 %v4516_v26  ;;  %v8417_v53 = vpop.f32.mrb[177].mxu1  ;;  %v3351_v8 = vadd.f32 %v8413_v6, %v8341_v7 }
 0x604   : > { %v6302_v10 = vpop.eup %6301  ;;  %4944 = vst [vmem:[%s8398_s23 + $0x8] sm:$0xff] %v6300_v20  ;;  %6321 = vpow2.f32 %v4093_v27  ;;  %v8419_v12 = vpop.f32.mrb[209].mxu0 }
 0x605   : > { %v6304_v59 = vpop.eup %6303  ;;  %4946 = vst [vmem:[%s8398_s23 + $0x18] sm:$0xff] %v6302_v10  ;;  %6323 = vpow2.f32 %v4091_v44  ;;  %v8422_v17 = vpop.f32.mrb[178].mxu1  ;;  %v4131_v44 = vmul.f32 1.442695, %v3865_v31  ;;  %v3152_v10 = vadd.f32 %v8384_v3, %v8338_v61  ;;  %v3345_v3 = vadd.f32 %v8386_v0, %v8341_v7 }
 0x606   : > { %v6306_v19 = vpop.eup %6305  ;;  %4950 = vst [vmem:[%s8398_s23 + $0x38] sm:$0xff] %v6304_v59  ;;  %6325 = vpow2.f32 %v4095_v14  ;;  %v8425_v30 = vpop.f32.mrb[210].mxu0  ;;  %5490 = vmatmul.mubr.msk.bf16.gmra.mrb[28].mxu1 %vm1843_vm1, %v8244_v49  ;;  %v4135_v49 = vmul.f32 1.442695, %v3867_v62  ;;  %v3347_v0 = vadd.f32 %v8391_v63, %v8347_v54  ;;  %v3160_v63 = vadd.f32 %v8417_v53, %v8344_v22 }
 0x607   : > { %v6308_v29 = vpop.eup %6307  ;;  %4952 = vst [vmem:[%s8398_s23 + $0x48] sm:$0xff] %v6306_v19  ;;  %6327 = vpow2.f32 %v4103_v2  ;;  %v8428_v40 = vpop.f32.mrb[179].mxu1  ;;  %v3872_v62 = vsub.f32 0.0, %v3152_v10  ;;  %v3162_v53 = vadd.f32 %v8422_v17, %v8338_v61 }
 0x608   : > { %v8430_v21 = vpop.f32.mrb[211].mxu0  ;;  %v6310_v27 = vpop.eup %6309  ;;  %4951 = vst [vmem:[%s8398_s23 + $0x40] sm:$0xff] %v6308_v29  ;;  %6329 = vpow2.f32 %v4107_v11 }
 0x609   : > { %v6312_v36 = vpop.eup %6311  ;;  %4953 = vst [vmem:[%s8398_s23 + $0x50] sm:$0xff] %v6310_v27  ;;  %6331 = vpow2.f32 %v4105_v16  ;;  %v8438_v18 = vpop.f32.mrb[180].mxu1 }
 0x60a   : > { %v6314_v60 = vpop.eup %6313  ;;  %4957 = vst [vmem:[%s8398_s23 + $0x70] sm:$0xff] %v6312_v36  ;;  %6333 = vpow2.f32 %v4109_v1  ;;  %v8441_v41 = vpop.f32.mrb[212].mxu0  ;;  %v3154_v36 = vadd.f32 %v8389_v5, %v8344_v22 }
 0x60b   : > { %v6316_v43 = vpop.eup %6315  ;;  %4959 = vst [vmem:[%s8398_s23 + $0x80] sm:$0xff] %v6314_v60  ;;  %6335 = vpow2.f32 %v4117_v35  ;;  %v8444_v48 = vpop.f32.mrb[181].mxu1 }
 0x60c   : > { %v6318_v23 = vpop.eup %6317  ;;  %4958 = vst [vmem:[%s8398_s23 + $0x78] sm:$0xff] %v6316_v43  ;;  %6337 = vpow2.f32 %v4121_v45  ;;  %v8446_v28 = vpop.f32.mrb[213].mxu0  ;;  %v3873_v51 = vsub.f32 0.0, %v3154_v36 }
 0x60d   : > { %v6320_v47 = vpop.eup %6319  ;;  %4960 = vst [vmem:[%s8398_s23 + $0x88] sm:$0xff] %v6318_v23  ;;  %6339 = vpow2.f32 %v4119_v34  ;;  %v8449_v42 = vpop.f32.mrb[182].mxu1 }
 0x60e   : > { %v6322_v52 = vpop.eup %6321  ;;  %4964 = vst [vmem:[%s8398_s23 + $0xa8] sm:$0xff] %v6320_v47  ;;  %6341 = vpow2.f32 %v4123_v32  ;;  %v8451_v25 = vpop.f32.mrb[214].mxu0  ;;  %v4137_v47 = vmul.f32 1.442695, %v3868_v56  ;;  %v3881_v56 = vsub.f32 0.0, %v3351_v8 }
 0x60f   : > { %v6324_v57 = vpop.eup %6323  ;;  %v4518_v26 = vadd.f32 1.0, %v6322_v52  ;;  %6343 = vpow2.f32 %v4131_v44  ;;  %v8455_v38 = vpop.f32.mrb[183].mxu1  ;;  %v4133_v44 = vmul.f32 1.442695, %v3866_v58  ;;  %v3158_v52 = vadd.f32 %v8411_v9, %v8338_v61 }
 0x610   : > { %v8457_v50 = vpop.f32.mrb[215].mxu0  ;;  %v6326_v14 = vpop.eup %6325  ;;  %v4517_v46 = vadd.f32 1.0, %v6324_v57  ;;  %6345 = vpow2.f32 %v4135_v49  ;;  %v3875_v9 = vsub.f32 0.0, %v3347_v0  ;;  %v4147_v17 = vmul.f32 1.442695, %v3873_v51 }
 0x611   : > { %v6328_v20 = vpop.eup %6327  ;;  %6347 = vrcp.f32 %v4518_v26  ;;  %v4519_v2 = vadd.f32 1.0, %v6326_v14  ;;  %v8463_v15 = vpop.f32.mrb[184].mxu1  ;;  %v3874_v26 = vsub.f32 0.0, %v3345_v3 }
 0x612   : > { %v6330_v55 = vpop.eup %6329  ;;  %6349 = vrcp.f32 %v4517_v46  ;;  %v4523_v37 = vadd.f32 1.0, %v6328_v20  ;;  %v8465_v59 = vpop.f32.mrb[216].mxu0 }
 0x613   : > { %v6332_v33 = vpop.eup %6331  ;;  %6351 = vrcp.f32 %v4519_v2  ;;  %v4525_v11 = vadd.f32 1.0, %v6330_v55  ;;  %v8467_v19 = vpop.f32.mrb[185].mxu1  ;;  %v3353_v55 = vadd.f32 %v8419_v12, %v8347_v54  ;;  %v4149_v12 = vmul.f32 1.442695, %v3874_v26 }
 0x614   : > { %v6334_v16 = vpop.eup %6333  ;;  %6353 = vrcp.f32 %v4523_v37  ;;  %v4524_v13 = vadd.f32 1.0, %v6332_v33  ;;  %v8469_v1 = vpop.f32.mrb[217].mxu0  ;;  %v4145_v33 = vmul.f32 1.442695, %v3872_v62  ;;  %v3164_v62 = vadd.f32 %v8428_v40, %v8344_v22 }
 0x615   : > { %v6336_v24 = vpop.eup %6335  ;;  %6355 = vrcp.f32 %v4525_v11  ;;  %v4526_v29 = vadd.f32 1.0, %v6334_v16  ;;  %v8473_v35 = vpop.f32.mrb[186].mxu1  ;;  %v3879_v11 = vsub.f32 0.0, %v3158_v52  ;;  %v4163_v40 = vmul.f32 1.442695, %v3881_v56 }
 0x616   : > { %v8475_v31 = vpop.f32.mrb[218].mxu0  ;;  %v6338_v27 = vpop.eup %6337  ;;  %6357 = vrcp.f32 %v4524_v13  ;;  %v4530_v45 = vadd.f32 1.0, %v6336_v24  ;;  %v3355_v24 = vadd.f32 %v8425_v30, %v8341_v7  ;;  %v4151_v30 = vmul.f32 1.442695, %v3875_v9 }
 0x617   : > { %v8479_v34 = vpop.f32.mrb[187].mxu1  ;;  %v8481_v60 = vpop.f32.mrb[219].mxu0  ;;  %6359 = vrcp.f32 %v4526_v29  ;;  %v4532_v43 = vadd.f32 1.0, %v6338_v27  ;;  %v3887_v26 = vsub.f32 0.0, %v3164_v62 }
 0x618   : > { %v6340_v32 = vpop.eup %6339  ;;  %6361 = vrcp.f32 %v4530_v45  ;;  %v3880_v45 = vsub.f32 0.0, %v3160_v63 }
 0x619   : > { %v6342_v23 = vpop.eup %6341  ;;  %v4531_v49 = vadd.f32 1.0, %v6340_v32  ;;  %6363 = vrcp.f32 %v4532_v43  ;;  %v8493_v37 = vpop.f32.mrb[188].mxu1  ;;  %v3882_v43 = vsub.f32 0.0, %v3353_v55 }
 0x61a   : > { %v6344_v57 = vpop.eup %6343  ;;  %v4533_v5 = vadd.f32 1.0, %v6342_v23  ;;  %v8495_v10 = vpop.f32.mrb[220].mxu0 }
 0x61b   : > { %v6346_v14 = vpop.eup %6345  ;;  %6365 = vrcp.f32 %v4531_v49  ;;  %v4537_v46 = vadd.f32 1.0, %v6344_v57  ;;  %v8500_v58 = vpop.f32.mrb[189].mxu1  ;;  %v3886_v49 = vsub.f32 0.0, %v3162_v53  ;;  %v3888_v57 = vsub.f32 0.0, %v3355_v24 }
 0x61c   : > { %v6348_v20 = vpop.eup %6347  ;;  %6367 = vrcp.f32 %v4533_v5  ;;  %v4539_v2 = vadd.f32 1.0, %v6346_v14  ;;  %v8502_v16 = vpop.f32.mrb[221].mxu0  ;;  %v4165_v14 = vmul.f32 1.442695, %v3882_v43  ;;  %v4175_v53 = vmul.f32 1.442695, %v3887_v26 }
 0x61d   : > { %v6350_v6 = vpop.eup %6349  ;;  %4966 = vst [vmem:[%s8398_s23 + $0xb8] sm:$0xff] %v6348_v20  ;;  %6369 = vrcp.f32 %v4537_v46  ;;  %v8507_v29 = vpop.f32.mrb[190].mxu1  ;;  %v4173_v20 = vmul.f32 1.442695, %v3886_v49  ;;  %v4177_v55 = vmul.f32 1.442695, %v3888_v57 }
 0x61e   : > { %v6352_v13 = vpop.eup %6351  ;;  %4965 = vst [vmem:[%s8398_s23 + $0xb0] sm:$0xff] %v6350_v6  ;;  %6371 = vrcp.f32 %v4539_v2  ;;  %v8509_v3 = vpop.f32.mrb[222].mxu0 }
 0x61f   : > { %v6354_v27 = vpop.eup %6353  ;;  %4967 = vst [vmem:[%s8398_s23 + $0xc0] sm:$0xff] %v6352_v13  ;;  %6373 = vpow2.f32 %v4133_v44  ;;  %v8514_v36 = vpop.f32.mrb[191].mxu1  ;;  %v4159_v44 = vmul.f32 1.442695, %v3879_v11 }
 0x620   : > { %v6356_v32 = vpop.eup %6355  ;;  %4971 = vst [vmem:[%s8398_s23 + $0xe0] sm:$0xff] %v6354_v27  ;;  %6375 = vpow2.f32 %v4137_v47  ;;  %v8517_v0 = vpop.f32.mrb[223].mxu0  ;;  %v4161_v47 = vmul.f32 1.442695, %v3880_v45 }
 0x621   : > { %v6358_v23 = vpop.eup %6357  ;;  %4973 = vst [vmem:[%s8398_s23 + $0xf0] sm:$0xff] %v6356_v32  ;;  %6377 = vpow2.f32 %v4145_v33  ;;  %v8523_v46 = vpop.f32.mrb[192].mxu1 }
 0x622   : > { %v6360_v52 = vpop.eup %6359  ;;  %4972 = vst [vmem:[%s8398_s23 + $0xe8] sm:$0xff] %v6358_v23  ;;  %6379 = vpow2.f32 %v4149_v12  ;;  %v8525_v51 = vpop.f32.mrb[224].mxu0 }
 0x623   : > { %v6362_v5 = vpop.eup %6361  ;;  %4974 = vst [vmem:[%s8398_s23 + $0xf8] sm:$0xff] %v6360_v52  ;;  %6381 = vpow2.f32 %v4147_v17  ;;  %v8528_v2 = vpop.f32.mrb[193].mxu1  ;;  %v3357_v17 = vadd.f32 %v8430_v21, %v8347_v54  ;;  %v3168_v21 = vadd.f32 %v8438_v18, %v8338_v61  ;;  %v3170_v18 = vadd.f32 %v8444_v48, %v8344_v22 }
 0x624   : > { %v6364_v8 = vpop.eup %6363  ;;  %4978 = vst [vmem:[%s8398_s23 + $0x118] sm:$0xff] %v6362_v5  ;;  %6383 = vpow2.f32 %v4151_v30  ;;  %v8531_v6 = vpop.f32.mrb[225].mxu0  ;;  %v3172_v48 = vadd.f32 %v8449_v42, %v8338_v61 }
 0x625   : > { %v6366_v63 = vpop.eup %6365  ;;  %4980 = vst [vmem:[%s8398_s23 + $0x128] sm:$0xff] %v6364_v8  ;;  %6385 = vpow2.f32 %v4159_v44  ;;  %v8533_v33 = vpop.f32.mrb[194].mxu1  ;;  %v3889_v57 = vsub.f32 0.0, %v3357_v17 }
 0x626   : > { %v6368_v9 = vpop.eup %6367  ;;  %4979 = vst [vmem:[%s8398_s23 + $0x120] sm:$0xff] %v6366_v63  ;;  %6387 = vpow2.f32 %v4163_v40  ;;  %v8536_v13 = vpop.f32.mrb[226].mxu0 }
 0x627   : > { %v6370_v11 = vpop.eup %6369  ;;  %4981 = vst [vmem:[%s8398_s23 + $0x130] sm:$0xff] %v6368_v9  ;;  %6389 = vpow2.f32 %v4161_v47  ;;  %v8538_v12 = vpop.f32.mrb[195].mxu1 }
 0x628   : > { %v6372_v56 = vpop.eup %6371  ;;  %4985 = vst [vmem:[%s8398_s23 + $0x150] sm:$0xff] %v6370_v11  ;;  %6391 = vpow2.f32 %v4165_v14  ;;  %v8541_v24 = vpop.f32.mrb[227].mxu0  ;;  %v3361_v14 = vadd.f32 %v8441_v41, %v8341_v7  ;;  %v3363_v41 = vadd.f32 %v8446_v28, %v8347_v54 }
 0x629   : > { %v6374_v27 = vpop.eup %6373  ;;  %4987 = vst [vmem:[%s8398_s23 + $0x160] sm:$0xff] %v6372_v56  ;;  %6393 = vpow2.f32 %v4173_v20  ;;  %v8546_v44 = vpop.f32.mrb[196].mxu1 }
 0x62a   : > { %v6376_v45 = vpop.eup %6375  ;;  %v4538_v62 = vadd.f32 1.0, %v6374_v27  ;;  %6395 = vpow2.f32 %v4177_v55  ;;  %v8548_v49 = vpop.f32.mrb[228].mxu0 }
 0x62b   : > { %v6378_v32 = vpop.eup %6377  ;;  %v4540_v30 = vadd.f32 1.0, %v6376_v45  ;;  %6397 = vpow2.f32 %v4175_v53  ;;  %v8552_v5 = vpop.f32.mrb[197].mxu1 }
 0x62c   : > { %v6380_v43 = vpop.eup %6379  ;;  %6399 = vrcp.f32 %v4538_v62  ;;  %v4544_v23 = vadd.f32 1.0, %v6378_v32  ;;  %v8554_v47 = vpop.f32.mrb[229].mxu0  ;;  %v4179_v62 = vmul.f32 1.442695, %v3889_v57  ;;  %v3893_v32 = vsub.f32 0.0, %v3168_v21 }
 0x62d   : > { %v6382_v52 = vpop.eup %6381  ;;  %6401 = vrcp.f32 %v4540_v30  ;;  %v4546_v40 = vadd.f32 1.0, %v6380_v43  ;;  %v8558_v63 = vpop.f32.mrb[198].mxu1  ;;  %v3174_v57 = vadd.f32 %v8455_v38, %v8344_v22 }
 0x62e   : > { %v6384_v26 = vpop.eup %6383  ;;  %6403 = vrcp.f32 %v4544_v23  ;;  %v4545_v8 = vadd.f32 1.0, %v6382_v52  ;;  %v8560_v20 = vpop.f32.mrb[230].mxu0  ;;  %v3895_v23 = vsub.f32 0.0, %v3361_v14 }
 0x62f   : > { %v6386_v9 = vpop.eup %6385  ;;  %6405 = vrcp.f32 %v4546_v40  ;;  %v4547_v55 = vadd.f32 1.0, %v6384_v26  ;;  %v8564_v11 = vpop.f32.mrb[199].mxu1  ;;  %v3894_v26 = vsub.f32 0.0, %v3170_v18  ;;  %v3367_v18 = vadd.f32 %v8457_v50, %v8347_v54 }
 0x630   : > { %v8566_v53 = vpop.f32.mrb[231].mxu0  ;;  %v6388_v56 = vpop.eup %6387  ;;  %6407 = vrcp.f32 %v4545_v8  ;;  %v4551_v27 = vadd.f32 1.0, %v6386_v9  ;;  %v3365_v8 = vadd.f32 %v8451_v25, %v8341_v7  ;;  %v4191_v50 = vmul.f32 1.442695, %v3895_v23 }
 0x631   : > { %v6390_v17 = vpop.eup %6389  ;;  %6409 = vrcp.f32 %v4547_v55  ;;  %v4553_v45 = vadd.f32 1.0, %v6388_v56  ;;  %v3896_v55 = vsub.f32 0.0, %v3363_v41  ;;  %v8576_v21 = vpop.f32.mrb[200].mxu1  ;;  %v3901_v39 = vsub.f32 0.0, %v3174_v57 }
 0x632   : > { %v6392_v30 = vpop.eup %6391  ;;  %6411 = vrcp.f32 %v4551_v27  ;;  %v4552_v43 = vadd.f32 1.0, %v6390_v17  ;;  %v8578_v14 = vpop.f32.mrb[232].mxu0  ;;  %v4187_v27 = vmul.f32 1.442695, %v3893_v32 }
 0x633   : > { %v6394_v52 = vpop.eup %6393  ;;  %6413 = vrcp.f32 %v4553_v45  ;;  %v4554_v40 = vadd.f32 1.0, %v6392_v30  ;;  %v8582_v25 = vpop.f32.mrb[201].mxu1  ;;  %v3900_v45 = vsub.f32 0.0, %v3172_v48  ;;  %v3178_v30 = vadd.f32 %v8463_v15, %v8338_v61 }
 0x634   : > { %v6396_v28 = vpop.eup %6395  ;;  %6415 = vrcp.f32 %v4552_v43  ;;  %v4558_v9 = vadd.f32 1.0, %v6394_v52  ;;  %v8584_v17 = vpop.f32.mrb[233].mxu0  ;;  %v4189_v15 = vmul.f32 1.442695, %v3894_v26  ;;  %v4193_v23 = vmul.f32 1.442695, %v3896_v55 }
 0x635   : > { %v6398_v42 = vpop.eup %6397  ;;  %6417 = vrcp.f32 %v4554_v40  ;;  %v4560_v56 = vadd.f32 1.0, %v6396_v28  ;;  %v8588_v43 = vpop.f32.mrb[202].mxu1  ;;  %v3902_v40 = vsub.f32 0.0, %v3365_v8  ;;  %v3371_v28 = vadd.f32 %v8465_v59, %v8341_v7 }
 0x636   : > { %v6400_v41 = vpop.eup %6399  ;;  %6419 = vrcp.f32 %v4558_v9  ;;  %v4559_v38 = vadd.f32 1.0, %v6398_v42  ;;  %v8590_v52 = vpop.f32.mrb[234].mxu0  ;;  %v3903_v59 = vsub.f32 0.0, %v3367_v18  ;;  %v3373_v8 = vadd.f32 %v8469_v1, %v8347_v54 }
 0x637   : > { %v6402_v32 = vpop.eup %6401  ;;  %4986 = vst [vmem:[%s8398_s23 + $0x158] sm:$0xff] %v6400_v41  ;;  %6421 = vrcp.f32 %v4560_v56  ;;  %v8595_v9 = vpop.f32.mrb[203].mxu1  ;;  %v3180_v41 = vadd.f32 %v8467_v19, %v8344_v22  ;;  %v4205_v57 = vmul.f32 1.442695, %v3902_v40  ;;  %v3909_v19 = vsub.f32 0.0, %v3371_v28 }
 0x638   : > { %v8597_v48 = vpop.f32.mrb[235].mxu0  ;;  %v6404_v42 = vpop.eup %6403  ;;  %4988 = vst [vmem:[%s8398_s23 + $0x168] sm:$0xff] %v6402_v32  ;;  %6423 = vrcp.f32 %v4559_v38  ;;  %v4201_v38 = vmul.f32 1.442695, %v3900_v45  ;;  %v3907_v32 = vsub.f32 0.0, %v3178_v30  ;;  %v3910_v30 = vsub.f32 0.0, %v3373_v8 }
 0x639   : > { %v6406_v56 = vpop.eup %6405  ;;  %4992 = vst [vmem:[%s8398_s23 + $0x188] sm:$0xff] %v6404_v42  ;;  %6425 = vpow2.f32 %v4179_v62  ;;  %v4203_v62 = vmul.f32 1.442695, %v3901_v39  ;;  %v3908_v55 = vsub.f32 0.0, %v3180_v41  ;;  %v8608_v18 = vpop.f32.mrb[204].mxu1 }
 0x63a   : > { %v6408_v4 = vpop.eup %6407  ;;  %4994 = vst [vmem:[%s8398_s23 + $0x198] sm:$0xff] %v6406_v56  ;;  %6427 = vpow2.f32 %v4187_v27  ;;  %v8610_v1 = vpop.f32.mrb[236].mxu0  ;;  %v4207_v45 = vmul.f32 1.442695, %v3903_v59  ;;  %v4215_v39 = vmul.f32 1.442695, %v3907_v32 }
 0x63b   : > { %v6410_v26 = vpop.eup %6409  ;;  %4993 = vst [vmem:[%s8398_s23 + $0x190] sm:$0xff] %v6408_v4  ;;  %6429 = vpow2.f32 %v4191_v50  ;;  %v8613_v4 = vpop.f32.mrb[205].mxu1  ;;  %v4219_v56 = vmul.f32 1.442695, %v3909_v19  ;;  %v4221_v32 = vmul.f32 1.442695, %v3910_v30 }
 0x63c   : > { %v6412_v42 = vpop.eup %6411  ;;  %4995 = vst [vmem:[%s8398_s23 + $0x1a0] sm:$0xff] %v6410_v26  ;;  %6431 = vpow2.f32 %v4189_v15  ;;  %v8615_v50 = vpop.f32.mrb[237].mxu0  ;;  %v4217_v26 = vmul.f32 1.442695, %v3908_v55 }
 0x63d   : > { %v6414_v27 = vpop.eup %6413  ;;  %4999 = vst [vmem:[%s8398_s23 + $0x1c0] sm:$0xff] %v6412_v42  ;;  %6433 = vpow2.f32 %v4193_v23  ;;  %v8618_v28 = vpop.f32.mrb[206].mxu1 }
 0x63e   : > { %v6416_v40 = vpop.eup %6415  ;;  %5001 = vst [vmem:[%s8398_s23 + $0x1d0] sm:$0xff] %v6414_v27  ;;  %6435 = vpow2.f32 %v4201_v38  ;;  %v8620_v15 = vpop.f32.mrb[238].mxu0 }
 0x63f   : > { %v6418_v41 = vpop.eup %6417  ;;  %5000 = vst [vmem:[%s8398_s23 + $0x1c8] sm:$0xff] %v6416_v40  ;;  %6437 = vpow2.f32 %v4205_v57  ;;  %v8623_v23 = vpop.f32.mrb[207].mxu1  ;;  %v3182_v57 = vadd.f32 %v8473_v35, %v8338_v61 }
 0x640   : > { %v8625_v59 = vpop.f32.mrb[239].mxu0  ;;  %v6420_v8 = vpop.eup %6419  ;;  %5002 = vst [vmem:[%s8398_s23 + $0x1d8] sm:$0xff] %v6418_v41  ;;  %6439 = vpow2.f32 %v4203_v62  ;;  %v3375_v62 = vadd.f32 %v8475_v31, %v8341_v7 }
 0x641   : > { %v6422_v38 = vpop.eup %6421  ;;  %5006 = vst [vmem:[%s8398_s23 + $0x1f8] sm:$0xff] %v6420_v8  ;;  %6441 = vpow2.f32 %v4207_v45  ;;  %v8635_v55 = vpop.f32.mrb[208].mxu1 }
 0x642   : > { %v6424_v42 = vpop.eup %6423  ;;  %5008 = vst [vmem:[%s8398_s23 + $0x208] sm:$0xff] %v6422_v38  ;;  %6443 = vpow2.f32 %v4215_v39  ;;  %9447 = vst [vmem:[#allocation4_spill] sm:$0xff] %v8635_v55  ;;  %v8637_v41 = vpop.f32.mrb[240].mxu0 }
 0x643   : > { %v6426_v27 = vpop.eup %6425  ;;  %5007 = vst [vmem:[%s8398_s23 + $0x200] sm:$0xff] %v6424_v42  ;;  %6445 = vpow2.f32 %v4219_v56  ;;  %9448 = vst [vmem:[#allocation5_spill] sm:$0xff] %v8637_v41  ;;  %v8639_v39 = vpop.f32.mrb[209].mxu1 }
 0x644   : > { %v6428_v19 = vpop.eup %6427  ;;  %v4561_v40 = vadd.f32 1.0, %v6426_v27  ;;  %6447 = vpow2.f32 %v4217_v26  ;;  %9449 = vst [vmem:[#allocation6_spill] sm:$0xff] %v8639_v39  ;;  %v8641_v8 = vpop.f32.mrb[241].mxu0  ;;  %v3914_v27 = vsub.f32 0.0, %v3182_v57  ;;  %v3916_v39 = vsub.f32 0.0, %v3375_v62 }
 0x645   : > { %v6430_v45 = vpop.eup %6429  ;;  %v4565_v30 = vadd.f32 1.0, %v6428_v19  ;;  %6449 = vpow2.f32 %v4221_v32  ;;  %9450 = vst [vmem:[#allocation7_spill] sm:$0xff] %v8641_v8  ;;  %v8643_v38 = vpop.f32.mrb[210].mxu1  ;;  %v3377_v57 = vadd.f32 %v8481_v60, %v8347_v54 }
 0x646   : > { %v6432_v56 = vpop.eup %6431  ;;  %6451 = vrcp.f32 %v4561_v40  ;;  %v4567_v35 = vadd.f32 1.0, %v6430_v45  ;;  %9451 = vst [vmem:[#allocation8_spill] sm:$0xff] %v8643_v38  ;;  %v8645_v26 = vpop.f32.mrb[242].mxu0  ;;  %v3184_v45 = vadd.f32 %v8479_v34, %v8344_v22  ;;  %v3381_v34 = vadd.f32 %v8495_v10, %v8341_v7 }
 0x647   : > { %9452 = vst [vmem:[#allocation9_spill] sm:$0xff] %v8645_v26  ;;  %v6434_v42 = vpop.eup %6433  ;;  %6453 = vrcp.f32 %v4565_v30  ;;  %v4566_v31 = vadd.f32 1.0, %v6432_v56  ;;  %v8647_v55 = vpop.f32.mrb[211].mxu1  ;;  %v3383_v10 = vadd.f32 %v8502_v16, %v8347_v54 }
 0x648   : > { %v8649_v41 = vpop.f32.mrb[243].mxu0  ;;  %v6436_v32 = vpop.eup %6435  ;;  %6455 = vrcp.f32 %v4567_v35  ;;  %v4568_v19 = vadd.f32 1.0, %v6434_v42  ;;  %v3188_v35 = vadd.f32 %v8493_v37, %v8338_v61 }
 0x649   : > { %9453 = vst [vmem:[#allocation10_spill] sm:$0xff] %v8649_v41  ;;  %v6438_v8 = vpop.eup %6437  ;;  %6457 = vrcp.f32 %v4566_v31  ;;  %v4572_v40 = vadd.f32 1.0, %v6436_v32  ;;  %v4229_v41 = vmul.f32 1.442695, %v3914_v27  ;;  %v4233_v31 = vmul.f32 1.442695, %v3916_v39 }
 0x64a   : > { %v6440_v38 = vpop.eup %6439  ;;  %6459 = vrcp.f32 %v4568_v19  ;;  %v4574_v26 = vadd.f32 1.0, %v6438_v8  ;;  %v8659_v32 = vpop.f32.mrb[212].mxu1 }
 0x64b   : > { %v6442_v30 = vpop.eup %6441  ;;  %6461 = vrcp.f32 %v4572_v40  ;;  %v4573_v56 = vadd.f32 1.0, %v6440_v38  ;;  %v8661_v8 = vpop.f32.mrb[244].mxu0  ;;  %v3915_v40 = vsub.f32 0.0, %v3184_v45  ;;  %v3190_v38 = vadd.f32 %v8500_v58, %v8344_v22 }
 0x64c   : > { %v6444_v62 = vpop.eup %6443  ;;  %6463 = vrcp.f32 %v4574_v26  ;;  %v4575_v42 = vadd.f32 1.0, %v6442_v30  ;;  %9454 = vst [vmem:[#allocation11_spill] sm:$0xff] %v8661_v8  ;;  %v8665_v27 = vpop.f32.mrb[213].mxu1  ;;  %v3917_v30 = vsub.f32 0.0, %v3377_v57  ;;  %v3921_v58 = vsub.f32 0.0, %v3188_v35 }
 0x64d   : > { %v6446_v19 = vpop.eup %6445  ;;  %6465 = vrcp.f32 %v4573_v56  ;;  %v4579_v60 = vadd.f32 1.0, %v6444_v62  ;;  %9455 = vst [vmem:[#allocation12_spill] sm:$0xff] %v8665_v27  ;;  %v8667_v37 = vpop.f32.mrb[245].mxu0  ;;  %v4231_v35 = vmul.f32 1.442695, %v3915_v40  ;;  %v3198_v40 = vadd.f32 %v8523_v46, %v8338_v61 }
 0x64e   : > { %9456 = vst [vmem:[#allocation13_spill] sm:$0xff] %v8667_v37  ;;  %v6448_v26 = vpop.eup %6447  ;;  %6467 = vrcp.f32 %v4575_v42  ;;  %v4581_v39 = vadd.f32 1.0, %v6446_v19  ;;  %v8671_v8 = vpop.f32.mrb[214].mxu1  ;;  %v3192_v37 = vadd.f32 %v8507_v29, %v8338_v61  ;;  %v3923_v19 = vsub.f32 0.0, %v3381_v34 }
 0x64f   : > { %9457 = vst [vmem:[#allocation14_spill] sm:$0xff] %v8671_v8  ;;  %v8673_v56 = vpop.f32.mrb[246].mxu0  ;;  %v6450_v45 = vpop.eup %6449  ;;  %6469 = vrcp.f32 %v4579_v60  ;;  %v4580_v62 = vadd.f32 1.0, %v6448_v26  ;;  %v3922_v60 = vsub.f32 0.0, %v3190_v38  ;;  %v3194_v29 = vadd.f32 %v8514_v36, %v8344_v22 }
 0x650   : > { %9458 = vst [vmem:[#allocation15_spill] sm:$0xff] %v8673_v56  ;;  %v8677_v27 = vpop.f32.mrb[215].mxu1  ;;  %v8679_v42 = vpop.f32.mrb[247].mxu0  ;;  %6471 = vrcp.f32 %v4581_v39  ;;  %v4582_v16 = vadd.f32 1.0, %v6450_v45  ;;  %v3385_v56 = vadd.f32 %v8509_v3, %v8341_v7  ;;  %v3924_v39 = vsub.f32 0.0, %v3383_v10 }
 0x651   : > { %9459 = vst [vmem:[#allocation16_spill] sm:$0xff] %v8679_v42  ;;  %v6452_v57 = vpop.eup %6451  ;;  %6473 = vrcp.f32 %v4580_v62  ;;  %v4235_v42 = vmul.f32 1.442695, %v3917_v30  ;;  %v3387_v34 = vadd.f32 %v8517_v0, %v8347_v54  ;;  %v4243_v3 = vmul.f32 1.442695, %v3921_v58  ;;  %v8693_v30 = vpop.f32.mrb[216].mxu1 }
 0x652   : > { %v6454_v8 = vpop.eup %6453  ;;  %5009 = vst [vmem:[%s8398_s23 + $0x210] sm:$0xff] %v6452_v57  ;;  %6475 = vrcp.f32 %v4582_v16  ;;  %v3928_v62 = vsub.f32 0.0, %v3192_v37  ;;  %v4247_v36 = vmul.f32 1.442695, %v3923_v19  ;;  %v8695_v10 = vpop.f32.mrb[248].mxu0  ;;  %v3929_v58 = vsub.f32 0.0, %v3194_v29 }
 0x653   : > { %v6456_v26 = vpop.eup %6455  ;;  %5013 = vst [vmem:[%s8398_s23 + $0x230] sm:$0xff] %v6454_v8  ;;  %6477 = vpow2.f32 %v4229_v41  ;;  %v3930_v8 = vsub.f32 0.0, %v3385_v56  ;;  %v4245_v41 = vmul.f32 1.442695, %v3922_v60  ;;  %v8698_v37 = vpop.f32.mrb[217].mxu1  ;;  %v3931_v56 = vsub.f32 0.0, %v3387_v34 }
 0x654   : > { %v6458_v45 = vpop.eup %6457  ;;  %5015 = vst [vmem:[%s8398_s23 + $0x240] sm:$0xff] %v6456_v26  ;;  %6479 = vpow2.f32 %v4233_v31  ;;  %v8700_v57 = vpop.f32.mrb[249].mxu0  ;;  %v4249_v31 = vmul.f32 1.442695, %v3924_v39  ;;  %v3935_v60 = vsub.f32 0.0, %v3198_v40 }
 0x655   : > { %v6460_v38 = vpop.eup %6459  ;;  %5014 = vst [vmem:[%s8398_s23 + $0x238] sm:$0xff] %v6458_v45  ;;  %6481 = vpow2.f32 %v4231_v35  ;;  %v8703_v16 = vpop.f32.mrb[218].mxu1  ;;  %v4257_v35 = vmul.f32 1.442695, %v3928_v62  ;;  %v4259_v34 = vmul.f32 1.442695, %v3929_v58 }
 0x656   : > { %v6462_v0 = vpop.eup %6461  ;;  %5016 = vst [vmem:[%s8398_s23 + $0x248] sm:$0xff] %v6460_v38  ;;  %6483 = vpow2.f32 %v4235_v42  ;;  %v8705_v19 = vpop.f32.mrb[250].mxu0  ;;  %v4261_v42 = vmul.f32 1.442695, %v3930_v8  ;;  %v4271_v40 = vmul.f32 1.442695, %v3935_v60 }
 0x657   : > { %v6464_v46 = vpop.eup %6463  ;;  %5020 = vst [vmem:[%s8398_s23 + $0x268] sm:$0xff] %v6462_v0  ;;  %6485 = vpow2.f32 %v4243_v3  ;;  %v8708_v29 = vpop.f32.mrb[219].mxu1  ;;  %v4263_v3 = vmul.f32 1.442695, %v3931_v56 }
 0x658   : > { %v6466_v26 = vpop.eup %6465  ;;  %5022 = vst [vmem:[%s8398_s23 + $0x278] sm:$0xff] %v6464_v46  ;;  %v8710_v45 = vpop.f32.mrb[251].mxu0  ;;  %6487 = vpow2.f32 %v4247_v36 }
 0x659   : > { %v6468_v38 = vpop.eup %6467  ;;  %5021 = vst [vmem:[%s8398_s23 + $0x270] sm:$0xff] %v6466_v26  ;;  %6489 = vpow2.f32 %v4245_v41  ;;  %v8717_v26 = vpop.f32.mrb[220].mxu1 }
 0x65a   : > { %v6470_v39 = vpop.eup %6469  ;;  %5023 = vst [vmem:[%s8398_s23 + $0x280] sm:$0xff] %v6468_v38  ;;  %6491 = vpow2.f32 %v4249_v31  ;;  %v8719_v36 = vpop.f32.mrb[252].mxu0 }
 0x65b   : > { %v6472_v0 = vpop.eup %6471  ;;  %5027 = vst [vmem:[%s8398_s23 + $0x2a0] sm:$0xff] %v6470_v39  ;;  %6493 = vpow2.f32 %v4257_v35  ;;  %v8722_v41 = vpop.f32.mrb[221].mxu1  ;;  %v3391_v35 = vadd.f32 %v8525_v51, %v8341_v7 }
 0x65c   : > { %v6474_v62 = vpop.eup %6473  ;;  %5029 = vst [vmem:[%s8398_s23 + $0x2b0] sm:$0xff] %v6472_v0  ;;  %6495 = vpow2.f32 %v4261_v42  ;;  %9460 = vst [vmem:[#allocation17_spill] sm:$0xff] %v8722_v41  ;;  %v8724_v58 = vpop.f32.mrb[253].mxu0 }
 0x65d   : > { %v6476_v46 = vpop.eup %6475  ;;  %5028 = vst [vmem:[%s8398_s23 + $0x2a8] sm:$0xff] %v6474_v62  ;;  %6497 = vpow2.f32 %v4259_v34  ;;  %9461 = vst [vmem:[#allocation18_spill] sm:$0xff] %v8724_v58  ;;  %v8728_v60 = vpop.f32.mrb[222].mxu1  ;;  %v3200_v34 = vadd.f32 %v8528_v2, %v8344_v22 }
 0x65e   : > { %v6478_v8 = vpop.eup %6477  ;;  %5030 = vst [vmem:[%s8398_s23 + $0x2b8] sm:$0xff] %v6476_v46  ;;  %6499 = vpow2.f32 %v4263_v3  ;;  %9462 = vst [vmem:[#allocation19_spill] sm:$0xff] %v8728_v60  ;;  %v8730_v38 = vpop.f32.mrb[254].mxu0  ;;  %v3393_v60 = vadd.f32 %v8531_v6, %v8347_v54 }
 0x65f   : > { %v6480_v31 = vpop.eup %6479  ;;  %v4586_v56 = vadd.f32 1.0, %v6478_v8  ;;  %9463 = vst [vmem:[#allocation20_spill] sm:$0xff] %v8730_v38  ;;  %6501 = vpow2.f32 %v4271_v40  ;;  %v8734_v0 = vpop.f32.mrb[223].mxu1  ;;  %v3937_v40 = vsub.f32 0.0, %v3391_v35  ;;  %v3936_v41 = vsub.f32 0.0, %v3200_v34 }
 0x660   : > { %v6482_v42 = vpop.eup %6481  ;;  %v4588_v39 = vadd.f32 1.0, %v6480_v31  ;;  %9464 = vst [vmem:[#allocation21_spill] sm:$0xff] %v8734_v0  ;;  %v8736_v62 = vpop.f32.mrb[255].mxu0  ;;  %v3395_v35 = vadd.f32 %v8536_v13, %v8341_v7 }
 0x661   : > { %9465 = vst [vmem:[#allocation22_spill] sm:$0xff] %v8736_v62  ;;  %v6484_v46 = vpop.eup %6483  ;;  %6503 = vrcp.f32 %v4586_v56  ;;  %v4587_v3 = vadd.f32 1.0, %v6482_v42  ;;  %v3202_v56 = vadd.f32 %v8533_v33, %v8338_v61  ;;  %v8742_v42 = vpop.f32.mrb[224].mxu1  ;;  %v3204_v33 = vadd.f32 %v8538_v12, %v8344_v22 }
 0x662   : > { %v6486_v8 = vpop.eup %6485  ;;  %6505 = vrcp.f32 %v4588_v39  ;;  %v4589_v51 = vadd.f32 1.0, %v6484_v46  ;;  %v8744_v39 = vpop.f32.mrb[0].mxu0 }
 0x663   : > { %v6488_v38 = vpop.eup %6487  ;;  %6507 = vrcp.f32 %v4587_v3  ;;  %v4593_v31 = vadd.f32 1.0, %v6486_v8  ;;  %9466 = vst [vmem:[#allocation23_spill] sm:$0xff] %v8744_v39  ;;  %v3938_v3 = vsub.f32 0.0, %v3393_v60  ;;  %v8748_v8 = vpop.f32.mrb[225].mxu1  ;;  %v4273_v39 = vmul.f32 1.442695, %v3936_v41 }
 0x664   : > { %v6490_v58 = vpop.eup %6489  ;;  %6509 = vrcp.f32 %v4589_v51  ;;  %v4595_v2 = vadd.f32 1.0, %v6488_v38  ;;  %9467 = vst [vmem:[#allocation24_spill] sm:$0xff] %v8748_v8  ;;  %v3942_v13 = vsub.f32 0.0, %v3202_v56  ;;  %v3944_v8 = vsub.f32 0.0, %v3395_v35 }
 0x665   : > { %v6492_v0 = vpop.eup %6491  ;;  %6511 = vrcp.f32 %v4593_v31  ;;  %v4594_v62 = vadd.f32 1.0, %v6490_v58  ;;  %v4275_v58 = vmul.f32 1.442695, %v3937_v40  ;;  %v3401_v41 = vadd.f32 %v8548_v49, %v8341_v7 }
 0x666   : > { %v6494_v46 = vpop.eup %6493  ;;  %6513 = vrcp.f32 %v4595_v2  ;;  %v4596_v6 = vadd.f32 1.0, %v6492_v0  ;;  %v3397_v0 = vadd.f32 %v8541_v24, %v8347_v54  ;;  %v3210_v56 = vadd.f32 %v8552_v5, %v8344_v22 }
 0x667   : > { %v6496_v38 = vpop.eup %6495  ;;  %6515 = vrcp.f32 %v4594_v62  ;;  %v4600_v34 = vadd.f32 1.0, %v6494_v46  ;;  %v3208_v62 = vadd.f32 %v8546_v44, %v8338_v61  ;;  %v8756_v46 = vpop.f32.mrb[1].mxu0  ;;  %v4277_v35 = vmul.f32 1.442695, %v3938_v3 }
 0x668   : > { %v6498_v51 = vpop.eup %6497  ;;  %6517 = vrcp.f32 %v4596_v6  ;;  %v4602_v31 = vadd.f32 1.0, %v6496_v38  ;;  %v3943_v38 = vsub.f32 0.0, %v3204_v33  ;;  %v8764_v44 = vpop.f32.mrb[2].mxu0  ;;  %v3403_v49 = vadd.f32 %v8554_v47, %v8347_v54 }
 0x669   : > { %v6500_v60 = vpop.eup %6499  ;;  %6519 = vrcp.f32 %v4600_v34  ;;  %v4601_v2 = vadd.f32 1.0, %v6498_v51  ;;  %v8762_v34 = vpop.f32.mrb[226].mxu1  ;;  %9468 = vst [vmem:[#allocation25_spill] sm:$0xff] %v8764_v44  ;;  %v4285_v33 = vmul.f32 1.442695, %v3942_v13  ;;  %v3212_v5 = vadd.f32 %v8558_v63, %v8338_v61 }
 0x66a   : > { %v6502_v40 = vpop.eup %6501  ;;  %6521 = vrcp.f32 %v4602_v31  ;;  %v4603_v12 = vadd.f32 1.0, %v6500_v60  ;;  %v3945_v31 = vsub.f32 0.0, %v3397_v0  ;;  %v8774_v44 = vpop.f32.mrb[3].mxu0  ;;  %v4289_v3 = vmul.f32 1.442695, %v3944_v8 }
 0x66b   : > { %v6504_v6 = vpop.eup %6503  ;;  %6523 = vrcp.f32 %v4601_v2  ;;  %v4607_v24 = vadd.f32 1.0, %v6502_v40  ;;  %v3949_v2 = vsub.f32 0.0, %v3208_v62  ;;  %v8772_v40 = vpop.f32.mrb[227].mxu1  ;;  %v3951_v47 = vsub.f32 0.0, %v3401_v41 }
 0x66c   : > { %v6506_v51 = vpop.eup %6505  ;;  %5034 = vst [vmem:[%s8398_s23 + $0x2d8] sm:$0xff] %v6504_v6  ;;  %6525 = vrcp.f32 %v4603_v12  ;;  %v3405_v0 = vadd.f32 %v8560_v20, %v8341_v7  ;;  %v4287_v13 = vmul.f32 1.442695, %v3943_v38  ;;  %v3950_v62 = vsub.f32 0.0, %v3210_v56 }
 0x66d   : > { %v6508_v60 = vpop.eup %6507  ;;  %5036 = vst [vmem:[%s8398_s23 + $0x2e8] sm:$0xff] %v6506_v51  ;;  %6527 = vrcp.f32 %v4607_v24  ;;  %v4291_v24 = vmul.f32 1.442695, %v3945_v31  ;;  %v3952_v51 = vsub.f32 0.0, %v3403_v49  ;;  %v4299_v8 = vmul.f32 1.442695, %v3949_v2 }
 0x66e   : > { %v6510_v12 = vpop.eup %6509  ;;  %5035 = vst [vmem:[%s8398_s23 + $0x2e0] sm:$0xff] %v6508_v60  ;;  %6529 = vpow2.f32 %v4275_v58  ;;  %v3956_v58 = vsub.f32 0.0, %v3212_v5  ;;  %v4303_v20 = vmul.f32 1.442695, %v3951_v47  ;;  %v4301_v56 = vmul.f32 1.442695, %v3950_v62 }
 0x66f   : > { %v6512_v6 = vpop.eup %6511  ;;  %5037 = vst [vmem:[%s8398_s23 + $0x2f0] sm:$0xff] %v6510_v12  ;;  %6531 = vpow2.f32 %v4273_v39  ;;  %v3958_v39 = vsub.f32 0.0, %v3405_v0  ;;  %v8786_v31 = vpop.f32.mrb[4].mxu0 }
 0x670   : > { %v6514_v63 = vpop.eup %6513  ;;  %5041 = vst [vmem:[%s8398_s23 + $0x310] sm:$0xff] %v6512_v6  ;;  %6533 = vpow2.f32 %v4277_v35  ;;  %v8784_v35 = vpop.f32.mrb[228].mxu1 }
 0x671   : > { %v6516_v60 = vpop.eup %6515  ;;  %5043 = vst [vmem:[%s8398_s23 + $0x320] sm:$0xff] %v6514_v63  ;;  %6535 = vpow2.f32 %v4285_v33  ;;  %v4305_v33 = vmul.f32 1.442695, %v3952_v51  ;;  %v8789_v2 = vpop.f32.mrb[229].mxu1 }
 0x672   : > { %v6518_v41 = vpop.eup %6517  ;;  %5042 = vst [vmem:[%s8398_s23 + $0x318] sm:$0xff] %v6516_v60  ;;  %6537 = vpow2.f32 %v4289_v3  ;;  %v8791_v5 = vpop.f32.mrb[5].mxu0  ;;  %v4313_v3 = vmul.f32 1.442695, %v3956_v58  ;;  %v3214_v60 = vadd.f32 %v8564_v11, %v8344_v22 }
 0x673   : > { %v6520_v38 = vpop.eup %6519  ;;  %5044 = vst [vmem:[%s8398_s23 + $0x328] sm:$0xff] %v6518_v41  ;;  %6539 = vpow2.f32 %v4287_v13  ;;  %v8794_v47 = vpop.f32.mrb[230].mxu1  ;;  %v4317_v13 = vmul.f32 1.442695, %v3958_v39  ;;  %v3407_v41 = vadd.f32 %v8566_v53, %v8347_v54  ;;  %v3218_v53 = vadd.f32 %v8576_v21, %v8338_v61 }
 0x674   : > { %v6522_v49 = vpop.eup %6521  ;;  %5048 = vst [vmem:[%s8398_s23 + $0x348] sm:$0xff] %v6520_v38  ;;  %6541 = vpow2.f32 %v4291_v24  ;;  %v8796_v0 = vpop.f32.mrb[6].mxu0  ;;  %v3413_v21 = vadd.f32 %v8584_v17, %v8347_v54 }
 0x675   : > { %v6524_v12 = vpop.eup %6523  ;;  %5050 = vst [vmem:[%s8398_s23 + $0x358] sm:$0xff] %v6522_v49  ;;  %6543 = vpow2.f32 %v4299_v8  ;;  %v8799_v62 = vpop.f32.mrb[231].mxu1  ;;  %v3959_v11 = vsub.f32 0.0, %v3407_v41 }
 0x676   : > { %v6526_v6 = vpop.eup %6525  ;;  %5049 = vst [vmem:[%s8398_s23 + $0x350] sm:$0xff] %v6524_v12  ;;  %6545 = vpow2.f32 %v4303_v20  ;;  %v8801_v63 = vpop.f32.mrb[7].mxu0 }
 0x677   : > { %9469 = vst [vmem:[#allocation26_spill] sm:$0xff] %v8801_v63  ;;  %v6528_v24 = vpop.eup %6527  ;;  %5051 = vst [vmem:[%s8398_s23 + $0x360] sm:$0xff] %v6526_v6  ;;  %6547 = vpow2.f32 %v4301_v56  ;;  %v3957_v6 = vsub.f32 0.0, %v3214_v60 }
 0x678   : > { %v6530_v51 = vpop.eup %6529  ;;  %5055 = vst [vmem:[%s8398_s23 + $0x380] sm:$0xff] %v6528_v24  ;;  %6549 = vpow2.f32 %v4305_v33 }
 0x679   : > { %v6532_v8 = vpop.eup %6531  ;;  %v4609_v58 = vadd.f32 1.0, %v6530_v51  ;;  %6551 = vpow2.f32 %v4313_v3  ;;  %v4315_v60 = vmul.f32 1.442695, %v3957_v6 }
 0x67a   : > { %v6534_v20 = vpop.eup %6533  ;;  %v4608_v39 = vadd.f32 1.0, %v6532_v8  ;;  %6553 = vpow2.f32 %v4317_v13  ;;  %v3411_v8 = vadd.f32 %v8578_v14, %v8341_v7  ;;  %v3222_v14 = vadd.f32 %v8588_v43, %v8338_v61 }
 0x67b   : > { %v6536_v38 = vpop.eup %6535  ;;  %6555 = vrcp.f32 %v4609_v58  ;;  %v4610_v49 = vadd.f32 1.0, %v6534_v20  ;;  %v3966_v43 = vsub.f32 0.0, %v3413_v21  ;;  %v3421_v21 = vadd.f32 %v8610_v1, %v8341_v7 }
 0x67c   : > { %v6538_v12 = vpop.eup %6537  ;;  %6557 = vrcp.f32 %v4608_v39  ;;  %v4614_v56 = vadd.f32 1.0, %v6536_v38  ;;  %v3220_v39 = vadd.f32 %v8582_v25, %v8344_v22  ;;  %v3415_v25 = vadd.f32 %v8590_v52, %v8341_v7 }
 0x67d   : > { %v6540_v33 = vpop.eup %6539  ;;  %6559 = vrcp.f32 %v4610_v49  ;;  %v4616_v24 = vadd.f32 1.0, %v6538_v12  ;;  %v4319_v49 = vmul.f32 1.442695, %v3959_v11 }
 0x67e   : > { %v6542_v63 = vpop.eup %6541  ;;  %6561 = vrcp.f32 %v4614_v56  ;;  %v4615_v3 = vadd.f32 1.0, %v6540_v33  ;;  %v3963_v56 = vsub.f32 0.0, %v3218_v53  ;;  %v3964_v17 = vsub.f32 0.0, %v3220_v39 }
 0x67f   : > { %v6544_v51 = vpop.eup %6543  ;;  %6563 = vrcp.f32 %v4616_v24  ;;  %v4617_v13 = vadd.f32 1.0, %v6542_v63  ;;  %v3965_v24 = vsub.f32 0.0, %v3411_v8 }
 0x680   : > { %v6546_v58 = vpop.eup %6545  ;;  %6565 = vrcp.f32 %v4615_v3  ;;  %v4621_v20 = vadd.f32 1.0, %v6544_v51  ;;  %v3224_v51 = vadd.f32 %v8595_v9, %v8344_v22  ;;  %v4327_v52 = vmul.f32 1.442695, %v3963_v56 }
 0x681   : > { %v6548_v41 = vpop.eup %6547  ;;  %6567 = vrcp.f32 %v4617_v13  ;;  %v4623_v38 = vadd.f32 1.0, %v6546_v58  ;;  %v3417_v58 = vadd.f32 %v8597_v48, %v8347_v54  ;;  %v4331_v9 = vmul.f32 1.442695, %v3965_v24 }
 0x682   : > { %v6550_v12 = vpop.eup %6549  ;;  %6569 = vrcp.f32 %v4621_v20  ;;  %v4622_v63 = vadd.f32 1.0, %v6548_v41  ;;  %v3970_v20 = vsub.f32 0.0, %v3222_v14  ;;  %v3228_v41 = vadd.f32 %v8608_v18, %v8338_v61  ;;  %v8834_v14 = vpop.f32.mrb[232].mxu1 }
 0x683   : > { %v6552_v33 = vpop.eup %6551  ;;  %6571 = vrcp.f32 %v4623_v38  ;;  %v4624_v6 = vadd.f32 1.0, %v6550_v12  ;;  %v3972_v38 = vsub.f32 0.0, %v3415_v25  ;;  %v4329_v48 = vmul.f32 1.442695, %v3964_v17  ;;  %v8836_v18 = vpop.f32.mrb[8].mxu0 }
 0x684   : > { %v6554_v3 = vpop.eup %6553  ;;  %6573 = vrcp.f32 %v4622_v63  ;;  %v4628_v11 = vadd.f32 1.0, %v6552_v33  ;;  %v3971_v63 = vsub.f32 0.0, %v3224_v51  ;;  %v3230_v56 = vadd.f32 %v8613_v4, %v8344_v22  ;;  %v8839_v1 = vpop.f32.mrb[233].mxu1 }
 0x685   : > { %v6556_v53 = vpop.eup %6555  ;;  %6575 = vrcp.f32 %v4624_v6  ;;  %v4630_v13 = vadd.f32 1.0, %v6554_v3  ;;  %v4333_v6 = vmul.f32 1.442695, %v3966_v43  ;;  %v3973_v24 = vsub.f32 0.0, %v3417_v58  ;;  %v8841_v25 = vpop.f32.mrb[9].mxu0 }
 0x686   : > { %v6558_v8 = vpop.eup %6557  ;;  %5057 = vst [vmem:[%s8398_s23 + $0x390] sm:$0xff] %v6556_v53  ;;  %6577 = vrcp.f32 %v4628_v11  ;;  %v4341_v3 = vmul.f32 1.442695, %v3970_v20  ;;  %v3977_v4 = vsub.f32 0.0, %v3228_v41  ;;  %v8844_v11 = vpop.f32.mrb[234].mxu1  ;;  %v3979_v53 = vsub.f32 0.0, %v3421_v21 }
 0x687   : > { %v6560_v39 = vpop.eup %6559  ;;  %5056 = vst [vmem:[%s8398_s23 + $0x388] sm:$0xff] %v6558_v8  ;;  %6579 = vrcp.f32 %v4630_v13  ;;  %v8846_v17 = vpop.f32.mrb[10].mxu0  ;;  %v4343_v8 = vmul.f32 1.442695, %v3971_v63  ;;  %v4347_v41 = vmul.f32 1.442695, %v3973_v24 }
 0x688   : > { %v6562_v12 = vpop.eup %6561  ;;  %5058 = vst [vmem:[%s8398_s23 + $0x398] sm:$0xff] %v6560_v39  ;;  %6581 = vpow2.f32 %v4315_v60  ;;  %v8849_v13 = vpop.f32.mrb[235].mxu1  ;;  %v4359_v21 = vmul.f32 1.442695, %v3979_v53 }
 0x689   : > { %v6564_v33 = vpop.eup %6563  ;;  %5062 = vst [vmem:[%s8398_s23 + $0x3b8] sm:$0xff] %v6562_v12  ;;  %6583 = vpow2.f32 %v4319_v49  ;;  %v4345_v49 = vmul.f32 1.442695, %v3972_v38  ;;  %v8851_v43 = vpop.f32.mrb[11].mxu0 }
 0x68a   : > { %v6566_v60 = vpop.eup %6565  ;;  %5064 = vst [vmem:[%s8398_s23 + $0x3c8] sm:$0xff] %v6564_v33  ;;  %6585 = vpow2.f32 %v4327_v52  ;;  %v3978_v52 = vsub.f32 0.0, %v3230_v56  ;;  %v8858_v63 = vpop.f32.mrb[236].mxu1 }
 0x68b   : > { %v6568_v51 = vpop.eup %6567  ;;  %5063 = vst [vmem:[%s8398_s23 + $0x3c0] sm:$0xff] %v6566_v60  ;;  %6587 = vpow2.f32 %v4331_v9  ;;  %v4355_v9 = vmul.f32 1.442695, %v3977_v4  ;;  %v8860_v56 = vpop.f32.mrb[12].mxu0 }
 0x68c   : > { %v6570_v58 = vpop.eup %6569  ;;  %5065 = vst [vmem:[%s8398_s23 + $0x3d0] sm:$0xff] %v6568_v51  ;;  %6589 = vpow2.f32 %v4329_v48  ;;  %v4357_v48 = vmul.f32 1.442695, %v3978_v52  ;;  %v8865_v24 = vpop.f32.mrb[13].mxu0 }
 0x68d   : > { %v6572_v20 = vpop.eup %6571  ;;  %5069 = vst [vmem:[%s8398_s23 + $0x3f0] sm:$0xff] %v6570_v58  ;;  %6591 = vpow2.f32 %v4333_v6  ;;  %v8863_v6 = vpop.f32.mrb[237].mxu1  ;;  %9470 = vst [vmem:[#allocation27_spill] sm:$0xff] %v8865_v24 }
 0x68e   : > { %v6574_v39 = vpop.eup %6573  ;;  %5071 = vst [vmem:[%s8398_s23 + $0x400] sm:$0xff] %v6572_v20  ;;  %6593 = vpow2.f32 %v4341_v3  ;;  %v8868_v3 = vpop.f32.mrb[238].mxu1 }
 0x68f   : > { %v6576_v38 = vpop.eup %6575  ;;  %5070 = vst [vmem:[%s8398_s23 + $0x3f8] sm:$0xff] %v6574_v39  ;;  %6595 = vpow2.f32 %v4345_v49  ;;  %9471 = vst [vmem:[#allocation28_spill] sm:$0xff] %v8868_v3  ;;  %v3423_v49 = vadd.f32 %v8615_v50, %v8347_v54  ;;  %v8892_v24 = vpop.f32.mrb[239].mxu1 }
 0x690   : > { %v6578_v12 = vpop.eup %6577  ;;  %5072 = vst [vmem:[%s8398_s23 + $0x408] sm:$0xff] %v6576_v38  ;;  %6597 = vpow2.f32 %v4343_v8  ;;  %v3232_v8 = vadd.f32 %v8618_v28, %v8338_v61 }
 0x691   : > { %v6580_v33 = vpop.eup %6579  ;;  %5076 = vst [vmem:[%s8398_s23 + $0x428] sm:$0xff] %v6578_v12  ;;  %6599 = vpow2.f32 %v4347_v41  ;;  %v3980_v12 = vsub.f32 0.0, %v3423_v49 }
 0x692   : > { %v6582_v60 = vpop.eup %6581  ;;  %5078 = vst [vmem:[%s8398_s23 + $0x438] sm:$0xff] %v6580_v33  ;;  %6601 = vpow2.f32 %v4355_v9  ;;  %v3425_v9 = vadd.f32 %v8620_v15, %v8341_v7  ;;  %v3427_v15 = vadd.f32 %v8625_v59, %v8347_v54  ;;  %v9474_v59 = vld [vmem:[#allocation6_spill] sm:$0xff] }
 0x693   : > { %v6584_v4 = vpop.eup %6583  ;;  %v4629_v51 = vadd.f32 1.0, %v6582_v60  ;;  %6603 = vpow2.f32 %v4359_v21 }
 0x694   : > { %v6586_v53 = vpop.eup %6585  ;;  %v4631_v58 = vadd.f32 1.0, %v6584_v4  ;;  %6605 = vpow2.f32 %v4357_v48  ;;  %v3984_v48 = vsub.f32 0.0, %v3232_v8  ;;  %v3234_v4 = vadd.f32 %v8623_v23, %v8344_v22  ;;  %v9473_v23 = vld [vmem:[#allocation5_spill] sm:$0xff] }
 0x695   : > { %v6588_v52 = vpop.eup %6587  ;;  %6607 = vrcp.f32 %v4629_v51  ;;  %v4635_v20 = vadd.f32 1.0, %v6586_v53  ;;  %v3987_v3 = vsub.f32 0.0, %v3427_v15  ;;  %9478 = vst [vmem:[#allocation5_spill] sm:$0xff] %v8892_v24 }
 0x696   : > { %v6590_v41 = vpop.eup %6589  ;;  %6609 = vrcp.f32 %v4631_v58  ;;  %v4637_v39 = vadd.f32 1.0, %v6588_v52  ;;  %v3986_v58 = vsub.f32 0.0, %v3425_v9 }
 0x697   : > { %v6592_v38 = vpop.eup %6591  ;;  %6611 = vrcp.f32 %v4635_v20  ;;  %v4636_v21 = vadd.f32 1.0, %v6590_v41  ;;  %v4361_v20 = vmul.f32 1.442695, %v3980_v12  ;;  %v9472_v41 = vld [vmem:[#allocation4_spill] sm:$0xff] }
 0x698   : > { %v6594_v50 = vpop.eup %6593  ;;  %6613 = vrcp.f32 %v4637_v39  ;;  %v4638_v33 = vadd.f32 1.0, %v6592_v38  ;;  %v3238_v8 = vadd.f32 %v9472_v41, %v8338_v61  ;;  %v4373_v15 = vmul.f32 1.442695, %v3986_v58 }
 0x699   : > { %v6596_v60 = vpop.eup %6595  ;;  %6615 = vrcp.f32 %v4636_v21  ;;  %v4642_v28 = vadd.f32 1.0, %v6594_v50  ;;  %v4369_v21 = vmul.f32 1.442695, %v3984_v48  ;;  %v3431_v50 = vadd.f32 %v9473_v23, %v8341_v7 }
 0x69a   : > { %v6598_v51 = vpop.eup %6597  ;;  %6617 = vrcp.f32 %v4638_v33  ;;  %v4644_v53 = vadd.f32 1.0, %v6596_v60  ;;  %v3985_v60 = vsub.f32 0.0, %v3234_v4  ;;  %v9477_v4 = vld [vmem:[#allocation8_spill] sm:$0xff] }
 0x69b   : > { %v6600_v52 = vpop.eup %6599  ;;  %6619 = vrcp.f32 %v4642_v28  ;;  %v4643_v49 = vadd.f32 1.0, %v6598_v51  ;;  %v3240_v28 = vadd.f32 %v9474_v59, %v8344_v22  ;;  %v8886_v51 = vpop.f32.mrb[14].mxu0 }
 0x69c   : > { %v6602_v39 = vpop.eup %6601  ;;  %6621 = vrcp.f32 %v4644_v53  ;;  %v4645_v38 = vadd.f32 1.0, %v6600_v52  ;;  %9475 = vst [vmem:[#allocation4_spill] sm:$0xff] %v8886_v51  ;;  %v9476_v53 = vld [vmem:[#allocation7_spill] sm:$0xff]  ;;  %v8894_v59 = vpop.f32.mrb[15].mxu0 }
 0x69d   : > { %v6604_v33 = vpop.eup %6603  ;;  %6623 = vrcp.f32 %v4643_v49  ;;  %v4649_v9 = vadd.f32 1.0, %v6602_v39  ;;  %v3433_v48 = vadd.f32 %v9476_v53, %v8347_v54  ;;  %v3991_v49 = vsub.f32 0.0, %v3238_v8  ;;  %9479 = vst [vmem:[#allocation6_spill] sm:$0xff] %v8894_v59 }
 0x69e   : > { %v6606_v12 = vpop.eup %6605  ;;  %6625 = vrcp.f32 %v4645_v38  ;;  %v4651_v41 = vadd.f32 1.0, %v6604_v33  ;;  %v3242_v39 = vadd.f32 %v9477_v4, %v8338_v61  ;;  %v3993_v38 = vsub.f32 0.0, %v3431_v50  ;;  %v9480_v33 = vld [vmem:[#allocation9_spill] sm:$0xff]  ;;  %v9481_v50 = vld [vmem:[#allocation10_spill] sm:$0xff] }
 0x69f   : > { %v6608_v52 = vpop.eup %6607  ;;  %6627 = vrcp.f32 %v4649_v9  ;;  %v4650_v23 = vadd.f32 1.0, %v6606_v12  ;;  %v3435_v53 = vadd.f32 %v9480_v33, %v8341_v7  ;;  %v4371_v8 = vmul.f32 1.442695, %v3985_v60 }
 0x6a0   : > { %v6610_v51 = vpop.eup %6609  ;;  %5077 = vst [vmem:[%s8398_s23 + $0x430] sm:$0xff] %v6608_v52  ;;  %6629 = vrcp.f32 %v4651_v41  ;;  %v3992_v12 = vsub.f32 0.0, %v3240_v28  ;;  %v3244_v4 = vadd.f32 %v8647_v55, %v8344_v22  ;;  %v4375_v41 = vmul.f32 1.442695, %v3987_v3 }
 0x6a1   : > { %v6612_v9 = vpop.eup %6611  ;;  %5079 = vst [vmem:[%s8398_s23 + $0x440] sm:$0xff] %v6610_v51  ;;  %6631 = vrcp.f32 %v4650_v23  ;;  %v3994_v58 = vsub.f32 0.0, %v3433_v48  ;;  %v3437_v52 = vadd.f32 %v9481_v50, %v8347_v54  ;;  %v4383_v51 = vmul.f32 1.442695, %v3991_v49  ;;  %v8908_v48 = vpop.f32.mrb[240].mxu1 }
 0x6a2   : > { %v6614_v24 = vpop.eup %6613  ;;  %5083 = vst [vmem:[%s8398_s23 + $0x460] sm:$0xff] %v6612_v9  ;;  %6633 = vpow2.f32 %v4361_v20  ;;  %v3998_v23 = vsub.f32 0.0, %v3242_v39  ;;  %v4387_v28 = vmul.f32 1.442695, %v3993_v38  ;;  %v4000_v55 = vsub.f32 0.0, %v3435_v53  ;;  %v8910_v9 = vpop.f32.mrb[16].mxu0 }
 0x6a3   : > { %v6616_v59 = vpop.eup %6615  ;;  %5085 = vst [vmem:[%s8398_s23 + $0x470] sm:$0xff] %v6614_v24  ;;  %6635 = vpow2.f32 %v4369_v21  ;;  %v4385_v3 = vmul.f32 1.442695, %v3992_v12  ;;  %v3999_v20 = vsub.f32 0.0, %v3244_v4  ;;  %v4389_v21 = vmul.f32 1.442695, %v3994_v58 }
 0x6a4   : > { %v6618_v60 = vpop.eup %6617  ;;  %5084 = vst [vmem:[%s8398_s23 + $0x468] sm:$0xff] %v6616_v59  ;;  %6637 = vpow2.f32 %v4373_v15  ;;  %v4001_v49 = vsub.f32 0.0, %v3437_v52  ;;  %v8913_v39 = vpop.f32.mrb[241].mxu1  ;;  %v4397_v38 = vmul.f32 1.442695, %v3998_v23 }
 0x6a5   : > { %v6620_v33 = vpop.eup %6619  ;;  %5086 = vst [vmem:[%s8398_s23 + $0x478] sm:$0xff] %v6618_v60  ;;  %6639 = vpow2.f32 %v4371_v8  ;;  %v8915_v59 = vpop.f32.mrb[17].mxu0  ;;  %v4401_v4 = vmul.f32 1.442695, %v4000_v55  ;;  %v4399_v52 = vmul.f32 1.442695, %v3999_v20 }
 0x6a6   : > { %v6622_v24 = vpop.eup %6621  ;;  %5090 = vst [vmem:[%s8398_s23 + $0x498] sm:$0xff] %v6620_v33  ;;  %6641 = vpow2.f32 %v4375_v41  ;;  %v8918_v53 = vpop.f32.mrb[242].mxu1  ;;  %v4403_v23 = vmul.f32 1.442695, %v4001_v49 }
 0x6a7   : > { %v6624_v15 = vpop.eup %6623  ;;  %5092 = vst [vmem:[%s8398_s23 + $0x4a8] sm:$0xff] %v6622_v24  ;;  %6643 = vpow2.f32 %v4383_v51  ;;  %9482 = vst [vmem:[#allocation7_spill] sm:$0xff] %v8918_v53  ;;  %v8920_v8 = vpop.f32.mrb[18].mxu0 }
 0x6a8   : > { %9483 = vst [vmem:[#allocation8_spill] sm:$0xff] %v8920_v8  ;;  %v6626_v12 = vpop.eup %6625  ;;  %5091 = vst [vmem:[%s8398_s23 + $0x4a0] sm:$0xff] %v6624_v15  ;;  %6645 = vpow2.f32 %v4387_v28  ;;  %v8923_v41 = vpop.f32.mrb[243].mxu1  ;;  %v3248_v28 = vadd.f32 %v8659_v32, %v8338_v61 }
 0x6a9   : > { %9484 = vst [vmem:[#allocation9_spill] sm:$0xff] %v8923_v41  ;;  %v8925_v58 = vpop.f32.mrb[19].mxu0  ;;  %v6628_v50 = vpop.eup %6627  ;;  %5093 = vst [vmem:[%s8398_s23 + $0x4b0] sm:$0xff] %v6626_v12  ;;  %6647 = vpow2.f32 %v4385_v3 }
 0x6aa   : > { %9485 = vst [vmem:[#allocation10_spill] sm:$0xff] %v8925_v58  ;;  %v6630_v51 = vpop.eup %6629  ;;  %5097 = vst [vmem:[%s8398_s23 + $0x4d0] sm:$0xff] %v6628_v50  ;;  %6649 = vpow2.f32 %v4389_v21  ;;  %v8933_v15 = vpop.f32.mrb[244].mxu1  ;;  %v9488_v21 = vld [vmem:[#allocation11_spill] sm:$0xff]  ;;  %v4005_v32 = vsub.f32 0.0, %v3248_v28 }
 0x6ab   : > { %v6632_v60 = vpop.eup %6631  ;;  %5099 = vst [vmem:[%s8398_s23 + $0x4e0] sm:$0xff] %v6630_v51  ;;  %6651 = vpow2.f32 %v4397_v38  ;;  %9486 = vst [vmem:[#allocation29_spill] sm:$0xff] %v8933_v15  ;;  %v8935_v3 = vpop.f32.mrb[20].mxu0  ;;  %v3441_v49 = vadd.f32 %v9488_v21, %v8341_v7 }
 0x6ac   : > { %v6634_v33 = vpop.eup %6633  ;;  %5098 = vst [vmem:[%s8398_s23 + $0x4d8] sm:$0xff] %v6632_v60  ;;  %6653 = vpow2.f32 %v4401_v4  ;;  %9487 = vst [vmem:[#allocation30_spill] sm:$0xff] %v8935_v3  ;;  %v4411_v28 = vmul.f32 1.442695, %v4005_v32 }
 0x6ad   : > { %v6636_v55 = vpop.eup %6635  ;;  %v4652_v24 = vadd.f32 1.0, %v6634_v33  ;;  %6655 = vpow2.f32 %v4399_v52  ;;  %v9489_v33 = vld [vmem:[#allocation12_spill] sm:$0xff] }
 0x6ae   : > { %v6638_v20 = vpop.eup %6637  ;;  %v4656_v12 = vadd.f32 1.0, %v6636_v55  ;;  %6657 = vpow2.f32 %v4403_v23  ;;  %v3250_v15 = vadd.f32 %v9489_v33, %v8344_v22  ;;  %v4007_v23 = vsub.f32 0.0, %v3441_v49 }
 0x6af   : > { %v6640_v38 = vpop.eup %6639  ;;  %6659 = vrcp.f32 %v4652_v24  ;;  %v4658_v50 = vadd.f32 1.0, %v6638_v20  ;;  %v9490_v24 = vld [vmem:[#allocation13_spill] sm:$0xff] }
 0x6b0   : > { %v6642_v4 = vpop.eup %6641  ;;  %6661 = vrcp.f32 %v4656_v12  ;;  %v4657_v51 = vadd.f32 1.0, %v6640_v38  ;;  %v3443_v20 = vadd.f32 %v9490_v24, %v8347_v54  ;;  %v9491_v38 = vld [vmem:[#allocation14_spill] sm:$0xff]  ;;  %v4006_v8 = vsub.f32 0.0, %v3250_v15 }
 0x6b1   : > { %v6644_v60 = vpop.eup %6643  ;;  %6663 = vrcp.f32 %v4658_v50  ;;  %v4659_v52 = vadd.f32 1.0, %v6642_v4  ;;  %v3252_v50 = vadd.f32 %v9491_v38, %v8338_v61  ;;  %v3254_v24 = vadd.f32 %v8677_v27, %v8344_v22  ;;  %v9493_v38 = vld [vmem:[#allocation16_spill] sm:$0xff] }
 0x6b2   : > { %v6646_v3 = vpop.eup %6645  ;;  %6665 = vrcp.f32 %v4657_v51  ;;  %v4663_v55 = vadd.f32 1.0, %v6644_v60  ;;  %v9492_v51 = vld [vmem:[#allocation15_spill] sm:$0xff]  ;;  %v4008_v32 = vsub.f32 0.0, %v3443_v20  ;;  %v3451_v20 = vadd.f32 %v8695_v10, %v8341_v7 }
 0x6b3   : > { %v6648_v58 = vpop.eup %6647  ;;  %6667 = vrcp.f32 %v4659_v52  ;;  %v4665_v21 = vadd.f32 1.0, %v6646_v3  ;;  %v3445_v49 = vadd.f32 %v9492_v51, %v8341_v7  ;;  %v4415_v52 = vmul.f32 1.442695, %v4007_v23  ;;  %v8955_v23 = vpop.f32.mrb[21].mxu0 }
 0x6b4   : > { %v6650_v41 = vpop.eup %6649  ;;  %6669 = vrcp.f32 %v4663_v55  ;;  %v4664_v12 = vadd.f32 1.0, %v6648_v58  ;;  %v4012_v53 = vsub.f32 0.0, %v3252_v50  ;;  %v4413_v50 = vmul.f32 1.442695, %v4006_v8 }
 0x6b5   : > { %v6652_v4 = vpop.eup %6651  ;;  %6671 = vrcp.f32 %v4665_v21  ;;  %v4666_v33 = vadd.f32 1.0, %v6650_v41  ;;  %v3447_v21 = vadd.f32 %v9493_v38, %v8347_v54  ;;  %v4014_v51 = vsub.f32 0.0, %v3445_v49  ;;  %v8964_v38 = vpop.f32.mrb[22].mxu0 }
 0x6b6   : > { %v6654_v60 = vpop.eup %6653  ;;  %6673 = vrcp.f32 %v4664_v12  ;;  %v4670_v3 = vadd.f32 1.0, %v6652_v4  ;;  %v3258_v12 = vadd.f32 %v8693_v30, %v8338_v61  ;;  %v8953_v4 = vpop.f32.mrb[245].mxu1  ;;  %v3260_v30 = vadd.f32 %v8698_v37, %v8344_v22  ;;  %9494 = vst [vmem:[#allocation11_spill] sm:$0xff] %v8964_v38 }
 0x6b7   : > { %v6656_v55 = vpop.eup %6655  ;;  %6675 = vrcp.f32 %v4666_v33  ;;  %v4672_v58 = vadd.f32 1.0, %v6654_v60  ;;  %v4417_v49 = vmul.f32 1.442695, %v4008_v32  ;;  %v3453_v10 = vadd.f32 %v8700_v57, %v8347_v54  ;;  %v8974_v38 = vpop.f32.mrb[23].mxu0 }
 0x6b8   : > { %v6658_v41 = vpop.eup %6657  ;;  %6677 = vrcp.f32 %v4670_v3  ;;  %v4671_v15 = vadd.f32 1.0, %v6656_v55  ;;  %v4013_v3 = vsub.f32 0.0, %v3254_v24  ;;  %v8962_v55 = vpop.f32.mrb[246].mxu1  ;;  %v4425_v8 = vmul.f32 1.442695, %v4012_v53 }
 0x6b9   : > { %v6660_v27 = vpop.eup %6659  ;;  %6679 = vrcp.f32 %v4672_v58  ;;  %v4673_v33 = vadd.f32 1.0, %v6658_v41  ;;  %v4015_v41 = vsub.f32 0.0, %v3447_v21  ;;  %v4019_v37 = vsub.f32 0.0, %v3258_v12 }
 0x6ba   : > { %v6662_v60 = vpop.eup %6661  ;;  %5100 = vst [vmem:[%s8398_s23 + $0x4e8] sm:$0xff] %v6660_v27  ;;  %6681 = vrcp.f32 %v4671_v15  ;;  %v3262_v24 = vadd.f32 %v8703_v16, %v8338_v61  ;;  %v8972_v27 = vpop.f32.mrb[247].mxu1  ;;  %v4429_v32 = vmul.f32 1.442695, %v4014_v51  ;;  %v4021_v21 = vsub.f32 0.0, %v3451_v20 }
 0x6bb   : > { %v6664_v58 = vpop.eup %6663  ;;  %5104 = vst [vmem:[%s8398_s23 + $0x508] sm:$0xff] %v6662_v60  ;;  %6683 = vrcp.f32 %v4673_v33  ;;  %v4427_v53 = vmul.f32 1.442695, %v4013_v3  ;;  %v4431_v16 = vmul.f32 1.442695, %v4015_v41  ;;  %v4022_v60 = vsub.f32 0.0, %v3453_v10 }
 0x6bc   : > { %v6666_v15 = vpop.eup %6665  ;;  %5106 = vst [vmem:[%s8398_s23 + $0x518] sm:$0xff] %v6664_v58  ;;  %6685 = vpow2.f32 %v4411_v28  ;;  %v4020_v28 = vsub.f32 0.0, %v3260_v30  ;;  %v4443_v20 = vmul.f32 1.442695, %v4021_v21  ;;  %v8982_v30 = vpop.f32.mrb[248].mxu1 }
 0x6bd   : > { %v6668_v33 = vpop.eup %6667  ;;  %5105 = vst [vmem:[%s8398_s23 + $0x510] sm:$0xff] %v6666_v15  ;;  %6687 = vpow2.f32 %v4415_v52  ;;  %v4439_v15 = vmul.f32 1.442695, %v4019_v37  ;;  %v4026_v52 = vsub.f32 0.0, %v3262_v24  ;;  %v4445_v10 = vmul.f32 1.442695, %v4022_v60 }
 0x6be   : > { %v6670_v57 = vpop.eup %6669  ;;  %5107 = vst [vmem:[%s8398_s23 + $0x520] sm:$0xff] %v6668_v33  ;;  %6689 = vpow2.f32 %v4413_v50  ;;  %v4441_v3 = vmul.f32 1.442695, %v4020_v28 }
 0x6bf   : > { %v6672_v12 = vpop.eup %6671  ;;  %5111 = vst [vmem:[%s8398_s23 + $0x540] sm:$0xff] %v6670_v57  ;;  %6691 = vpow2.f32 %v4417_v49  ;;  %v8984_v49 = vpop.f32.mrb[24].mxu0  ;;  %v4453_v33 = vmul.f32 1.442695, %v4026_v52 }
 0x6c0   : > { %v6674_v58 = vpop.eup %6673  ;;  %5113 = vst [vmem:[%s8398_s23 + $0x550] sm:$0xff] %v6672_v12  ;;  %6693 = vpow2.f32 %v4425_v8  ;;  %v8987_v8 = vpop.f32.mrb[249].mxu1 }
 0x6c1   : > { %v6676_v51 = vpop.eup %6675  ;;  %5112 = vst [vmem:[%s8398_s23 + $0x548] sm:$0xff] %v6674_v58  ;;  %6695 = vpow2.f32 %v4429_v32  ;;  %9495 = vst [vmem:[#allocation12_spill] sm:$0xff] %v8987_v8  ;;  %v8989_v37 = vpop.f32.mrb[25].mxu0  ;;  %v3455_v32 = vadd.f32 %v8705_v19, %v8341_v7 }
 0x6c2   : > { %v6678_v50 = vpop.eup %6677  ;;  %5114 = vst [vmem:[%s8398_s23 + $0x558] sm:$0xff] %v6676_v51  ;;  %6697 = vpow2.f32 %v4427_v53  ;;  %9496 = vst [vmem:[#allocation13_spill] sm:$0xff] %v8989_v37  ;;  %v8994_v21 = vpop.f32.mrb[250].mxu1 }
 0x6c3   : > { %v6680_v41 = vpop.eup %6679  ;;  %5118 = vst [vmem:[%s8398_s23 + $0x578] sm:$0xff] %v6678_v50  ;;  %6699 = vpow2.f32 %v4431_v16  ;;  %9497 = vst [vmem:[#allocation14_spill] sm:$0xff] %v8994_v21  ;;  %v8996_v57 = vpop.f32.mrb[26].mxu0  ;;  %v3264_v16 = vadd.f32 %v8708_v29, %v8344_v22  ;;  %v4028_v52 = vsub.f32 0.0, %v3455_v32 }
 0x6c4   : > { %v6682_v24 = vpop.eup %6681  ;;  %5120 = vst [vmem:[%s8398_s23 + $0x588] sm:$0xff] %v6680_v41  ;;  %6701 = vpow2.f32 %v4439_v15  ;;  %9498 = vst [vmem:[#allocation15_spill] sm:$0xff] %v8996_v57  ;;  %v8999_v28 = vpop.f32.mrb[251].mxu1 }
 0x6c5   : > { %v6684_v53 = vpop.eup %6683  ;;  %5119 = vst [vmem:[%s8398_s23 + $0x580] sm:$0xff] %v6682_v24  ;;  %6703 = vpow2.f32 %v4443_v20  ;;  %9499 = vst [vmem:[#allocation16_spill] sm:$0xff] %v8999_v28  ;;  %v3457_v20 = vadd.f32 %v8710_v45, %v8347_v54  ;;  %v4457_v32 = vmul.f32 1.442695, %v4028_v52  ;;  %v9501_v52 = vld [vmem:[#allocation17_spill] sm:$0xff] }
 0x6c6   : > { %v6686_v12 = vpop.eup %6685  ;;  %5121 = vst [vmem:[%s8398_s23 + $0x590] sm:$0xff] %v6684_v53  ;;  %6705 = vpow2.f32 %v4441_v3  ;;  %v4027_v3 = vsub.f32 0.0, %v3264_v16  ;;  %v3270_v57 = vadd.f32 %v9501_v52, %v8344_v22 }
 0x6c7   : > { %v6688_v60 = vpop.eup %6687  ;;  %v4677_v58 = vadd.f32 1.0, %v6686_v12  ;;  %6707 = vpow2.f32 %v4445_v10  ;;  %v3268_v10 = vadd.f32 %v8717_v26, %v8338_v61 }
 0x6c8   : > { %v6690_v15 = vpop.eup %6689  ;;  %v4679_v19 = vadd.f32 1.0, %v6688_v60  ;;  %6709 = vpow2.f32 %v4453_v33  ;;  %v3461_v60 = vadd.f32 %v8719_v36, %v8341_v7 }
 0x6c9   : > { %v6692_v51 = vpop.eup %6691  ;;  %6711 = vrcp.f32 %v4677_v58  ;;  %v4678_v50 = vadd.f32 1.0, %v6690_v15  ;;  %v4029_v15 = vsub.f32 0.0, %v3457_v20  ;;  %v9502_v20 = vld [vmem:[#allocation18_spill] sm:$0xff] }
 0x6ca   : > { %v6694_v41 = vpop.eup %6693  ;;  %6713 = vrcp.f32 %v4679_v19  ;;  %v4680_v24 = vadd.f32 1.0, %v6692_v51  ;;  %v9500_v19 = vld [vmem:[#allocation2_spill] sm:$0xff]  ;;  %v3463_v21 = vadd.f32 %v9502_v20, %v8347_v54 }
 0x6cb   : > { %v6696_v53 = vpop.eup %6695  ;;  %6715 = vrcp.f32 %v4678_v50  ;;  %v4684_v29 = vadd.f32 1.0, %v6694_v41  ;;  %v2946_v51 = vsub.s32 4, %v9500_v19  ;;  %v4455_v41 = vmul.f32 1.442695, %v4027_v3 }
 0x6cc   : > { %v6698_v12 = vpop.eup %6697  ;;  %6717 = vrcp.f32 %v4680_v24  ;;  %v4686_v33 = vadd.f32 1.0, %v6696_v53  ;;  %v2954_v28 = vsub.s32 6, %v9500_v19  ;;  %v4033_v53 = vsub.f32 0.0, %v3268_v10  ;;  %v9021_v10 = vpop.f32.mrb[27].mxu0 }
 0x6cd   : > { %v6700_v58 = vpop.eup %6699  ;;  %6719 = vrcp.f32 %v4684_v29  ;;  %v4685_v45 = vadd.f32 1.0, %v6698_v12  ;;  %v4035_v12 = vsub.f32 0.0, %v3461_v60  ;;  %9505 = vst [vmem:[#allocation2_spill] sm:$0xff] %v9021_v10  ;;  %v9506_v60 = vld [vmem:[#allocation20_spill] sm:$0xff]  ;;  %v9508_v10 = vld [vmem:[#allocation22_spill] sm:$0xff] }
 0x6ce   : > { %v6702_v16 = vpop.eup %6701  ;;  %6721 = vrcp.f32 %v4686_v33  ;;  %v4687_v50 = vadd.f32 1.0, %v6700_v58  ;;  %v9503_v33 = vld [vmem:[#allocation19_spill] sm:$0xff] }
 0x6cf   : > { %v6704_v26 = vpop.eup %6703  ;;  %6723 = vrcp.f32 %v4685_v45  ;;  %v4691_v24 = vadd.f32 1.0, %v6702_v16  ;;  %v3272_v58 = vadd.f32 %v9503_v33, %v8338_v61  ;;  %v9504_v45 = vld [vmem:[#allocation3_spill] sm:$0xff]  ;;  %v4034_v61 = vsub.f32 0.0, %v3270_v57 }
 0x6d0   : > { %v6706_v36 = vpop.eup %6705  ;;  %6725 = vrcp.f32 %v4687_v50  ;;  %v4693_v29 = vadd.f32 1.0, %v6704_v26  ;;  %v9019_v16 = vrot.slane %v9504_v45, %v2946_v51  ;;  %v3465_v26 = vadd.f32 %v9506_v60, %v8341_v7  ;;  %v9507_v51 = vld [vmem:[#allocation21_spill] sm:$0xff] }
 0x6d1   : > { %v6708_v37 = vpop.eup %6707  ;;  %6727 = vrcp.f32 %v4691_v24  ;;  %v4692_v3 = vadd.f32 1.0, %v6706_v36  ;;  %v9026_v20 = vrot.slane %v9504_v45, %v2954_v28  ;;  %v3274_v33 = vadd.f32 %v9507_v51, %v8344_v22 }
 0x6d2   : > { %v6710_v52 = vpop.eup %6709  ;;  %6729 = vrcp.f32 %v4693_v29  ;;  %v4694_v50 = vadd.f32 1.0, %v6708_v37  ;;  %v4459_v29 = vmul.f32 1.442695, %v4029_v15  ;;  %v4036_v37 = vsub.f32 0.0, %v3463_v21  ;;  %v9509_v15 = vld [vmem:[#allocation23_spill] sm:$0xff] }
 0x6d3   : > { %v6712_v24 = vpop.eup %6711  ;;  %6731 = vrcp.f32 %v4692_v3  ;;  %v4698_v36 = vadd.f32 1.0, %v6710_v52  ;;  %v3467_v7 = vadd.f32 %v9508_v10, %v8347_v54  ;;  %v4467_v28 = vmul.f32 1.442695, %v4033_v53  ;;  %v9040_v53 = vpop.f32.mrb[252].mxu1 }
 0x6d4   : > { %v6714_v8 = vpop.eup %6713  ;;  %5125 = vst [vmem:[%s8398_s23 + $0x5b0] sm:$0xff] %v6712_v24  ;;  %6733 = vrcp.f32 %v4694_v50  ;;  %v4040_v3 = vsub.f32 0.0, %v3272_v58  ;;  %v3504_v57 = vadd.f32 %v8742_v42, %v9019_v16  ;;  %v4471_v22 = vmul.f32 1.442695, %v4035_v12  ;;  %v9042_v58 = vpop.f32.mrb[28].mxu0 }
 0x6d5   : > { %v6716_v60 = vpop.eup %6715  ;;  %5127 = vst [vmem:[%s8398_s23 + $0x5c0] sm:$0xff] %v6714_v8  ;;  %6735 = vrcp.f32 %v4698_v36  ;;  %v4042_v50 = vsub.f32 0.0, %v3465_v26  ;;  %v3705_v21 = vadd.f32 %v9509_v15, %v9026_v20  ;;  %v4469_v54 = vmul.f32 1.442695, %v4034_v61  ;;  %v9045_v10 = vpop.f32.mrb[253].mxu1 }
 0x6d6   : > { %v6718_v52 = vpop.eup %6717  ;;  %5126 = vst [vmem:[%s8398_s23 + $0x5b8] sm:$0xff] %v6716_v60  ;;  %6737 = vpow2.f32 %v4457_v32  ;;  %v4041_v8 = vsub.f32 0.0, %v3274_v33  ;;  %v4473_v32 = vmul.f32 1.442695, %v4036_v37  ;;  %v4043_v12 = vsub.f32 0.0, %v3467_v7  ;;  %v9047_v26 = vpop.f32.mrb[29].mxu0 }
 0x6d7   : > { %v6720_v24 = vpop.eup %6719  ;;  %5128 = vst [vmem:[%s8398_s23 + $0x5c8] sm:$0xff] %v6718_v52  ;;  %6739 = vpow2.f32 %v4455_v41  ;;  %v4481_v41 = vmul.f32 1.442695, %v4040_v3  ;;  %v3827_v61 = vsub.f32 0.0, %v3504_v57  ;;  %v9050_v51 = vpop.f32.mrb[254].mxu1  ;;  %v3843_v37 = vsub.f32 0.0, %v3705_v21 }
 0x6d8   : > { %v6722_v42 = vpop.eup %6721  ;;  %5132 = vst [vmem:[%s8398_s23 + $0x5e8] sm:$0xff] %v6720_v24  ;;  %6741 = vpow2.f32 %v4459_v29  ;;  %v9052_v33 = vpop.f32.mrb[30].mxu0  ;;  %v4485_v29 = vmul.f32 1.442695, %v4042_v50  ;;  %v2950_v7 = vsub.s32 5, %v9500_v19 }
 0x6d9   : > { %v6724_v36 = vpop.eup %6723  ;;  %5134 = vst [vmem:[%s8398_s23 + $0x5f8] sm:$0xff] %v6722_v42  ;;  %6743 = vpow2.f32 %v4467_v28  ;;  %v9056_v52 = vpop.f32.mrb[255].mxu1  ;;  %v4483_v3 = vmul.f32 1.442695, %v4041_v8  ;;  %v4487_v24 = vmul.f32 1.442695, %v4043_v12 }
 0x6da   : > { %v6726_v60 = vpop.eup %6725  ;;  %5133 = vst [vmem:[%s8398_s23 + $0x5f0] sm:$0xff] %v6724_v36  ;;  %6745 = vpow2.f32 %v4471_v22  ;;  %v9058_v15 = vpop.f32.mrb[31].mxu0  ;;  %v4055_v50 = vmul.f32 1.442695, %v3827_v61  ;;  %v4087_v21 = vmul.f32 1.442695, %v3843_v37  ;;  %v9065_v42 = vrot.slane %v9504_v45, %v2950_v7 }
 0x6db   : > { %v6728_v28 = vpop.eup %6727  ;;  %5135 = vst [vmem:[%s8398_s23 + $0x600] sm:$0xff] %v6726_v60  ;;  %6747 = vpow2.f32 %v4469_v54  ;;  %v9068_v54 = vpop.f32.mrb[0].mxu1  ;;  %v9511_v37 = vld [vmem:[#allocation24_spill] sm:$0xff] }
 0x6dc   : > { %v6730_v57 = vpop.eup %6729  ;;  %5139 = vst [vmem:[%s8398_s23 + $0x620] sm:$0xff] %v6728_v28  ;;  %6749 = vpow2.f32 %v4473_v32  ;;  %v3697_v32 = vadd.f32 %v8756_v46, %v9026_v20  ;;  %v9073_v12 = vpop.f32.mrb[1].mxu1  ;;  %v3506_v7 = vadd.f32 %v9511_v37, %v9065_v42 }
 0x6dd   : > { %v6732_v22 = vpop.eup %6731  ;;  %5141 = vst [vmem:[%s8398_s23 + $0x630] sm:$0xff] %v6730_v57  ;;  %6751 = vpow2.f32 %v4481_v41  ;;  %v9075_v60 = vpop.f32.mrb[2].mxu1 }
 0x6de   : > { %v6734_v19 = vpop.eup %6733  ;;  %5140 = vst [vmem:[%s8398_s23 + $0x628] sm:$0xff] %v6732_v22  ;;  %6753 = vpow2.f32 %v4485_v29  ;;  %9510 = vst [vmem:[#allocation17_spill] sm:$0xff] %v9075_v60  ;;  %v9079_v28 = vpop.f32.mrb[3].mxu1  ;;  %v3829_v22 = vsub.f32 0.0, %v3697_v32 }
 0x6df   : > { %v6736_v36 = vpop.eup %6735  ;;  %5142 = vst [vmem:[%s8398_s23 + $0x638] sm:$0xff] %v6734_v19  ;;  %6755 = vpow2.f32 %v4483_v3  ;;  %9512 = vst [vmem:[#allocation18_spill] sm:$0xff] %v9079_v28 }
 0x6e0   : > { %v6738_v8 = vpop.eup %6737  ;;  %5146 = vst [vmem:[%s8398_s23 + $0x658] sm:$0xff] %v6736_v36  ;;  %6757 = vpow2.f32 %v4487_v24  ;;  %v3508_v36 = vadd.f32 %v8762_v34, %v9019_v16  ;;  %v4059_v32 = vmul.f32 1.442695, %v3829_v22 }
 0x6e1   : > { %v6740_v41 = vpop.eup %6739  ;;  %v4700_v61 = vadd.f32 1.0, %v6738_v8  ;;  %6759 = vpow2.f32 %v4055_v50 }
 0x6e2   : > { %v6742_v45 = vpop.eup %6741  ;;  %v4699_v29 = vadd.f32 1.0, %v6740_v41  ;;  %6761 = vpow2.f32 %v4087_v21  ;;  %v3828_v41 = vsub.f32 0.0, %v3506_v7  ;;  %v3700_v7 = vadd.f32 %v8774_v44, %v9026_v20 }
 0x6e3   : > { %v6744_v3 = vpop.eup %6743  ;;  %6763 = vrcp.f32 %v4700_v61  ;;  %v4701_v57 = vadd.f32 1.0, %v6742_v45  ;;  %v9513_v61 = vld [vmem:[#allocation25_spill] sm:$0xff] }
 0x6e4   : > { %v6746_v24 = vpop.eup %6745  ;;  %6765 = vrcp.f32 %v4699_v29  ;;  %v4705_v46 = vadd.f32 1.0, %v6744_v3  ;;  %v3708_v45 = vadd.f32 %v9513_v61, %v9026_v20  ;;  %v3510_v3 = vadd.f32 %v8772_v40, %v9065_v42 }
 0x6e5   : > { %v6748_v19 = vpop.eup %6747  ;;  %6767 = vrcp.f32 %v4701_v57  ;;  %v4707_v50 = vadd.f32 1.0, %v6746_v24  ;;  %v3834_v24 = vsub.f32 0.0, %v3508_v36  ;;  %v3721_v40 = vadd.f32 %v8786_v31, %v9026_v20 }
 0x6e6   : > { %v6750_v8 = vpop.eup %6749  ;;  %6769 = vrcp.f32 %v4705_v46  ;;  %v4706_v21 = vadd.f32 1.0, %v6748_v19  ;;  %v3835_v44 = vsub.f32 0.0, %v3510_v3  ;;  %v3516_v36 = vadd.f32 %v8789_v2, %v9065_v42 }
 0x6e7   : > { %v6752_v37 = vpop.eup %6751  ;;  %6771 = vrcp.f32 %v4707_v50  ;;  %v4708_v28 = vadd.f32 1.0, %v6750_v8  ;;  %v4057_v50 = vmul.f32 1.442695, %v3828_v41  ;;  %v3514_v8 = vadd.f32 %v8784_v35, %v9019_v16 }
 0x6e8   : > { %v6754_v60 = vpop.eup %6753  ;;  %6773 = vrcp.f32 %v4706_v21  ;;  %v4712_v29 = vadd.f32 1.0, %v6752_v37  ;;  %v3850_v37 = vsub.f32 0.0, %v3708_v45  ;;  %v3836_v35 = vsub.f32 0.0, %v3700_v7 }
 0x6e9   : > { %v6756_v57 = vpop.eup %6755  ;;  %6775 = vrcp.f32 %v4708_v28  ;;  %v4714_v34 = vadd.f32 1.0, %v6754_v60  ;;  %v4069_v31 = vmul.f32 1.442695, %v3834_v24  ;;  %v3518_v3 = vadd.f32 %v8794_v47, %v9019_v16 }
 0x6ea   : > { %v6758_v46 = vpop.eup %6757  ;;  %6777 = vrcp.f32 %v4712_v29  ;;  %v4713_v19 = vadd.f32 1.0, %v6756_v57  ;;  %v3713_v29 = vadd.f32 %v8791_v5, %v9026_v20  ;;  %v3841_v57 = vsub.f32 0.0, %v3514_v8  ;;  %v9106_v8 = vpop.f32.mrb[4].mxu1 }
 0x6eb   : > { %v6760_v21 = vpop.eup %6759  ;;  %6779 = vrcp.f32 %v4714_v34  ;;  %v4715_v22 = vadd.f32 1.0, %v6758_v46  ;;  %v4101_v2 = vmul.f32 1.442695, %v3850_v37  ;;  %v3871_v46 = vsub.f32 0.0, %v3721_v40  ;;  %v9109_v40 = vpop.f32.mrb[5].mxu1 }
 0x6ec   : > { %v6762_v60 = vpop.eup %6761  ;;  %6781 = vrcp.f32 %v4713_v19  ;;  %v4499_v28 = vadd.f32 1.0, %v6760_v21  ;;  %v3724_v7 = vadd.f32 %v8796_v0, %v9026_v20  ;;  %v4071_v5 = vmul.f32 1.442695, %v3835_v44 }
 0x6ed   : > { %v6764_v41 = vpop.eup %6763  ;;  %6783 = vrcp.f32 %v4715_v22  ;;  %v4515_v61 = vadd.f32 1.0, %v6762_v60  ;;  %v3842_v21 = vsub.f32 0.0, %v3516_v36  ;;  %v3520_v24 = vadd.f32 %v8799_v62, %v9065_v42 }
 0x6ee   : > { %v6766_v45 = vpop.eup %6765  ;;  %5148 = vst [vmem:[%s8398_s23 + $0x668] sm:$0xff] %v6764_v41  ;;  %6785 = vrcp.f32 %v4499_v28  ;;  %v4073_v22 = vmul.f32 1.442695, %v3836_v35  ;;  %v3857_v37 = vsub.f32 0.0, %v3713_v29  ;;  %v3848_v60 = vsub.f32 0.0, %v3518_v3  ;;  %v9112_v28 = vpop.f32.mrb[6].mxu1 }
 0x6ef   : > { %v6768_v34 = vpop.eup %6767  ;;  %5147 = vst [vmem:[%s8398_s23 + $0x660] sm:$0xff] %v6766_v45  ;;  %6787 = vrcp.f32 %v4515_v61  ;;  %v4143_v62 = vmul.f32 1.442695, %v3871_v46  ;;  %v3878_v36 = vsub.f32 0.0, %v3724_v7  ;;  %v4085_v61 = vmul.f32 1.442695, %v3842_v21 }
 0x6f0   : > { %v6770_v19 = vpop.eup %6769  ;;  %5149 = vst [vmem:[%s8398_s23 + $0x670] sm:$0xff] %v6768_v34  ;;  %6789 = vpow2.f32 %v4057_v50  ;;  %v4083_v50 = vmul.f32 1.442695, %v3841_v57  ;;  %v3849_v35 = vsub.f32 0.0, %v3520_v24  ;;  %v4115_v45 = vmul.f32 1.442695, %v3857_v37 }
 0x6f1   : > { %v6772_v47 = vpop.eup %6771  ;;  %5153 = vst [vmem:[%s8398_s23 + $0x690] sm:$0xff] %v6770_v19  ;;  %6791 = vpow2.f32 %v4059_v32  ;;  %v9115_v32 = vpop.f32.mrb[7].mxu1  ;;  %v4097_v57 = vmul.f32 1.442695, %v3848_v60  ;;  %v4157_v34 = vmul.f32 1.442695, %v3878_v36 }
 0x6f2   : > { %v6774_v0 = vpop.eup %6773  ;;  %5155 = vst [vmem:[%s8398_s23 + $0x6a0] sm:$0xff] %v6772_v47  ;;  %6793 = vpow2.f32 %v4069_v31  ;;  %v4099_v46 = vmul.f32 1.442695, %v3849_v35  ;;  %v9122_v7 = vpop.f32.mrb[8].mxu1  ;;  %v9514_v24 = vld [vmem:[#allocation26_spill] sm:$0xff] }
 0x6f3   : > { %v6776_v44 = vpop.eup %6775  ;;  %5154 = vst [vmem:[%s8398_s23 + $0x698] sm:$0xff] %v6774_v0  ;;  %6795 = vpow2.f32 %v4101_v2  ;;  %v3716_v47 = vadd.f32 %v9514_v24, %v9026_v20 }
 0x6f4   : > { %v6778_v41 = vpop.eup %6777  ;;  %5156 = vst [vmem:[%s8398_s23 + $0x6a8] sm:$0xff] %v6776_v44  ;;  %6797 = vpow2.f32 %v4071_v5  ;;  %v9125_v5 = vpop.f32.mrb[9].mxu1 }
 0x6f5   : > { %v6780_v29 = vpop.eup %6779  ;;  %5160 = vst [vmem:[%s8398_s23 + $0x6c8] sm:$0xff] %v6778_v41  ;;  %6799 = vpow2.f32 %v4073_v22  ;;  %v9130_v22 = vpop.f32.mrb[10].mxu1 }
 0x6f6   : > { %v6782_v31 = vpop.eup %6781  ;;  %5162 = vst [vmem:[%s8398_s23 + $0x6d8] sm:$0xff] %v6780_v29  ;;  %6801 = vpow2.f32 %v4083_v50  ;;  %v9132_v50 = vpop.f32.mrb[11].mxu1  ;;  %v3864_v29 = vsub.f32 0.0, %v3716_v47 }
 0x6f7   : > { %v6784_v3 = vpop.eup %6783  ;;  %5161 = vst [vmem:[%s8398_s23 + $0x6d0] sm:$0xff] %v6782_v31  ;;  %6803 = vpow2.f32 %v4143_v62  ;;  %v3524_v62 = vadd.f32 %v8834_v14, %v9019_v16 }
 0x6f8   : > { %v6786_v2 = vpop.eup %6785  ;;  %5163 = vst [vmem:[%s8398_s23 + $0x6e0] sm:$0xff] %v6784_v3  ;;  %6805 = vpow2.f32 %v4085_v61 }
 0x6f9   : > { %v6788_v19 = vpop.eup %6787  ;;  %4947 = vst [vmem:[%s8398_s23 + $0x20] sm:$0xff] %v6786_v2  ;;  %6807 = vpow2.f32 %v4115_v45  ;;  %v3855_v2 = vsub.f32 0.0, %v3524_v62 }
 0x6fa   : > { %v6790_v21 = vpop.eup %6789  ;;  %4963 = vst [vmem:[%s8398_s23 + $0xa0] sm:$0xff] %v6788_v19  ;;  %6809 = vpow2.f32 %v4097_v57  ;;  %v3737_v57 = vadd.f32 %v8836_v18, %v9026_v20  ;;  %v3729_v18 = vadd.f32 %v8841_v25, %v9026_v20 }
 0x6fb   : > { %v6792_v37 = vpop.eup %6791  ;;  %v4500_v0 = vadd.f32 1.0, %v6790_v21  ;;  %6811 = vpow2.f32 %v4157_v34  ;;  %v3526_v21 = vadd.f32 %v8839_v1, %v9065_v42 }
 0x6fc   : > { %v6794_v60 = vpop.eup %6793  ;;  %v4501_v44 = vadd.f32 1.0, %v6792_v37  ;;  %6813 = vpow2.f32 %v4099_v46  ;;  %v9138_v46 = vpop.f32.mrb[12].mxu1 }
 0x6fd   : > { %v6796_v36 = vpop.eup %6795  ;;  %6815 = vrcp.f32 %v4500_v0  ;;  %v4506_v41 = vadd.f32 1.0, %v6794_v60  ;;  %v9142_v24 = vpop.f32.mrb[13].mxu1  ;;  %v4129_v0 = vmul.f32 1.442695, %v3864_v29  ;;  %v3740_v29 = vadd.f32 %v8846_v17, %v9026_v20 }
 0x6fe   : > { %v6798_v61 = vpop.eup %6797  ;;  %6817 = vrcp.f32 %v4501_v44  ;;  %v4522_v35 = vadd.f32 1.0, %v6796_v36  ;;  %v9146_v60 = vpop.f32.mrb[14].mxu1  ;;  %v3899_v36 = vsub.f32 0.0, %v3737_v57  ;;  %v3530_v57 = vadd.f32 %v8849_v13, %v9065_v42 }
 0x6ff   : > { %v6800_v45 = vpop.eup %6799  ;;  %6819 = vrcp.f32 %v4506_v41  ;;  %v4507_v31 = vadd.f32 1.0, %v6798_v61  ;;  %v3528_v41 = vadd.f32 %v8844_v11, %v9019_v16  ;;  %v9150_v61 = vpop.f32.mrb[15].mxu1 }
 0x700   : > { %v6802_v3 = vpop.eup %6801  ;;  %6821 = vrcp.f32 %v4522_v35  ;;  %v4508_v34 = vadd.f32 1.0, %v6800_v45  ;;  %v4111_v45 = vmul.f32 1.442695, %v3855_v2  ;;  %v4199_v13 = vmul.f32 1.442695, %v3899_v36 }
 0x701   : > { %v6804_v14 = vpop.eup %6803  ;;  %6823 = vrcp.f32 %v4507_v31  ;;  %v4513_v19 = vadd.f32 1.0, %v6802_v3  ;;  %v3856_v3 = vsub.f32 0.0, %v3526_v21  ;;  %v3862_v17 = vsub.f32 0.0, %v3528_v41 }
 0x702   : > { %v6806_v47 = vpop.eup %6805  ;;  %6825 = vrcp.f32 %v4508_v34  ;;  %v4543_v37 = vadd.f32 1.0, %v6804_v14  ;;  %v3885_v14 = vsub.f32 0.0, %v3729_v18  ;;  %v9163_v18 = vpop.f32.mrb[16].mxu1  ;;  %v3863_v41 = vsub.f32 0.0, %v3530_v57 }
 0x703   : > { %v6808_v44 = vpop.eup %6807  ;;  %6827 = vrcp.f32 %v4513_v19  ;;  %v4514_v62 = vadd.f32 1.0, %v6806_v47  ;;  %v3732_v19 = vadd.f32 %v8851_v43, %v9026_v20 }
 0x704   : > { %v6810_v1 = vpop.eup %6809  ;;  %6829 = vrcp.f32 %v4543_v37  ;;  %v4529_v35 = vadd.f32 1.0, %v6808_v44  ;;  %v3534_v37 = vadd.f32 %v8858_v63, %v9019_v16  ;;  %v3906_v44 = vsub.f32 0.0, %v3740_v29  ;;  %v9515_v29 = vld [vmem:[#allocation27_spill] sm:$0xff] }
 0x705   : > { %v6812_v31 = vpop.eup %6811  ;;  %6831 = vrcp.f32 %v4514_v62  ;;  %v4520_v25 = vadd.f32 1.0, %v6810_v1  ;;  %v3753_v62 = vadd.f32 %v8860_v56, %v9026_v20  ;;  %v4113_v1 = vmul.f32 1.442695, %v3856_v3 }
 0x706   : > { %v6814_v34 = vpop.eup %6813  ;;  %6833 = vrcp.f32 %v4529_v35  ;;  %v4550_v11 = vadd.f32 1.0, %v6812_v31  ;;  %v3536_v63 = vadd.f32 %v8863_v6, %v9065_v42  ;;  %v9168_v35 = vpop.f32.mrb[17].mxu1  ;;  %v4171_v36 = vmul.f32 1.442695, %v3885_v14 }
 0x707   : > { %v6816_v2 = vpop.eup %6815  ;;  %6835 = vrcp.f32 %v4520_v25  ;;  %v4521_v47 = vadd.f32 1.0, %v6814_v34  ;;  %v3892_v56 = vsub.f32 0.0, %v3732_v19  ;;  %v3745_v25 = vadd.f32 %v9515_v29, %v9026_v20  ;;  %v9173_v34 = vpop.f32.mrb[18].mxu1 }
 0x708   : > { %v6818_v21 = vpop.eup %6817  ;;  %4948 = vst [vmem:[%s8398_s23 + $0x28] sm:$0xff] %v6816_v2  ;;  %6837 = vrcp.f32 %v4550_v11  ;;  %v4125_v3 = vmul.f32 1.442695, %v3862_v17  ;;  %v3869_v6 = vsub.f32 0.0, %v3534_v37  ;;  %v9176_v57 = vpop.f32.mrb[19].mxu1  ;;  %v3927_v14 = vsub.f32 0.0, %v3753_v62 }
 0x709   : > { %v6820_v43 = vpop.eup %6819  ;;  %4949 = vst [vmem:[%s8398_s23 + $0x30] sm:$0xff] %v6818_v21  ;;  %6839 = vrcp.f32 %v4521_v47  ;;  %v4127_v47 = vmul.f32 1.442695, %v3863_v41  ;;  %v3870_v21 = vsub.f32 0.0, %v3536_v63  ;;  %v3913_v17 = vsub.f32 0.0, %v3745_v25  ;;  %v9183_v62 = vpop.f32.mrb[20].mxu1 }
 0x70a   : > { %v6822_v31 = vpop.eup %6821  ;;  %4954 = vst [vmem:[%s8398_s23 + $0x58] sm:$0xff] %v6820_v43  ;;  %6841 = vpow2.f32 %v4129_v0  ;;  %v4213_v0 = vmul.f32 1.442695, %v3906_v44  ;;  %v4255_v44 = vmul.f32 1.442695, %v3927_v14  ;;  %v9186_v63 = vpop.f32.mrb[21].mxu1 }
 0x70b   : > { %v6824_v11 = vpop.eup %6823  ;;  %4970 = vst [vmem:[%s8398_s23 + $0xd8] sm:$0xff] %v6822_v31  ;;  %6843 = vpow2.f32 %v4111_v45  ;;  %v4185_v45 = vmul.f32 1.442695, %v3892_v56  ;;  %v4139_v31 = vmul.f32 1.442695, %v3869_v6  ;;  %v9189_v29 = vpop.f32.mrb[22].mxu1 }
 0x70c   : > { %v6826_v2 = vpop.eup %6825  ;;  %4955 = vst [vmem:[%s8398_s23 + $0x60] sm:$0xff] %v6824_v11  ;;  %6845 = vpow2.f32 %v4199_v13  ;;  %v4141_v41 = vmul.f32 1.442695, %v3870_v21  ;;  %v4227_v56 = vmul.f32 1.442695, %v3913_v17  ;;  %v9192_v11 = vpop.f32.mrb[23].mxu1 }
 0x70d   : > { %v6828_v19 = vpop.eup %6827  ;;  %4956 = vst [vmem:[%s8398_s23 + $0x68] sm:$0xff] %v6826_v2  ;;  %6847 = vpow2.f32 %v4113_v1  ;;  %9516 = vst [vmem:[#allocation19_spill] sm:$0xff] %v9192_v11  ;;  %v9517_v6 = vld [vmem:[#allocation28_spill] sm:$0xff] }
 0x70e   : > { %v6830_v43 = vpop.eup %6829  ;;  %4961 = vst [vmem:[%s8398_s23 + $0x90] sm:$0xff] %v6828_v19  ;;  %6849 = vpow2.f32 %v4171_v36  ;;  %v3538_v2 = vadd.f32 %v9517_v6, %v9019_v16  ;;  %v9518_v21 = vld [vmem:[#allocation4_spill] sm:$0xff] }
 0x70f   : > { %v6832_v37 = vpop.eup %6831  ;;  %4991 = vst [vmem:[%s8398_s23 + $0x180] sm:$0xff] %v6830_v43  ;;  %6851 = vpow2.f32 %v4125_v3  ;;  %v3756_v43 = vadd.f32 %v9518_v21, %v9026_v20 }
 0x710   : > { %v6834_v13 = vpop.eup %6833  ;;  %4962 = vst [vmem:[%s8398_s23 + $0x98] sm:$0xff] %v6832_v37  ;;  %6853 = vpow2.f32 %v4213_v0 }
 0x711   : > { %v6836_v1 = vpop.eup %6835  ;;  %4977 = vst [vmem:[%s8398_s23 + $0x110] sm:$0xff] %v6834_v13  ;;  %6855 = vpow2.f32 %v4127_v47  ;;  %v3876_v13 = vsub.f32 0.0, %v3538_v2  ;;  %v9523_v2 = vld [vmem:[#allocation6_spill] sm:$0xff] }
 0x712   : > { %v6838_v36 = vpop.eup %6837  ;;  %4968 = vst [vmem:[%s8398_s23 + $0xc8] sm:$0xff] %v6836_v1  ;;  %6857 = vpow2.f32 %v4185_v45  ;;  %v3748_v21 = vadd.f32 %v9523_v2, %v9026_v20 }
 0x713   : > { %v6840_v25 = vpop.eup %6839  ;;  %4998 = vst [vmem:[%s8398_s23 + $0x1b8] sm:$0xff] %v6838_v36  ;;  %6859 = vpow2.f32 %v4139_v31 }
 0x714   : > { %v6842_v3 = vpop.eup %6841  ;;  %4969 = vst [vmem:[%s8398_s23 + $0xd0] sm:$0xff] %v6840_v25  ;;  %6861 = vpow2.f32 %v4255_v44  ;;  %v9199_v44 = vpop.f32.mrb[24].mxu1 }
 0x715   : > { %v6844_v0 = vpop.eup %6843  ;;  %v4536_v14 = vadd.f32 1.0, %v6842_v3  ;;  %6863 = vpow2.f32 %v4141_v41  ;;  %9519 = vst [vmem:[#allocation3_spill] sm:$0xff] %v9199_v44  ;;  %v9520_v41 = vld [vmem:[#allocation5_spill] sm:$0xff]  ;;  %v9203_v3 = vpop.f32.mrb[25].mxu1 }
 0x716   : > { %v6846_v19 = vpop.eup %6845  ;;  %v4527_v47 = vadd.f32 1.0, %v6844_v0  ;;  %6865 = vpow2.f32 %v4227_v56  ;;  %v3540_v25 = vadd.f32 %v9520_v41, %v9065_v42  ;;  %9521 = vst [vmem:[#allocation20_spill] sm:$0xff] %v9203_v3  ;;  %v3934_v0 = vsub.f32 0.0, %v3756_v43 }
 0x717   : > { %v6848_v45 = vpop.eup %6847  ;;  %6867 = vrcp.f32 %v4536_v14  ;;  %v4571_v17 = vadd.f32 1.0, %v6846_v19  ;;  %v9205_v14 = vpop.f32.mrb[26].mxu1  ;;  %v4153_v41 = vmul.f32 1.442695, %v3876_v13  ;;  %v3544_v3 = vadd.f32 %v8908_v48, %v9019_v16 }
 0x718   : > { %v6850_v37 = vpop.eup %6849  ;;  %6869 = vrcp.f32 %v4527_v47  ;;  %v4528_v31 = vadd.f32 1.0, %v6848_v45  ;;  %9522 = vst [vmem:[#allocation21_spill] sm:$0xff] %v9205_v14  ;;  %v9209_v45 = vpop.f32.mrb[27].mxu1  ;;  %v4269_v2 = vmul.f32 1.442695, %v3934_v0  ;;  %v3761_v48 = vadd.f32 %v8915_v59, %v9026_v20 }
 0x719   : > { %v6852_v1 = vpop.eup %6851  ;;  %6871 = vrcp.f32 %v4571_v17  ;;  %v4557_v36 = vadd.f32 1.0, %v6850_v37  ;;  %9524 = vst [vmem:[#allocation22_spill] sm:$0xff] %v9209_v45  ;;  %v3546_v45 = vadd.f32 %v8913_v39, %v9065_v42  ;;  %v9221_v0 = vpop.f32.mrb[28].mxu1 }
 0x71a   : > { %v6854_v56 = vpop.eup %6853  ;;  %6873 = vrcp.f32 %v4528_v31  ;;  %v4534_v6 = vadd.f32 1.0, %v6852_v1  ;;  %v3877_v1 = vsub.f32 0.0, %v3540_v25  ;;  %9526 = vst [vmem:[#allocation23_spill] sm:$0xff] %v9221_v0  ;;  %v9225_v44 = vpop.f32.mrb[29].mxu1 }
 0x71b   : > { %v6856_v19 = vpop.eup %6855  ;;  %6875 = vrcp.f32 %v4557_v36  ;;  %v4578_v47 = vadd.f32 1.0, %v6854_v56  ;;  %v3769_v36 = vadd.f32 %v8910_v9, %v9026_v20  ;;  %v9525_v9 = vld [vmem:[#allocation7_spill] sm:$0xff]  ;;  %9528 = vst [vmem:[#allocation24_spill] sm:$0xff] %v9225_v44  ;;  %v9230_v0 = vpop.f32.mrb[30].mxu1 }
 0x71c   : > { %v6858_v17 = vpop.eup %6857  ;;  %6877 = vrcp.f32 %v4534_v6  ;;  %v4535_v37 = vadd.f32 1.0, %v6856_v19  ;;  %v3920_v19 = vsub.f32 0.0, %v3748_v21  ;;  %9530 = vst [vmem:[#allocation25_spill] sm:$0xff] %v9230_v0  ;;  %v9235_v11 = vpop.f32.mrb[31].mxu1 }
 0x71d   : > { %v6860_v31 = vpop.eup %6859  ;;  %6879 = vrcp.f32 %v4578_v47  ;;  %v4564_v43 = vadd.f32 1.0, %v6858_v17  ;;  %v3883_v17 = vsub.f32 0.0, %v3544_v3  ;;  %v4155_v3 = vmul.f32 1.442695, %v3877_v1 }
 0x71e   : > { %v6862_v56 = vpop.eup %6861  ;;  %6881 = vrcp.f32 %v4535_v37  ;;  %v4541_v14 = vadd.f32 1.0, %v6860_v31  ;;  %v3548_v37 = vadd.f32 %v9525_v9, %v9019_v16 }
 0x71f   : > { %v6864_v6 = vpop.eup %6863  ;;  %6883 = vrcp.f32 %v4564_v43  ;;  %v4599_v13 = vadd.f32 1.0, %v6862_v56  ;;  %v3955_v43 = vsub.f32 0.0, %v3769_v36  ;;  %v9527_v56 = vld [vmem:[#allocation8_spill] sm:$0xff]  ;;  %v4241_v36 = vmul.f32 1.442695, %v3920_v19 }
 0x720   : > { %v6866_v47 = vpop.eup %6865  ;;  %6885 = vrcp.f32 %v4541_v14  ;;  %v4542_v25 = vadd.f32 1.0, %v6864_v6  ;;  %v3772_v21 = vadd.f32 %v9527_v56, %v9026_v20  ;;  %v3884_v14 = vsub.f32 0.0, %v3546_v45  ;;  %v9529_v6 = vld [vmem:[#allocation9_spill] sm:$0xff]  ;;  %v9531_v56 = vld [vmem:[#allocation10_spill] sm:$0xff] }
 0x721   : > { %v6868_v31 = vpop.eup %6867  ;;  %6887 = vrcp.f32 %v4599_v13  ;;  %v4585_v39 = vadd.f32 1.0, %v6866_v47  ;;  %v3550_v9 = vadd.f32 %v9529_v6, %v9065_v42  ;;  %v3941_v47 = vsub.f32 0.0, %v3761_v48 }
 0x722   : > { %v6870_v59 = vpop.eup %6869  ;;  %4984 = vst [vmem:[%s8398_s23 + $0x148] sm:$0xff] %v6868_v31  ;;  %6889 = vrcp.f32 %v4542_v25  ;;  %v3764_v44 = vadd.f32 %v9531_v56, %v9026_v20  ;;  %v4167_v45 = vmul.f32 1.442695, %v3883_v17  ;;  %v3890_v1 = vsub.f32 0.0, %v3548_v37  ;;  %v9532_v31 = vld [vmem:[#allocation29_spill] sm:$0xff] }
 0x723   : > { %v6872_v13 = vpop.eup %6871  ;;  %4975 = vst [vmem:[%s8398_s23 + $0x100] sm:$0xff] %v6870_v59  ;;  %6891 = vrcp.f32 %v4585_v39  ;;  %v3554_v6 = vadd.f32 %v9532_v31, %v9019_v16  ;;  %v4311_v19 = vmul.f32 1.442695, %v3955_v43  ;;  %v3962_v48 = vsub.f32 0.0, %v3772_v21 }
 0x724   : > { %v6874_v25 = vpop.eup %6873  ;;  %5019 = vst [vmem:[%s8398_s23 + $0x260] sm:$0xff] %v6872_v13  ;;  %6893 = vpow2.f32 %v4153_v41  ;;  %v4169_v59 = vmul.f32 1.442695, %v3884_v14  ;;  %v3891_v56 = vsub.f32 0.0, %v3550_v9  ;;  %v4283_v41 = vmul.f32 1.442695, %v3941_v47 }
 0x725   : > { %v6876_v0 = vpop.eup %6875  ;;  %4976 = vst [vmem:[%s8398_s23 + $0x108] sm:$0xff] %v6874_v25  ;;  %6895 = vpow2.f32 %v4269_v2  ;;  %v3948_v17 = vsub.f32 0.0, %v3764_v44  ;;  %v4181_v2 = vmul.f32 1.442695, %v3890_v1  ;;  %v3897_v43 = vsub.f32 0.0, %v3554_v6  ;;  %v9533_v1 = vld [vmem:[#allocation30_spill] sm:$0xff] }
 0x726   : > { %v6878_v39 = vpop.eup %6877  ;;  %5005 = vst [vmem:[%s8398_s23 + $0x1f0] sm:$0xff] %v6876_v0  ;;  %6897 = vpow2.f32 %v4155_v3  ;;  %v4325_v0 = vmul.f32 1.442695, %v3962_v48  ;;  %v4183_v14 = vmul.f32 1.442695, %v3891_v56  ;;  %v3785_v31 = vadd.f32 %v9533_v1, %v9026_v20 }
 0x727   : > { %v6880_v13 = vpop.eup %6879  ;;  %4982 = vst [vmem:[%s8398_s23 + $0x138] sm:$0xff] %v6878_v39  ;;  %6899 = vpow2.f32 %v4241_v36  ;;  %v4297_v44 = vmul.f32 1.442695, %v3948_v17  ;;  %v4195_v47 = vmul.f32 1.442695, %v3897_v43 }
 0x728   : > { %v6882_v37 = vpop.eup %6881  ;;  %5026 = vst [vmem:[%s8398_s23 + $0x298] sm:$0xff] %v6880_v13  ;;  %6901 = vpow2.f32 %v4167_v45 }
 0x729   : > { %v6884_v21 = vpop.eup %6883  ;;  %4983 = vst [vmem:[%s8398_s23 + $0x140] sm:$0xff] %v6882_v37  ;;  %6903 = vpow2.f32 %v4311_v19  ;;  %v3983_v37 = vsub.f32 0.0, %v3785_v31 }
 0x72a   : > { %v6886_v3 = vpop.eup %6885  ;;  %5012 = vst [vmem:[%s8398_s23 + $0x228] sm:$0xff] %v6884_v21  ;;  %6905 = vpow2.f32 %v4169_v59  ;;  %v3556_v59 = vadd.f32 %v8953_v4, %v9065_v42  ;;  %v3777_v21 = vadd.f32 %v8955_v23, %v9026_v20 }
 0x72b   : > { %v6888_v9 = vpop.eup %6887  ;;  %4989 = vst [vmem:[%s8398_s23 + $0x170] sm:$0xff] %v6886_v3  ;;  %6907 = vpow2.f32 %v4283_v41 }
 0x72c   : > { %v6890_v36 = vpop.eup %6889  ;;  %5047 = vst [vmem:[%s8398_s23 + $0x340] sm:$0xff] %v6888_v9  ;;  %6909 = vpow2.f32 %v4181_v2 }
 0x72d   : > { %v6892_v25 = vpop.eup %6891  ;;  %4990 = vst [vmem:[%s8398_s23 + $0x178] sm:$0xff] %v6890_v36  ;;  %6911 = vpow2.f32 %v4325_v0 }
 0x72e   : > { %v6894_v45 = vpop.eup %6893  ;;  %5033 = vst [vmem:[%s8398_s23 + $0x2d0] sm:$0xff] %v6892_v25  ;;  %6913 = vpow2.f32 %v4183_v14  ;;  %v3898_v14 = vsub.f32 0.0, %v3556_v59  ;;  %v4367_v25 = vmul.f32 1.442695, %v3983_v37 }
 0x72f   : > { %v6896_v6 = vpop.eup %6895  ;;  %v4548_v19 = vadd.f32 1.0, %v6894_v45  ;;  %6915 = vpow2.f32 %v4297_v44  ;;  %v3558_v44 = vadd.f32 %v8962_v55, %v9019_v16  ;;  %v9534_v45 = vld [vmem:[#allocation11_spill] sm:$0xff]  ;;  %v3780_v55 = vadd.f32 %v8974_v38, %v9026_v20 }
 0x730   : > { %v6898_v48 = vpop.eup %6897  ;;  %v4606_v39 = vadd.f32 1.0, %v6896_v6  ;;  %6917 = vpow2.f32 %v4195_v47  ;;  %v3788_v1 = vadd.f32 %v9534_v45, %v9026_v20  ;;  %v3969_v6 = vsub.f32 0.0, %v3777_v21 }
 0x731   : > { %v6900_v56 = vpop.eup %6899  ;;  %6919 = vrcp.f32 %v4548_v19  ;;  %v4549_v13 = vadd.f32 1.0, %v6898_v48  ;;  %v3560_v19 = vadd.f32 %v8972_v27, %v9065_v42  ;;  %v4197_v59 = vmul.f32 1.442695, %v3898_v14 }
 0x732   : > { %v6902_v41 = vpop.eup %6901  ;;  %6921 = vrcp.f32 %v4606_v39  ;;  %v4592_v17 = vadd.f32 1.0, %v6900_v56  ;;  %v3990_v27 = vsub.f32 0.0, %v3788_v1  ;;  %v9537_v1 = vld [vmem:[#allocation14_spill] sm:$0xff] }
 0x733   : > { %v6904_v2 = vpop.eup %6903  ;;  %6923 = vrcp.f32 %v4549_v13  ;;  %v4555_v43 = vadd.f32 1.0, %v6902_v41  ;;  %v3904_v41 = vsub.f32 0.0, %v3558_v44  ;;  %v3905_v38 = vsub.f32 0.0, %v3560_v19  ;;  %v9536_v44 = vld [vmem:[#allocation13_spill] sm:$0xff] }
 0x734   : > { %v6906_v0 = vpop.eup %6905  ;;  %6925 = vrcp.f32 %v4592_v17  ;;  %v4627_v3 = vadd.f32 1.0, %v6904_v2  ;;  %v3564_v17 = vadd.f32 %v8982_v30, %v9019_v16  ;;  %v4339_v30 = vmul.f32 1.442695, %v3969_v6 }
 0x735   : > { %v6908_v9 = vpop.eup %6907  ;;  %6927 = vrcp.f32 %v4555_v43  ;;  %v4556_v4 = vadd.f32 1.0, %v6906_v0  ;;  %v3801_v43 = vadd.f32 %v8984_v49, %v9026_v20  ;;  %v4209_v49 = vmul.f32 1.442695, %v3904_v41 }
 0x736   : > { %v6910_v36 = vpop.eup %6909  ;;  %6929 = vrcp.f32 %v4627_v3  ;;  %v4613_v47 = vadd.f32 1.0, %v6908_v9  ;;  %v9535_v3 = vld [vmem:[#allocation12_spill] sm:$0xff]  ;;  %v3911_v45 = vsub.f32 0.0, %v3564_v17  ;;  %v4381_v19 = vmul.f32 1.442695, %v3990_v27 }
 0x737   : > { %v6912_v31 = vpop.eup %6911  ;;  %6931 = vrcp.f32 %v4556_v4  ;;  %v4562_v23 = vadd.f32 1.0, %v6910_v36  ;;  %v3566_v14 = vadd.f32 %v9535_v3, %v9065_v42  ;;  %v3976_v4 = vsub.f32 0.0, %v3780_v55 }
 0x738   : > { %v6914_v48 = vpop.eup %6913  ;;  %6933 = vrcp.f32 %v4613_v47  ;;  %v4634_v39 = vadd.f32 1.0, %v6912_v31  ;;  %v3793_v36 = vadd.f32 %v9536_v44, %v9026_v20  ;;  %v3568_v31 = vadd.f32 %v9537_v1, %v9019_v16 }
 0x739   : > { %v6916_v56 = vpop.eup %6915  ;;  %6935 = vrcp.f32 %v4562_v23  ;;  %v4563_v13 = vadd.f32 1.0, %v6914_v48  ;;  %v4011_v6 = vsub.f32 0.0, %v3801_v43  ;;  %v9538_v48 = vld [vmem:[#allocation15_spill] sm:$0xff]  ;;  %v4353_v17 = vmul.f32 1.442695, %v3976_v4 }
 0x73a   : > { %v6918_v37 = vpop.eup %6917  ;;  %6937 = vrcp.f32 %v4634_v39  ;;  %v4620_v2 = vadd.f32 1.0, %v6916_v56  ;;  %v3804_v39 = vadd.f32 %v9538_v48, %v9026_v20  ;;  %v4211_v56 = vmul.f32 1.442695, %v3905_v38 }
 0x73b   : > { %v6920_v21 = vpop.eup %6919  ;;  %6939 = vrcp.f32 %v4563_v13  ;;  %v4569_v0 = vadd.f32 1.0, %v6918_v37  ;;  %v3912_v13 = vsub.f32 0.0, %v3566_v14  ;;  %v3997_v37 = vsub.f32 0.0, %v3793_v36 }
 0x73c   : > { %v6922_v9 = vpop.eup %6921  ;;  %4996 = vst [vmem:[%s8398_s23 + $0x1a8] sm:$0xff] %v6920_v21  ;;  %6941 = vrcp.f32 %v4620_v2  ;;  %v3918_v27 = vsub.f32 0.0, %v3568_v31  ;;  %v4018_v21 = vsub.f32 0.0, %v3804_v39 }
 0x73d   : > { %v6924_v47 = vpop.eup %6923  ;;  %5054 = vst [vmem:[%s8398_s23 + $0x378] sm:$0xff] %v6922_v9  ;;  %6943 = vrcp.f32 %v4569_v0  ;;  %v4225_v38 = vmul.f32 1.442695, %v3912_v13  ;;  %v4395_v14 = vmul.f32 1.442695, %v3997_v37 }
 0x73e   : > { %v6926_v23 = vpop.eup %6925  ;;  %4997 = vst [vmem:[%s8398_s23 + $0x1b0] sm:$0xff] %v6924_v47  ;;  %6945 = vpow2.f32 %v4367_v25  ;;  %v4223_v25 = vmul.f32 1.442695, %v3911_v45  ;;  %v4437_v44 = vmul.f32 1.442695, %v4018_v21 }
 0x73f   : > { %v6928_v55 = vpop.eup %6927  ;;  %5040 = vst [vmem:[%s8398_s23 + $0x308] sm:$0xff] %v6926_v23  ;;  %6947 = vpow2.f32 %v4197_v59  ;;  %v4423_v59 = vmul.f32 1.442695, %v4011_v6  ;;  %v9540_v23 = vld [vmem:[#allocation2_spill] sm:$0xff] }
 0x740   : > { %v6930_v41 = vpop.eup %6929  ;;  %5003 = vst [vmem:[%s8398_s23 + $0x1e0] sm:$0xff] %v6928_v55  ;;  %6949 = vpow2.f32 %v4339_v30  ;;  %v4237_v30 = vmul.f32 1.442695, %v3918_v27 }
 0x741   : > { %v6932_v2 = vpop.eup %6931  ;;  %5075 = vst [vmem:[%s8398_s23 + $0x420] sm:$0xff] %v6930_v41  ;;  %6951 = vpow2.f32 %v4209_v49  ;;  %v9539_v49 = vld [vmem:[#allocation16_spill] sm:$0xff] }
 0x742   : > { %v6934_v43 = vpop.eup %6933  ;;  %5004 = vst [vmem:[%s8398_s23 + $0x1e8] sm:$0xff] %v6932_v2  ;;  %6953 = vpow2.f32 %v4381_v19  ;;  %v3570_v45 = vadd.f32 %v9539_v49, %v9065_v42  ;;  %v3796_v19 = vadd.f32 %v9540_v23, %v9026_v20 }
 0x743   : > { %v6936_v0 = vpop.eup %6935  ;;  %5061 = vst [vmem:[%s8398_s23 + $0x3b0] sm:$0xff] %v6934_v43  ;;  %6955 = vpow2.f32 %v4211_v56  ;;  %v3574_v43 = vadd.f32 %v9040_v53, %v9019_v16  ;;  %v3809_v53 = vadd.f32 %v9047_v26, %v9026_v20 }
 0x744   : > { %v6938_v3 = vpop.eup %6937  ;;  %5010 = vst [vmem:[%s8398_s23 + $0x218] sm:$0xff] %v6936_v0  ;;  %6957 = vpow2.f32 %v4353_v17  ;;  %v3919_v41 = vsub.f32 0.0, %v3570_v45  ;;  %v4004_v2 = vsub.f32 0.0, %v3796_v19  ;;  %v3817_v0 = vadd.f32 %v9042_v58, %v9026_v20 }
 0x745   : > { %v6940_v9 = vpop.eup %6939  ;;  %5082 = vst [vmem:[%s8398_s23 + $0x458] sm:$0xff] %v6938_v3  ;;  %6959 = vpow2.f32 %v4223_v25  ;;  %v3925_v49 = vsub.f32 0.0, %v3574_v43  ;;  %v3578_v58 = vadd.f32 %v9050_v51, %v9019_v16  ;;  %v4025_v51 = vsub.f32 0.0, %v3809_v53 }
 0x746   : > { %v6942_v4 = vpop.eup %6941  ;;  %5011 = vst [vmem:[%s8398_s23 + $0x220] sm:$0xff] %v6940_v9  ;;  %6961 = vpow2.f32 %v4423_v59  ;;  %v3576_v9 = vadd.f32 %v9045_v10, %v9065_v42  ;;  %v3820_v10 = vadd.f32 %v9052_v33, %v9026_v20 }
 0x747   : > { %v6944_v36 = vpop.eup %6943  ;;  %5068 = vst [vmem:[%s8398_s23 + $0x3e8] sm:$0xff] %v6942_v4  ;;  %6963 = vpow2.f32 %v4225_v38  ;;  %v4251_v33 = vmul.f32 1.442695, %v3925_v49 }
 0x748   : > { %v6946_v47 = vpop.eup %6945  ;;  %5017 = vst [vmem:[%s8398_s23 + $0x250] sm:$0xff] %v6944_v36  ;;  %6965 = vpow2.f32 %v4395_v14  ;;  %v4239_v14 = vmul.f32 1.442695, %v3919_v41  ;;  %v3926_v26 = vsub.f32 0.0, %v3576_v9  ;;  %v3584_v41 = vadd.f32 %v9068_v54, %v9019_v16 }
 0x749   : > { %v6948_v1 = vpop.eup %6947  ;;  %v4655_v31 = vadd.f32 1.0, %v6946_v47  ;;  %6967 = vpow2.f32 %v4237_v30  ;;  %v4451_v54 = vmul.f32 1.442695, %v4025_v51 }
 0x74a   : > { %v6950_v6 = vpop.eup %6949  ;;  %v4570_v48 = vadd.f32 1.0, %v6948_v1  ;;  %6969 = vpow2.f32 %v4437_v44  ;;  %v4409_v44 = vmul.f32 1.442695, %v4004_v2  ;;  %v3586_v2 = vadd.f32 %v9073_v12, %v9065_v42 }
 0x74b   : > { %v6952_v39 = vpop.eup %6951  ;;  %6971 = vrcp.f32 %v4655_v31  ;;  %v4641_v55 = vadd.f32 1.0, %v6950_v6  ;;  %v4039_v31 = vsub.f32 0.0, %v3817_v0  ;;  %v3580_v6 = vadd.f32 %v9056_v52, %v9065_v42 }
 0x74c   : > { %v6954_v56 = vpop.eup %6953  ;;  %6973 = vrcp.f32 %v4570_v48  ;;  %v4576_v13 = vadd.f32 1.0, %v6952_v39  ;;  %v3940_v9 = vsub.f32 0.0, %v3586_v2  ;;  %v3596_v2 = vadd.f32 %v9109_v40, %v9065_v42 }
 0x74d   : > { %v6956_v17 = vpop.eup %6955  ;;  %6975 = vrcp.f32 %v4641_v55  ;;  %v4662_v37 = vadd.f32 1.0, %v6954_v56  ;;  %v3812_v55 = vadd.f32 %v9058_v15, %v9026_v20  ;;  %v4479_v52 = vmul.f32 1.442695, %v4039_v31 }
 0x74e   : > { %v6958_v25 = vpop.eup %6957  ;;  %6977 = vrcp.f32 %v4576_v13  ;;  %v4577_v27 = vadd.f32 1.0, %v6956_v17  ;;  %v3932_v13 = vsub.f32 0.0, %v3578_v58  ;;  %v4253_v20 = vmul.f32 1.442695, %v3926_v26 }
 0x74f   : > { %v6960_v59 = vpop.eup %6959  ;;  %6979 = vrcp.f32 %v4662_v37  ;;  %v4648_v21 = vadd.f32 1.0, %v6958_v25  ;;  %v4046_v37 = vsub.f32 0.0, %v3820_v10  ;;  %v3933_v15 = vsub.f32 0.0, %v3580_v6 }
 0x750   : > { %v6962_v38 = vpop.eup %6961  ;;  %6981 = vrcp.f32 %v4577_v27  ;;  %v4583_v3 = vadd.f32 1.0, %v6960_v59  ;;  %v9541_v27 = vld [vmem:[#allocation17_spill] sm:$0xff]  ;;  %v4265_v12 = vmul.f32 1.442695, %v3932_v13 }
 0x751   : > { %v6964_v30 = vpop.eup %6963  ;;  %6983 = vrcp.f32 %v4648_v21  ;;  %v4683_v4 = vadd.f32 1.0, %v6962_v38  ;;  %v3588_v43 = vadd.f32 %v9541_v27, %v9019_v16  ;;  %v4032_v21 = vsub.f32 0.0, %v3812_v55 }
 0x752   : > { %v6966_v36 = vpop.eup %6965  ;;  %6985 = vrcp.f32 %v4583_v3  ;;  %v4584_v47 = vadd.f32 1.0, %v6964_v30  ;;  %v3939_v38 = vsub.f32 0.0, %v3584_v41  ;;  %v3594_v55 = vadd.f32 %v9106_v8, %v9019_v16 }
 0x753   : > { %v6968_v45 = vpop.eup %6967  ;;  %6987 = vrcp.f32 %v4683_v4  ;;  %v4669_v1 = vadd.f32 1.0, %v6966_v36  ;;  %v4267_v4 = vmul.f32 1.442695, %v3933_v15  ;;  %v4465_v36 = vmul.f32 1.442695, %v4032_v21 }
 0x754   : > { %v6970_v23 = vpop.eup %6969  ;;  %6989 = vrcp.f32 %v4584_v47  ;;  %v4590_v19 = vadd.f32 1.0, %v6968_v45  ;;  %v4279_v49 = vmul.f32 1.442695, %v3939_v38  ;;  %v4281_v45 = vmul.f32 1.442695, %v3940_v9 }
 0x755   : > { %v6972_v48 = vpop.eup %6971  ;;  %6991 = vrcp.f32 %v4669_v1  ;;  %v4690_v39 = vadd.f32 1.0, %v6970_v23  ;;  %v3953_v15 = vsub.f32 0.0, %v3594_v55  ;;  %v3954_v38 = vsub.f32 0.0, %v3596_v2 }
 0x756   : > { %v6974_v56 = vpop.eup %6973  ;;  %5103 = vst [vmem:[%s8398_s23 + $0x500] sm:$0xff] %v6972_v48  ;;  %6993 = vrcp.f32 %v4590_v19  ;;  %v9542_v19 = vld [vmem:[#allocation18_spill] sm:$0xff] }
 0x757   : > { %v6976_v17 = vpop.eup %6975  ;;  %5018 = vst [vmem:[%s8398_s23 + $0x258] sm:$0xff] %v6974_v56  ;;  %6995 = vrcp.f32 %v4690_v39  ;;  %v3590_v26 = vadd.f32 %v9542_v19, %v9065_v42 }
 0x758   : > { %v6978_v25 = vpop.eup %6977  ;;  %5089 = vst [vmem:[%s8398_s23 + $0x490] sm:$0xff] %v6976_v17  ;;  %6997 = vpow2.f32 %v4239_v14  ;;  %v4493_v14 = vmul.f32 1.442695, %v4046_v37 }
 0x759   : > { %v6980_v59 = vpop.eup %6979  ;;  %5024 = vst [vmem:[%s8398_s23 + $0x288] sm:$0xff] %v6978_v25  ;;  %6999 = vpow2.f32 %v4409_v44  ;;  %v3946_v44 = vsub.f32 0.0, %v3588_v43  ;;  %v3947_v17 = vsub.f32 0.0, %v3590_v26  ;;  %v3598_v43 = vadd.f32 %v9112_v28, %v9019_v16 }
 0x75a   : > { %v6982_v0 = vpop.eup %6981  ;;  %5110 = vst [vmem:[%s8398_s23 + $0x538] sm:$0xff] %v6980_v59  ;;  %7001 = vpow2.f32 %v4251_v33  ;;  %v3606_v28 = vadd.f32 %v9125_v5, %v9065_v42 }
 0x75b   : > { %v6984_v3 = vpop.eup %6983  ;;  %5025 = vst [vmem:[%s8398_s23 + $0x290] sm:$0xff] %v6982_v0  ;;  %7003 = vpow2.f32 %v4479_v52  ;;  %v4293_v31 = vmul.f32 1.442695, %v3946_v44  ;;  %v4295_v21 = vmul.f32 1.442695, %v3947_v17  ;;  %v3600_v0 = vadd.f32 %v9115_v32, %v9065_v42 }
 0x75c   : > { %v6986_v30 = vpop.eup %6985  ;;  %5096 = vst [vmem:[%s8398_s23 + $0x4c8] sm:$0xff] %v6984_v3  ;;  %7005 = vpow2.f32 %v4253_v20  ;;  %v3604_v3 = vadd.f32 %v9122_v7, %v9019_v16  ;;  %v3608_v32 = vadd.f32 %v9130_v22, %v9019_v16  ;;  %v4309_v22 = vmul.f32 1.442695, %v3954_v38 }
 0x75d   : > { %v6988_v53 = vpop.eup %6987  ;;  %5031 = vst [vmem:[%s8398_s23 + $0x2c0] sm:$0xff] %v6986_v30  ;;  %7007 = vpow2.f32 %v4451_v54  ;;  %v4307_v30 = vmul.f32 1.442695, %v3953_v15  ;;  %v3961_v7 = vsub.f32 0.0, %v3600_v0 }
 0x75e   : > { %v6990_v47 = vpop.eup %6989  ;;  %5131 = vst [vmem:[%s8398_s23 + $0x5e0] sm:$0xff] %v6988_v53  ;;  %7009 = vpow2.f32 %v4265_v12  ;;  %v3960_v53 = vsub.f32 0.0, %v3598_v43  ;;  %v3967_v5 = vsub.f32 0.0, %v3604_v3  ;;  %v3974_v26 = vsub.f32 0.0, %v3608_v32 }
 0x75f   : > { %v6992_v58 = vpop.eup %6991  ;;  %5032 = vst [vmem:[%s8398_s23 + $0x2c8] sm:$0xff] %v6990_v47  ;;  %7011 = vpow2.f32 %v4493_v14 }
 0x760   : > { %v6994_v1 = vpop.eup %6993  ;;  %5117 = vst [vmem:[%s8398_s23 + $0x570] sm:$0xff] %v6992_v58  ;;  %7013 = vpow2.f32 %v4267_v4  ;;  %v4349_v17 = vmul.f32 1.442695, %v3974_v26 }
 0x761   : > { %v6996_v10 = vpop.eup %6995  ;;  %5038 = vst [vmem:[%s8398_s23 + $0x2f8] sm:$0xff] %v6994_v1  ;;  %7015 = vpow2.f32 %v4465_v36  ;;  %v3614_v1 = vadd.f32 %v9138_v46, %v9019_v16  ;;  %v4323_v46 = vmul.f32 1.442695, %v3961_v7 }
 0x762   : > { %v6998_v23 = vpop.eup %6997  ;;  %5138 = vst [vmem:[%s8398_s23 + $0x618] sm:$0xff] %v6996_v10  ;;  %7017 = vpow2.f32 %v4279_v49  ;;  %v3610_v49 = vadd.f32 %v9132_v50, %v9065_v42  ;;  %v3968_v10 = vsub.f32 0.0, %v3606_v28  ;;  %v4321_v50 = vmul.f32 1.442695, %v3960_v53 }
 0x763   : > { %v7000_v6 = vpop.eup %6999  ;;  %v4591_v48 = vadd.f32 1.0, %v6998_v23  ;;  %7019 = vpow2.f32 %v4281_v45  ;;  %v3616_v23 = vadd.f32 %v9142_v24, %v9065_v42  ;;  %v4335_v24 = vmul.f32 1.442695, %v3967_v5 }
 0x764   : > { %v7002_v39 = vpop.eup %7001  ;;  %v4676_v51 = vadd.f32 1.0, %v7000_v6  ;;  %7021 = vpow2.f32 %v4293_v31  ;;  %v3618_v6 = vadd.f32 %v9146_v60, %v9019_v16  ;;  %v4337_v60 = vmul.f32 1.442695, %v3968_v10 }
 0x765   : > { %v7004_v56 = vpop.eup %7003  ;;  %7023 = vrcp.f32 %v4591_v48  ;;  %v4597_v33 = vadd.f32 1.0, %v7002_v39  ;;  %v3975_v39 = vsub.f32 0.0, %v3610_v49 }
 0x766   : > { %v7006_v13 = vpop.eup %7005  ;;  %7025 = vrcp.f32 %v4676_v51  ;;  %v4711_v41 = vadd.f32 1.0, %v7004_v56  ;;  %v3620_v51 = vadd.f32 %v9150_v61, %v9065_v42  ;;  %v3981_v56 = vsub.f32 0.0, %v3614_v1 }
 0x767   : > { %v7008_v52 = vpop.eup %7007  ;;  %7027 = vrcp.f32 %v4597_v33  ;;  %v4598_v37 = vadd.f32 1.0, %v7006_v13  ;;  %v3982_v13 = vsub.f32 0.0, %v3616_v23 }
 0x768   : > { %v7010_v25 = vpop.eup %7009  ;;  %7029 = vrcp.f32 %v4711_v41  ;;  %v4697_v20 = vadd.f32 1.0, %v7008_v52  ;;  %v3988_v52 = vsub.f32 0.0, %v3618_v6  ;;  %v3989_v2 = vsub.f32 0.0, %v3620_v51 }
 0x769   : > { %v7012_v27 = vpop.eup %7011  ;;  %7031 = vrcp.f32 %v4598_v37  ;;  %v4604_v8 = vadd.f32 1.0, %v7010_v25  ;;  %v4351_v37 = vmul.f32 1.442695, %v3975_v39 }
 0x76a   : > { %v7014_v59 = vpop.eup %7013  ;;  %7033 = vrcp.f32 %v4697_v20  ;;  %v4718_v54 = vadd.f32 1.0, %v7012_v27  ;;  %v4363_v20 = vmul.f32 1.442695, %v3981_v56  ;;  %v4365_v27 = vmul.f32 1.442695, %v3982_v13  ;;  %v9544_v56 = vld [vmem:[#allocation3_spill] sm:$0xff] }
 0x76b   : > { %v7016_v12 = vpop.eup %7015  ;;  %7035 = vrcp.f32 %v4604_v8  ;;  %v4605_v40 = vadd.f32 1.0, %v7014_v59  ;;  %v4377_v43 = vmul.f32 1.442695, %v3988_v52 }
 0x76c   : > { %v7018_v14 = vpop.eup %7017  ;;  %7037 = vrcp.f32 %v4718_v54  ;;  %v4704_v9 = vadd.f32 1.0, %v7016_v12  ;;  %v4379_v54 = vmul.f32 1.442695, %v3989_v2  ;;  %v3624_v12 = vadd.f32 %v9163_v18, %v9019_v16  ;;  %v9546_v2 = vld [vmem:[#allocation21_spill] sm:$0xff] }
 0x76d   : > { %v7020_v4 = vpop.eup %7019  ;;  %7039 = vrcp.f32 %v4605_v40  ;;  %v4611_v44 = vadd.f32 1.0, %v7018_v14  ;;  %v3628_v18 = vadd.f32 %v9173_v34, %v9019_v16 }
 0x76e   : > { %v7022_v36 = vpop.eup %7021  ;;  %7041 = vrcp.f32 %v4704_v9  ;;  %v4612_v47 = vadd.f32 1.0, %v7020_v4  ;;  %v3626_v9 = vadd.f32 %v9168_v35, %v9065_v42  ;;  %v3995_v53 = vsub.f32 0.0, %v3624_v12 }
 0x76f   : > { %v7024_v58 = vpop.eup %7023  ;;  %7043 = vrcp.f32 %v4611_v44  ;;  %v4618_v45 = vadd.f32 1.0, %v7022_v36  ;;  %v4002_v23 = vsub.f32 0.0, %v3628_v18 }
 0x770   : > { %v7026_v31 = vpop.eup %7025  ;;  %5039 = vst [vmem:[%s8398_s23 + $0x300] sm:$0xff] %v7024_v58  ;;  %7045 = vrcp.f32 %v4612_v47  ;;  %v3996_v49 = vsub.f32 0.0, %v3626_v9 }
 0x771   : > { %v7028_v19 = vpop.eup %7027  ;;  %5124 = vst [vmem:[%s8398_s23 + $0x5a8] sm:$0xff] %v7026_v31  ;;  %7047 = vrcp.f32 %v4618_v45  ;;  %v3630_v45 = vadd.f32 %v9176_v57, %v9065_v42  ;;  %v4391_v31 = vmul.f32 1.442695, %v3995_v53  ;;  %v3638_v57 = vadd.f32 %v9189_v29, %v9019_v16 }
 0x772   : > { %v7030_v48 = vpop.eup %7029  ;;  %5045 = vst [vmem:[%s8398_s23 + $0x330] sm:$0xff] %v7028_v19  ;;  %7049 = vpow2.f32 %v4295_v21  ;;  %v3636_v19 = vadd.f32 %v9186_v63, %v9065_v42  ;;  %v4393_v6 = vmul.f32 1.442695, %v3996_v49 }
 0x773   : > { %v7032_v55 = vpop.eup %7031  ;;  %5159 = vst [vmem:[%s8398_s23 + $0x6c0] sm:$0xff] %v7030_v48  ;;  %7051 = vpow2.f32 %v4307_v30  ;;  %v4003_v39 = vsub.f32 0.0, %v3630_v45 }
 0x774   : > { %v7034_v33 = vpop.eup %7033  ;;  %5046 = vst [vmem:[%s8398_s23 + $0x338] sm:$0xff] %v7032_v55  ;;  %7053 = vpow2.f32 %v4309_v22  ;;  %v3634_v22 = vadd.f32 %v9183_v62, %v9019_v16  ;;  %v9543_v62 = vld [vmem:[#allocation19_spill] sm:$0xff]  ;;  %v4010_v29 = vsub.f32 0.0, %v3636_v19 }
 0x775   : > { %v7036_v41 = vpop.eup %7035  ;;  %5145 = vst [vmem:[%s8398_s23 + $0x650] sm:$0xff] %v7034_v33  ;;  %7055 = vpow2.f32 %v4321_v50  ;;  %v3640_v51 = vadd.f32 %v9543_v62, %v9065_v42  ;;  %v3644_v33 = vadd.f32 %v9544_v56, %v9019_v16  ;;  %v9550_v62 = vld [vmem:[#allocation25_spill] sm:$0xff] }
 0x776   : > { %v7038_v61 = vpop.eup %7037  ;;  %5052 = vst [vmem:[%s8398_s23 + $0x368] sm:$0xff] %v7036_v41  ;;  %7057 = vpow2.f32 %v4323_v46  ;;  %v4009_v63 = vsub.f32 0.0, %v3634_v22  ;;  %v9545_v41 = vld [vmem:[#allocation20_spill] sm:$0xff] }
 0x777   : > { %v7040_v25 = vpop.eup %7039  ;;  %5166 = vst [vmem:[%s8398_s23 + $0x6f8] sm:$0xff] %v7038_v61  ;;  %7059 = vpow2.f32 %v4335_v24  ;;  %v4405_v61 = vmul.f32 1.442695, %v4002_v23 }
 0x778   : > { %v7042_v15 = vpop.eup %7041  ;;  %5053 = vst [vmem:[%s8398_s23 + $0x370] sm:$0xff] %v7040_v25  ;;  %7061 = vpow2.f32 %v4337_v60  ;;  %v3648_v25 = vadd.f32 %v9546_v2, %v9019_v16 }
 0x779   : > { %v7044_v8 = vpop.eup %7043  ;;  %5152 = vst [vmem:[%s8398_s23 + $0x688] sm:$0xff] %v7042_v15  ;;  %7063 = vpow2.f32 %v4349_v17  ;;  %v3646_v17 = vadd.f32 %v9545_v41, %v9065_v42  ;;  %v4407_v15 = vmul.f32 1.442695, %v4003_v39 }
 0x77a   : > { %v7046_v59 = vpop.eup %7045  ;;  %5059 = vst [vmem:[%s8398_s23 + $0x3a0] sm:$0xff] %v7044_v8  ;;  %7065 = vpow2.f32 %v4351_v37  ;;  %v4016_v37 = vsub.f32 0.0, %v3638_v57  ;;  %v9547_v8 = vld [vmem:[#allocation22_spill] sm:$0xff]  ;;  %v9549_v57 = vld [vmem:[#allocation24_spill] sm:$0xff] }
 0x77b   : > { %v7048_v21 = vpop.eup %7047  ;;  %5060 = vst [vmem:[%s8398_s23 + $0x3a8] sm:$0xff] %v7046_v59  ;;  %7067 = vpow2.f32 %v4363_v20 }
 0x77c   : > { %v7050_v0 = vpop.eup %7049  ;;  %5066 = vst [vmem:[%s8398_s23 + $0x3d8] sm:$0xff] %v7048_v21  ;;  %7069 = vpow2.f32 %v4365_v27  ;;  %v4017_v27 = vsub.f32 0.0, %v3640_v51  ;;  %v4023_v21 = vsub.f32 0.0, %v3644_v33  ;;  %v4433_v9 = vmul.f32 1.442695, %v4016_v37 }
 0x77d   : > { %v7052_v40 = vpop.eup %7051  ;;  %v4619_v38 = vadd.f32 1.0, %v7050_v0  ;;  %7071 = vpow2.f32 %v4377_v43  ;;  %v3650_v43 = vadd.f32 %v9547_v8, %v9065_v42  ;;  %v9548_v0 = vld [vmem:[#allocation23_spill] sm:$0xff]  ;;  %v3658_v51 = vadd.f32 %v9550_v62, %v9019_v16 }
 0x77e   : > { %v7054_v3 = vpop.eup %7053  ;;  %v4625_v14 = vadd.f32 1.0, %v7052_v40  ;;  %7073 = vpow2.f32 %v4379_v54  ;;  %v4419_v54 = vmul.f32 1.442695, %v4009_v63  ;;  %v3654_v12 = vadd.f32 %v9548_v0, %v9019_v16 }
 0x77f   : > { %v7056_v30 = vpop.eup %7055  ;;  %7075 = vrcp.f32 %v4619_v38  ;;  %v4626_v28 = vadd.f32 1.0, %v7054_v3  ;;  %v4421_v38 = vmul.f32 1.442695, %v4010_v29  ;;  %v4024_v3 = vsub.f32 0.0, %v3646_v17 }
 0x780   : > { %v7058_v4 = vpop.eup %7057  ;;  %7077 = vrcp.f32 %v4625_v14  ;;  %v4632_v44 = vadd.f32 1.0, %v7056_v30  ;;  %v4030_v30 = vsub.f32 0.0, %v3648_v25  ;;  %v3660_v63 = vadd.f32 %v9235_v11, %v9065_v42 }
 0x781   : > { %v7060_v32 = vpop.eup %7059  ;;  %7079 = vrcp.f32 %v4626_v28  ;;  %v4633_v36 = vadd.f32 1.0, %v7058_v4  ;;  %v4435_v4 = vmul.f32 1.442695, %v4017_v27 }
 0x782   : > { %v7062_v47 = vpop.eup %7061  ;;  %7081 = vrcp.f32 %v4632_v44  ;;  %v4639_v7 = vadd.f32 1.0, %v7060_v32  ;;  %v4031_v44 = vsub.f32 0.0, %v3650_v43  ;;  %v4447_v32 = vmul.f32 1.442695, %v4023_v21 }
 0x783   : > { %v7064_v58 = vpop.eup %7063  ;;  %7083 = vrcp.f32 %v4633_v36  ;;  %v4640_v35 = vadd.f32 1.0, %v7062_v47  ;;  %v4037_v36 = vsub.f32 0.0, %v3654_v12  ;;  %v4449_v47 = vmul.f32 1.442695, %v4024_v3 }
 0x784   : > { %v7066_v5 = vpop.eup %7065  ;;  %7085 = vrcp.f32 %v4639_v7  ;;  %v4646_v1 = vadd.f32 1.0, %v7064_v58  ;;  %v4461_v49 = vmul.f32 1.442695, %v4030_v30  ;;  %v4045_v37 = vsub.f32 0.0, %v3660_v63 }
 0x785   : > { %v7068_v10 = vpop.eup %7067  ;;  %7087 = vrcp.f32 %v4640_v35  ;;  %v4647_v34 = vadd.f32 1.0, %v7066_v5  ;;  %v4463_v35 = vmul.f32 1.442695, %v4031_v44  ;;  %v4475_v5 = vmul.f32 1.442695, %v4037_v36 }
 0x786   : > { %v7070_v50 = vpop.eup %7069  ;;  %7089 = vrcp.f32 %v4646_v1  ;;  %v4653_v26 = vadd.f32 1.0, %v7068_v10 }
 0x787   : > { %v7072_v48 = vpop.eup %7071  ;;  %7091 = vrcp.f32 %v4647_v34  ;;  %v4654_v46 = vadd.f32 1.0, %v7070_v50 }
 0x788   : > { %v7074_v55 = vpop.eup %7073  ;;  %7093 = vrcp.f32 %v4653_v26  ;;  %v4660_v24 = vadd.f32 1.0, %v7072_v48  ;;  %v3656_v48 = vadd.f32 %v9549_v57, %v9065_v42 }
 0x789   : > { %v7076_v60 = vpop.eup %7075  ;;  %7095 = vrcp.f32 %v4654_v46  ;;  %v4661_v13 = vadd.f32 1.0, %v7074_v55 }
 0x78a   : > { %v7078_v52 = vpop.eup %7077  ;;  %5067 = vst [vmem:[%s8398_s23 + $0x3e0] sm:$0xff] %v7076_v60  ;;  %7097 = vrcp.f32 %v4660_v24  ;;  %v4038_v29 = vsub.f32 0.0, %v3656_v48 }
 0x78b   : > { %v7080_v20 = vpop.eup %7079  ;;  %5073 = vst [vmem:[%s8398_s23 + $0x410] sm:$0xff] %v7078_v52  ;;  %7099 = vrcp.f32 %v4661_v13  ;;  %v4044_v52 = vsub.f32 0.0, %v3658_v51 }
 0x78c   : > { %v7082_v59 = vpop.eup %7081  ;;  %5074 = vst [vmem:[%s8398_s23 + $0x418] sm:$0xff] %v7080_v20  ;;  %7101 = vpow2.f32 %v4391_v31  ;;  %v4477_v20 = vmul.f32 1.442695, %v4038_v29 }
 0x78d   : > { %v7084_v40 = vpop.eup %7083  ;;  %5080 = vst [vmem:[%s8398_s23 + $0x448] sm:$0xff] %v7082_v59  ;;  %7103 = vpow2.f32 %v4393_v6  ;;  %v4489_v8 = vmul.f32 1.442695, %v4044_v52  ;;  %v4491_v59 = vmul.f32 1.442695, %v4045_v37 }
 0x78e   : > { %v7086_v14 = vpop.eup %7085  ;;  %5081 = vst [vmem:[%s8398_s23 + $0x450] sm:$0xff] %v7084_v40  ;;  %7105 = vpow2.f32 %v4405_v61 }
 0x78f   : > { %v7088_v28 = vpop.eup %7087  ;;  %5087 = vst [vmem:[%s8398_s23 + $0x480] sm:$0xff] %v7086_v14  ;;  %7107 = vpow2.f32 %v4407_v15 }
 0x790   : > { %v7090_v53 = vpop.eup %7089  ;;  %5088 = vst [vmem:[%s8398_s23 + $0x488] sm:$0xff] %v7088_v28  ;;  %7109 = vpow2.f32 %v4419_v54 }
 0x791   : > { %v7092_v18 = vpop.eup %7091  ;;  %5094 = vst [vmem:[%s8398_s23 + $0x4b8] sm:$0xff] %v7090_v53  ;;  %7111 = vpow2.f32 %v4421_v38 }
 0x792   : > { %v7094_v7 = vpop.eup %7093  ;;  %5095 = vst [vmem:[%s8398_s23 + $0x4c0] sm:$0xff] %v7092_v18  ;;  %7113 = vpow2.f32 %v4433_v9 }
 0x793   : > { %v7096_v58 = vpop.eup %7095  ;;  %5101 = vst [vmem:[%s8398_s23 + $0x4f0] sm:$0xff] %v7094_v7  ;;  %7115 = vpow2.f32 %v4435_v4 }
 0x794   : > { %v7098_v45 = vpop.eup %7097  ;;  %5102 = vst [vmem:[%s8398_s23 + $0x4f8] sm:$0xff] %v7096_v58  ;;  %7117 = vpow2.f32 %v4447_v32 }
 0x795   : > { %v7100_v1 = vpop.eup %7099  ;;  %5108 = vst [vmem:[%s8398_s23 + $0x528] sm:$0xff] %v7098_v45  ;;  %7119 = vpow2.f32 %v4449_v47 }
 0x796   : > { %v7102_v31 = vpop.eup %7101  ;;  %5109 = vst [vmem:[%s8398_s23 + $0x530] sm:$0xff] %v7100_v1  ;;  %7121 = vpow2.f32 %v4461_v49 }
 0x797   : > { %v7104_v22 = vpop.eup %7103  ;;  %v4667_v10 = vadd.f32 1.0, %v7102_v31  ;;  %7123 = vpow2.f32 %v4463_v35 }
 0x798   : > { %v7106_v34 = vpop.eup %7105  ;;  %v4668_v23 = vadd.f32 1.0, %v7104_v22  ;;  %7125 = vpow2.f32 %v4475_v5 }
 0x799   : > { %v7108_v19 = vpop.eup %7107  ;;  %7127 = vrcp.f32 %v4667_v10  ;;  %v4674_v50 = vadd.f32 1.0, %v7106_v34 }
 0x79a   : > { %v7110_v26 = vpop.eup %7109  ;;  %7129 = vrcp.f32 %v4668_v23  ;;  %v4675_v6 = vadd.f32 1.0, %v7108_v19 }
 0x79b   : > { %v7112_v46 = vpop.eup %7111  ;;  %7131 = vrcp.f32 %v4674_v50  ;;  %v4681_v39 = vadd.f32 1.0, %v7110_v26 }
 0x79c   : > { %v7114_v55 = vpop.eup %7113  ;;  %7133 = vrcp.f32 %v4675_v6  ;;  %v4682_v24 = vadd.f32 1.0, %v7112_v46 }
 0x79d   : > { %v7116_v56 = vpop.eup %7115  ;;  %7135 = vrcp.f32 %v4681_v39  ;;  %v4688_v33 = vadd.f32 1.0, %v7114_v55 }
 0x79e   : > { %v7118_v60 = vpop.eup %7117  ;;  %7137 = vrcp.f32 %v4682_v24  ;;  %v4689_v13 = vadd.f32 1.0, %v7116_v56 }
 0x79f   : > { %v7120_v41 = vpop.eup %7119  ;;  %7139 = vrcp.f32 %v4688_v33  ;;  %v4695_v17 = vadd.f32 1.0, %v7118_v60 }
 0x7a0   : > { %v7122_v61 = vpop.eup %7121  ;;  %7141 = vrcp.f32 %v4689_v13  ;;  %v4696_v16 = vadd.f32 1.0, %v7120_v41 }
 0x7a1   : > { %v7124_v2 = vpop.eup %7123  ;;  %7143 = vrcp.f32 %v4695_v17  ;;  %v4702_v42 = vadd.f32 1.0, %v7122_v61 }
 0x7a2   : > { %v7126_v11 = vpop.eup %7125  ;;  %7145 = vrcp.f32 %v4696_v16  ;;  %v4703_v25 = vadd.f32 1.0, %v7124_v2 }
 0x7a3   : > { %v7128_v15 = vpop.eup %7127  ;;  %7147 = vrcp.f32 %v4702_v42  ;;  %v4709_v27 = vadd.f32 1.0, %v7126_v11 }
 0x7a4   : > { %v7130_v43 = vpop.eup %7129  ;;  %5115 = vst [vmem:[%s8398_s23 + $0x560] sm:$0xff] %v7128_v15  ;;  %7149 = vrcp.f32 %v4703_v25 }
 0x7a5   : > { %v7132_v54 = vpop.eup %7131  ;;  %5116 = vst [vmem:[%s8398_s23 + $0x568] sm:$0xff] %v7130_v43  ;;  %7151 = vrcp.f32 %v4709_v27 }
 0x7a6   : > { %v7134_v21 = vpop.eup %7133  ;;  %5122 = vst [vmem:[%s8398_s23 + $0x598] sm:$0xff] %v7132_v54  ;;  %7153 = vpow2.f32 %v4477_v20 }
 0x7a7   : > { %v7136_v0 = vpop.eup %7135  ;;  %5123 = vst [vmem:[%s8398_s23 + $0x5a0] sm:$0xff] %v7134_v21  ;;  %7155 = vpow2.f32 %v4489_v8 }
 0x7a8   : > { %v7138_v12 = vpop.eup %7137  ;;  %5129 = vst [vmem:[%s8398_s23 + $0x5d0] sm:$0xff] %v7136_v0  ;;  %7157 = vpow2.f32 %v4491_v59 }
 0x7a9   : > { %v7140_v40 = vpop.eup %7139  ;;  %5130 = vst [vmem:[%s8398_s23 + $0x5d8] sm:$0xff] %v7138_v12 }
 0x7aa   : > { %v7142_v38 = vpop.eup %7141  ;;  %5136 = vst [vmem:[%s8398_s23 + $0x608] sm:$0xff] %v7140_v40 }
 0x7ab   : > { %v7144_v3 = vpop.eup %7143  ;;  %5137 = vst [vmem:[%s8398_s23 + $0x610] sm:$0xff] %v7142_v38 }
 0x7ac   : > { %v7146_v14 = vpop.eup %7145  ;;  %5143 = vst [vmem:[%s8398_s23 + $0x640] sm:$0xff] %v7144_v3 }
 0x7ad   : > { %v7148_v9 = vpop.eup %7147  ;;  %5144 = vst [vmem:[%s8398_s23 + $0x648] sm:$0xff] %v7146_v14 }
 0x7ae   : > { %v7150_v30 = vpop.eup %7149  ;;  %5150 = vst [vmem:[%s8398_s23 + $0x678] sm:$0xff] %v7148_v9 }
 0x7af   : > { %v7152_v28 = vpop.eup %7151  ;;  %5151 = vst [vmem:[%s8398_s23 + $0x680] sm:$0xff] %v7150_v30 }
 0x7b0   : > { %v7154_v4 = vpop.eup %7153  ;;  %5157 = vst [vmem:[%s8398_s23 + $0x6b0] sm:$0xff] %v7152_v28 }
 0x7b1   : > { %v7156_v44 = vpop.eup %7155  ;;  %v4710_v53 = vadd.f32 1.0, %v7154_v4 }
 0x7b2   : > { %v7158_v32 = vpop.eup %7157  ;;  %v4716_v36 = vadd.f32 1.0, %v7156_v44 }
 0x7b3   : > { %7159 = vrcp.f32 %v4710_v53  ;;  %v4717_v18 = vadd.f32 1.0, %v7158_v32 }
 0x7b4   : > { %7161 = vrcp.f32 %v4716_v36 }
 0x7b5   : > { %7163 = vrcp.f32 %v4717_v18 }
 0x7bd   : > { %v7160_v47 = vpop.eup %7159 }
 0x7be   : > { %v7162_v7 = vpop.eup %7161  ;;  %5158 = vst [vmem:[%s8398_s23 + $0x6b8] sm:$0xff] %v7160_v47 }
 0x7bf   : > { %v7164_v49 = vpop.eup %7163  ;;  %5164 = vst [vmem:[%s8398_s23 + $0x6e8] sm:$0xff] %v7162_v7 }
 0x7c0   : > { %5165 = vst [vmem:[%s8398_s23 + $0x6f0] sm:$0xff] %v7164_v49 }
 0x7c1 PF: > { %s20_s30 = sadd.s32 1, %s7171_s30  }
 0x7c2   : > { %p17_p4 = scmp.ge.s32.totalorder %s20_s30, 4  }
 0x7c4   :  { %19 = sbr.rel (!%p17_p4) target bundleno = 1 (0x1), region = 95 }

</bundles_post_ra>
